<compile_context>
chip_gen: v6e
topology: v6e:2x2x1
jax: 0.10.0
libtpu: 0.0.40
codegen_flags: <defaults>
</compile_context>

<pallas_src>
import functools
import math

import jax
import jax.numpy as jnp
from jax import lax
from jax.experimental import pallas as pl
from jax.experimental.pallas import tpu as pltpu


# ----------------------------------------------------------------------------
# Fused kernel: gate + grouped 3x3 conv + BN + PReLU + gating, per batch element
# ----------------------------------------------------------------------------
def _effpw_kernel(x_ref, mask_ref, scale_ref, shift_ref, alpha_ref,
                  wwt_ref, wconv_ref, o_ref, xpad_ref,
                  *, H, W, cout, groups, cinpg, coutpg):
    HW = H * W
    cin = groups * cinpg
    xf = x_ref[0]                                            # (Cin, HW), lane-dense

    # ---- wt_layer: sigmoid(W_wt @ global_avg_pool(x)), scalar-weight FMAs (no MXU) ----
    s_col = jnp.sum(xf, axis=1, keepdims=True) * (1.0 / HW)  # (Cin, 1) spatial means
    z_rows = []
    for co in range(cout):
        zc = s_col[0:1, :] * wwt_ref[co, 0]
        for ci in range(1, cin):
            zc = zc + s_col[ci:ci + 1, :] * wwt_ref[co, ci]
        z_rows.append(zc)                                    # each (1, 1)
    z = jnp.concatenate(z_rows, axis=0)                      # (Cout, 1)
    wts = 1.0 / (1.0 + jnp.exp(-z))                          # sigmoid, (Cout, 1)

    # ---- zero-padded flattened input plane (in-VMEM halo, no host-side pad) ----
    P = W + 1                                                # flat pad on each side
    xpad_ref[...] = jnp.zeros(xpad_ref.shape, xpad_ref.dtype)
    xpad_ref[:, P:P + HW] = xf

    # 9 shifted/masked taps shared by all output channels (lane-dense (Cin, HW) slabs)
    not_left = mask_ref[0:1, :]                              # zero where w == 0
    not_right = mask_ref[1:2, :]                             # zero where w == W-1
    taps = []
    for dy in (-1, 0, 1):
        for dx in (-1, 0, 1):
            s = P + dy * W + dx
            t = xpad_ref[:, s:s + HW]                        # (Cin, HW)
            if dx == -1:
                t = t * not_left
            elif dx == 1:
                t = t * not_right
            taps.append(t)

    # ---- grouped 3x3 conv: per-output-channel scalar-weight FMAs on lane-dense rows ----
    # (channel counts are tiny here; for large Cout this loop should be vectorized
    #  across sublanes instead of unrolled)
    rows = []
    for co in range(cout):
        g = co // coutpg
        acc = None
        for ci in range(cinpg):
            cidx = g * cinpg + ci
            for k in range(9):
                term = taps[k][cidx:cidx + 1, :] * wconv_ref[co, ci * 9 + k]
                acc = term if acc is None else acc + term
        rows.append(acc)                                     # each (1, HW)
    y = jnp.concatenate(rows, axis=0)                        # (Cout, HW)

    # ---- fused BN (eval) + PReLU + gate scaling ----
    y = y * scale_ref[...] + shift_ref[...]
    y = jnp.where(y >= 0.0, y, alpha_ref[...] * y)
    y = y * wts
    o_ref[0] = y.astype(o_ref.dtype)                         # lane-dense (Cout, HW) store


# ----------------------------------------------------------------------------
# Wrapper: NCHW in / NCHW out, single pallas_call
# ----------------------------------------------------------------------------
def efficient_pw_conv_forward(x_nchw, prm):
    x = x_nchw.astype(jnp.float32)
    N, Cin, H, W = x.shape
    w_conv = prm["w_conv"].astype(jnp.float32)               # (Cout, Cin/groups, 3, 3)
    Cout, cinpg = w_conv.shape[0], w_conv.shape[1]
    groups = Cin // cinpg
    coutpg = Cout // groups
    HW = H * W

    x_flat = x.reshape(N, Cin, HW)                           # free reshape, stays NCHW-major
    wconv_flat = w_conv.reshape(Cout, cinpg * 9)
    wwt = prm["w_wt"].astype(jnp.float32)                    # (Cout, Cin)
    scale = prm["bn_scale"].reshape(Cout, 1).astype(jnp.float32)
    shift = prm["bn_shift"].reshape(Cout, 1).astype(jnp.float32)
    alpha = prm["prelu_alpha"].reshape(Cout, 1).astype(jnp.float32)

    # edge-column masks for the dx = -1 / +1 taps in flattened (h*W + w) lane layout
    col = jnp.arange(HW, dtype=jnp.int32) % W
    masks = jnp.stack([(col != 0), (col != W - 1)]).astype(jnp.float32)   # (2, HW)

    kernel = functools.partial(_effpw_kernel, H=H, W=W, cout=Cout,
                               groups=groups, cinpg=cinpg, coutpg=coutpg)

    out = pl.pallas_call(
        kernel,
        out_shape=jax.ShapeDtypeStruct((N, Cout, HW), jnp.float32),
        grid=(N,),
        in_specs=[
            pl.BlockSpec((1, Cin, HW), lambda n: (n, 0, 0)),        # activations
            pl.BlockSpec((2, HW), lambda n: (0, 0)),                # edge masks
            pl.BlockSpec((Cout, 1), lambda n: (0, 0)),              # BN scale
            pl.BlockSpec((Cout, 1), lambda n: (0, 0)),              # BN shift
            pl.BlockSpec((Cout, 1), lambda n: (0, 0)),              # PReLU alpha
            pl.BlockSpec(memory_space=pltpu.MemorySpace.SMEM),      # gate 1x1 weight
            pl.BlockSpec(memory_space=pltpu.MemorySpace.SMEM),      # grouped 3x3 weight
        ],
        out_specs=pl.BlockSpec((1, Cout, HW), lambda n: (n, 0, 0)),
        scratch_shapes=[pltpu.VMEM((Cin, HW + 2 * (W + 1)), jnp.float32)],
        compiler_params=pltpu.CompilerParams(dimension_semantics=("parallel",)),
    )(x_flat, masks, scale, shift, alpha, wwt, wconv_flat)

    return out.reshape(N, Cout, H, W)                        # already NCHW


# ----------------------------------------------------------------------------
# Pure-JAX reference for validation
# ----------------------------------------------------------------------------
def ref_forward(x, prm):
    HI = lax.Precision.HIGHEST
    N, Cin, H, W = x.shape
    groups = Cin // prm["w_conv"].shape[1]
    m = jnp.mean(x, axis=(2, 3))                                         # (N, Cin)
    z = jnp.einsum("nc,oc->no", m, prm["w_wt"], precision=HI)            # (N, Cout)
    wts = jax.nn.sigmoid(z)[:, :, None, None]
    y = lax.conv_general_dilated(x, prm["w_conv"], (1, 1), "SAME",
                                 dimension_numbers=("NCHW", "OIHW", "NCHW"),
                                 feature_group_count=groups, precision=HI)
    y = y * prm["bn_scale"][None, :, None, None] + prm["bn_shift"][None, :, None, None]
    y = jnp.where(y >= 0, y, prm["prelu_alpha"][None, :, None, None] * y)
    return y * wts


# ----------------------------------------------------------------------------
# Deterministic synthetic parameters (eval-mode BN folded into scale/shift)
# ----------------------------------------------------------------------------
def make_params(key, nin, nout):
    groups = math.gcd(nin, nout)
    cinpg = nin // groups
    ks = iter(jax.random.split(key, 8))

    def nrm(shape, s=0.3):
        return s * jax.random.normal(next(ks), shape, jnp.float32)

    gamma = 1.0 + nrm((nout,), 0.1)
    beta = nrm((nout,), 0.1)
    mean = nrm((nout,), 0.2)
    var = 0.5 + jax.random.uniform(next(ks), (nout,), jnp.float32)
    scale = gamma * lax.rsqrt(var + 1e-5)
    shift = beta - mean * scale
    return {
        "w_wt": nrm((nout, nin), 0.5),             # gate 1x1 conv weight (O, I)
        "w_conv": nrm((nout, cinpg, 3, 3), 0.4),   # grouped 3x3 conv weight (OIHW)
        "bn_scale": scale,
        "bn_shift": shift,
        "prelu_alpha": 0.25 + nrm((nout,), 0.05),
    }


if __name__ == "__main__":
    key = jax.random.PRNGKey(0)
    kx, kp = jax.random.split(key)

    N, Cin, H, W = 2, 4, 16, 16
    Cout = 8

    x = jax.random.normal(kx, (N, Cin, H, W), jnp.float32)
    prm = make_params(kp, Cin, Cout)

    out = jax.block_until_ready(efficient_pw_conv_forward(x, prm))
    ref = jax.block_until_ready(ref_forward(x, prm))

    assert out.shape == (N, Cout, H, W), out.shape
    assert bool(jnp.isfinite(out).all())
    err = float(jnp.max(jnp.abs(out - ref)))
    if err > 2e-3:
        raise AssertionError(f"Pallas output mismatch vs JAX reference, max abs err = {err}")
    print("KERNEL_OK")
</pallas_src>

<mosaic_0001>
module attributes {stable_mosaic.version = 11 : i64} {
  func.func @_effpw_kernel(%arg0: i32, %arg1: memref<1x4x256xf32, #tpu.memory_space<vmem>>, %arg2: memref<2x256xf32, #tpu.memory_space<vmem>>, %arg3: memref<8x1xf32, #tpu.memory_space<vmem>>, %arg4: memref<8x1xf32, #tpu.memory_space<vmem>>, %arg5: memref<8x1xf32, #tpu.memory_space<vmem>>, %arg6: memref<8x4xf32, #tpu.memory_space<smem>>, %arg7: memref<8x9xf32, #tpu.memory_space<smem>>, %arg8: memref<1x8x256xf32, #tpu.memory_space<vmem>>, %arg9: memref<4x290xf32, #tpu.memory_space<vmem>>) attributes {dimension_semantics = [#tpu.dimension_semantics<parallel>], iteration_bounds = array<i64: 2>, scalar_prefetch = 0 : i64, scratch_operands = 1 : i64, tpu.core_type = #tpu.core_type<tc>, window_params = [{transform_indices = @transform_0, window_bounds = array<i64: 1, 4, 256>}, {pipeline_mode = #tpu.pipeline_mode<synchronous>, transform_indices = @transform_1, window_bounds = array<i64: 2, 256>}, {pipeline_mode = #tpu.pipeline_mode<synchronous>, transform_indices = @transform_2, window_bounds = array<i64: 8, 1>}, {pipeline_mode = #tpu.pipeline_mode<synchronous>, transform_indices = @transform_3, window_bounds = array<i64: 8, 1>}, {pipeline_mode = #tpu.pipeline_mode<synchronous>, transform_indices = @transform_4, window_bounds = array<i64: 8, 1>}, {transform_indices = @transform_5, window_bounds = array<i64: 8, 4>}, {transform_indices = @transform_6, window_bounds = array<i64: 8, 9>}, {transform_indices = @transform_7, window_bounds = array<i64: 1, 8, 256>}]} {
    %c0 = arith.constant 0 : index
    %c0_0 = arith.constant 0 : index
    %c0_1 = arith.constant 0 : index
    %0 = vector.load %arg1[%c0, %c0_0, %c0_1] : memref<1x4x256xf32, #tpu.memory_space<vmem>>, vector<1x4x256xf32>
    %1 = vector.shape_cast %0 : vector<1x4x256xf32> to vector<4x256xf32>
    %cst = arith.constant dense<0.000000e+00> : vector<4xf32>
    %2 = vector.multi_reduction <add>, %1, %cst [1] : vector<4x256xf32> to vector<4xf32>
    %3 = vector.shape_cast %2 : vector<4xf32> to vector<4x1xf32>
    %cst_2 = arith.constant 3.906250e-03 : f32
    %4 = vector.broadcast %cst_2 : f32 to vector<4x1xf32>
    %5 = arith.mulf %3, %4 : vector<4x1xf32>
    %6 = vector.extract_strided_slice %5 {offsets = [0, 0], sizes = [1, 1], strides = [1, 1]} : vector<4x1xf32> to vector<1x1xf32>
    %c0_3 = arith.constant 0 : index
    %c0_4 = arith.constant 0 : index
    %7 = memref.load %arg6[%c0_3, %c0_4] : memref<8x4xf32, #tpu.memory_space<smem>>
    %8 = vector.broadcast %7 : f32 to vector<1x1xf32>
    %9 = arith.mulf %6, %8 : vector<1x1xf32>
    %10 = vector.extract_strided_slice %5 {offsets = [1, 0], sizes = [1, 1], strides = [1, 1]} : vector<4x1xf32> to vector<1x1xf32>
    %c0_5 = arith.constant 0 : index
    %c1 = arith.constant 1 : index
    %11 = memref.load %arg6[%c0_5, %c1] : memref<8x4xf32, #tpu.memory_space<smem>>
    %12 = vector.broadcast %11 : f32 to vector<1x1xf32>
    %13 = arith.mulf %10, %12 : vector<1x1xf32>
    %14 = arith.addf %9, %13 : vector<1x1xf32>
    %15 = vector.extract_strided_slice %5 {offsets = [2, 0], sizes = [1, 1], strides = [1, 1]} : vector<4x1xf32> to vector<1x1xf32>
    %c0_6 = arith.constant 0 : index
    %c2 = arith.constant 2 : index
    %16 = memref.load %arg6[%c0_6, %c2] : memref<8x4xf32, #tpu.memory_space<smem>>
    %17 = vector.broadcast %16 : f32 to vector<1x1xf32>
    %18 = arith.mulf %15, %17 : vector<1x1xf32>
    %19 = arith.addf %14, %18 : vector<1x1xf32>
    %20 = vector.extract_strided_slice %5 {offsets = [3, 0], sizes = [1, 1], strides = [1, 1]} : vector<4x1xf32> to vector<1x1xf32>
    %c0_7 = arith.constant 0 : index
    %c3 = arith.constant 3 : index
    %21 = memref.load %arg6[%c0_7, %c3] : memref<8x4xf32, #tpu.memory_space<smem>>
    %22 = vector.broadcast %21 : f32 to vector<1x1xf32>
    %23 = arith.mulf %20, %22 : vector<1x1xf32>
    %24 = arith.addf %19, %23 : vector<1x1xf32>
    %25 = vector.extract_strided_slice %5 {offsets = [0, 0], sizes = [1, 1], strides = [1, 1]} : vector<4x1xf32> to vector<1x1xf32>
    %c1_8 = arith.constant 1 : index
    %c0_9 = arith.constant 0 : index
    %26 = memref.load %arg6[%c1_8, %c0_9] : memref<8x4xf32, #tpu.memory_space<smem>>
    %27 = vector.broadcast %26 : f32 to vector<1x1xf32>
    %28 = arith.mulf %25, %27 : vector<1x1xf32>
    %29 = vector.extract_strided_slice %5 {offsets = [1, 0], sizes = [1, 1], strides = [1, 1]} : vector<4x1xf32> to vector<1x1xf32>
    %c1_10 = arith.constant 1 : index
    %c1_11 = arith.constant 1 : index
    %30 = memref.load %arg6[%c1_10, %c1_11] : memref<8x4xf32, #tpu.memory_space<smem>>
    %31 = vector.broadcast %30 : f32 to vector<1x1xf32>
    %32 = arith.mulf %29, %31 : vector<1x1xf32>
    %33 = arith.addf %28, %32 : vector<1x1xf32>
    %34 = vector.extract_strided_slice %5 {offsets = [2, 0], sizes = [1, 1], strides = [1, 1]} : vector<4x1xf32> to vector<1x1xf32>
    %c1_12 = arith.constant 1 : index
    %c2_13 = arith.constant 2 : index
    %35 = memref.load %arg6[%c1_12, %c2_13] : memref<8x4xf32, #tpu.memory_space<smem>>
    %36 = vector.broadcast %35 : f32 to vector<1x1xf32>
    %37 = arith.mulf %34, %36 : vector<1x1xf32>
    %38 = arith.addf %33, %37 : vector<1x1xf32>
    %39 = vector.extract_strided_slice %5 {offsets = [3, 0], sizes = [1, 1], strides = [1, 1]} : vector<4x1xf32> to vector<1x1xf32>
    %c1_14 = arith.constant 1 : index
    %c3_15 = arith.constant 3 : index
    %40 = memref.load %arg6[%c1_14, %c3_15] : memref<8x4xf32, #tpu.memory_space<smem>>
    %41 = vector.broadcast %40 : f32 to vector<1x1xf32>
    %42 = arith.mulf %39, %41 : vector<1x1xf32>
    %43 = arith.addf %38, %42 : vector<1x1xf32>
    %44 = vector.extract_strided_slice %5 {offsets = [0, 0], sizes = [1, 1], strides = [1, 1]} : vector<4x1xf32> to vector<1x1xf32>
    %c2_16 = arith.constant 2 : index
    %c0_17 = arith.constant 0 : index
    %45 = memref.load %arg6[%c2_16, %c0_17] : memref<8x4xf32, #tpu.memory_space<smem>>
    %46 = vector.broadcast %45 : f32 to vector<1x1xf32>
    %47 = arith.mulf %44, %46 : vector<1x1xf32>
    %48 = vector.extract_strided_slice %5 {offsets = [1, 0], sizes = [1, 1], strides = [1, 1]} : vector<4x1xf32> to vector<1x1xf32>
    %c2_18 = arith.constant 2 : index
    %c1_19 = arith.constant 1 : index
    %49 = memref.load %arg6[%c2_18, %c1_19] : memref<8x4xf32, #tpu.memory_space<smem>>
    %50 = vector.broadcast %49 : f32 to vector<1x1xf32>
    %51 = arith.mulf %48, %50 : vector<1x1xf32>
    %52 = arith.addf %47, %51 : vector<1x1xf32>
    %53 = vector.extract_strided_slice %5 {offsets = [2, 0], sizes = [1, 1], strides = [1, 1]} : vector<4x1xf32> to vector<1x1xf32>
    %c2_20 = arith.constant 2 : index
    %c2_21 = arith.constant 2 : index
    %54 = memref.load %arg6[%c2_20, %c2_21] : memref<8x4xf32, #tpu.memory_space<smem>>
    %55 = vector.broadcast %54 : f32 to vector<1x1xf32>
    %56 = arith.mulf %53, %55 : vector<1x1xf32>
    %57 = arith.addf %52, %56 : vector<1x1xf32>
    %58 = vector.extract_strided_slice %5 {offsets = [3, 0], sizes = [1, 1], strides = [1, 1]} : vector<4x1xf32> to vector<1x1xf32>
    %c2_22 = arith.constant 2 : index
    %c3_23 = arith.constant 3 : index
    %59 = memref.load %arg6[%c2_22, %c3_23] : memref<8x4xf32, #tpu.memory_space<smem>>
    %60 = vector.broadcast %59 : f32 to vector<1x1xf32>
    %61 = arith.mulf %58, %60 : vector<1x1xf32>
    %62 = arith.addf %57, %61 : vector<1x1xf32>
    %63 = vector.extract_strided_slice %5 {offsets = [0, 0], sizes = [1, 1], strides = [1, 1]} : vector<4x1xf32> to vector<1x1xf32>
    %c3_24 = arith.constant 3 : index
    %c0_25 = arith.constant 0 : index
    %64 = memref.load %arg6[%c3_24, %c0_25] : memref<8x4xf32, #tpu.memory_space<smem>>
    %65 = vector.broadcast %64 : f32 to vector<1x1xf32>
    %66 = arith.mulf %63, %65 : vector<1x1xf32>
    %67 = vector.extract_strided_slice %5 {offsets = [1, 0], sizes = [1, 1], strides = [1, 1]} : vector<4x1xf32> to vector<1x1xf32>
    %c3_26 = arith.constant 3 : index
    %c1_27 = arith.constant 1 : index
    %68 = memref.load %arg6[%c3_26, %c1_27] : memref<8x4xf32, #tpu.memory_space<smem>>
    %69 = vector.broadcast %68 : f32 to vector<1x1xf32>
    %70 = arith.mulf %67, %69 : vector<1x1xf32>
    %71 = arith.addf %66, %70 : vector<1x1xf32>
    %72 = vector.extract_strided_slice %5 {offsets = [2, 0], sizes = [1, 1], strides = [1, 1]} : vector<4x1xf32> to vector<1x1xf32>
    %c3_28 = arith.constant 3 : index
    %c2_29 = arith.constant 2 : index
    %73 = memref.load %arg6[%c3_28, %c2_29] : memref<8x4xf32, #tpu.memory_space<smem>>
    %74 = vector.broadcast %73 : f32 to vector<1x1xf32>
    %75 = arith.mulf %72, %74 : vector<1x1xf32>
    %76 = arith.addf %71, %75 : vector<1x1xf32>
    %77 = vector.extract_strided_slice %5 {offsets = [3, 0], sizes = [1, 1], strides = [1, 1]} : vector<4x1xf32> to vector<1x1xf32>
    %c3_30 = arith.constant 3 : index
    %c3_31 = arith.constant 3 : index
    %78 = memref.load %arg6[%c3_30, %c3_31] : memref<8x4xf32, #tpu.memory_space<smem>>
    %79 = vector.broadcast %78 : f32 to vector<1x1xf32>
    %80 = arith.mulf %77, %79 : vector<1x1xf32>
    %81 = arith.addf %76, %80 : vector<1x1xf32>
    %82 = vector.extract_strided_slice %5 {offsets = [0, 0], sizes = [1, 1], strides = [1, 1]} : vector<4x1xf32> to vector<1x1xf32>
    %c4 = arith.constant 4 : index
    %c0_32 = arith.constant 0 : index
    %83 = memref.load %arg6[%c4, %c0_32] : memref<8x4xf32, #tpu.memory_space<smem>>
    %84 = vector.broadcast %83 : f32 to vector<1x1xf32>
    %85 = arith.mulf %82, %84 : vector<1x1xf32>
    %86 = vector.extract_strided_slice %5 {offsets = [1, 0], sizes = [1, 1], strides = [1, 1]} : vector<4x1xf32> to vector<1x1xf32>
    %c4_33 = arith.constant 4 : index
    %c1_34 = arith.constant 1 : index
    %87 = memref.load %arg6[%c4_33, %c1_34] : memref<8x4xf32, #tpu.memory_space<smem>>
    %88 = vector.broadcast %87 : f32 to vector<1x1xf32>
    %89 = arith.mulf %86, %88 : vector<1x1xf32>
    %90 = arith.addf %85, %89 : vector<1x1xf32>
    %91 = vector.extract_strided_slice %5 {offsets = [2, 0], sizes = [1, 1], strides = [1, 1]} : vector<4x1xf32> to vector<1x1xf32>
    %c4_35 = arith.constant 4 : index
    %c2_36 = arith.constant 2 : index
    %92 = memref.load %arg6[%c4_35, %c2_36] : memref<8x4xf32, #tpu.memory_space<smem>>
    %93 = vector.broadcast %92 : f32 to vector<1x1xf32>
    %94 = arith.mulf %91, %93 : vector<1x1xf32>
    %95 = arith.addf %90, %94 : vector<1x1xf32>
    %96 = vector.extract_strided_slice %5 {offsets = [3, 0], sizes = [1, 1], strides = [1, 1]} : vector<4x1xf32> to vector<1x1xf32>
    %c4_37 = arith.constant 4 : index
    %c3_38 = arith.constant 3 : index
    %97 = memref.load %arg6[%c4_37, %c3_38] : memref<8x4xf32, #tpu.memory_space<smem>>
    %98 = vector.broadcast %97 : f32 to vector<1x1xf32>
    %99 = arith.mulf %96, %98 : vector<1x1xf32>
    %100 = arith.addf %95, %99 : vector<1x1xf32>
    %101 = vector.extract_strided_slice %5 {offsets = [0, 0], sizes = [1, 1], strides = [1, 1]} : vector<4x1xf32> to vector<1x1xf32>
    %c5 = arith.constant 5 : index
    %c0_39 = arith.constant 0 : index
    %102 = memref.load %arg6[%c5, %c0_39] : memref<8x4xf32, #tpu.memory_space<smem>>
    %103 = vector.broadcast %102 : f32 to vector<1x1xf32>
    %104 = arith.mulf %101, %103 : vector<1x1xf32>
    %105 = vector.extract_strided_slice %5 {offsets = [1, 0], sizes = [1, 1], strides = [1, 1]} : vector<4x1xf32> to vector<1x1xf32>
    %c5_40 = arith.constant 5 : index
    %c1_41 = arith.constant 1 : index
    %106 = memref.load %arg6[%c5_40, %c1_41] : memref<8x4xf32, #tpu.memory_space<smem>>
    %107 = vector.broadcast %106 : f32 to vector<1x1xf32>
    %108 = arith.mulf %105, %107 : vector<1x1xf32>
    %109 = arith.addf %104, %108 : vector<1x1xf32>
    %110 = vector.extract_strided_slice %5 {offsets = [2, 0], sizes = [1, 1], strides = [1, 1]} : vector<4x1xf32> to vector<1x1xf32>
    %c5_42 = arith.constant 5 : index
    %c2_43 = arith.constant 2 : index
    %111 = memref.load %arg6[%c5_42, %c2_43] : memref<8x4xf32, #tpu.memory_space<smem>>
    %112 = vector.broadcast %111 : f32 to vector<1x1xf32>
    %113 = arith.mulf %110, %112 : vector<1x1xf32>
    %114 = arith.addf %109, %113 : vector<1x1xf32>
    %115 = vector.extract_strided_slice %5 {offsets = [3, 0], sizes = [1, 1], strides = [1, 1]} : vector<4x1xf32> to vector<1x1xf32>
    %c5_44 = arith.constant 5 : index
    %c3_45 = arith.constant 3 : index
    %116 = memref.load %arg6[%c5_44, %c3_45] : memref<8x4xf32, #tpu.memory_space<smem>>
    %117 = vector.broadcast %116 : f32 to vector<1x1xf32>
    %118 = arith.mulf %115, %117 : vector<1x1xf32>
    %119 = arith.addf %114, %118 : vector<1x1xf32>
    %120 = vector.extract_strided_slice %5 {offsets = [0, 0], sizes = [1, 1], strides = [1, 1]} : vector<4x1xf32> to vector<1x1xf32>
    %c6 = arith.constant 6 : index
    %c0_46 = arith.constant 0 : index
    %121 = memref.load %arg6[%c6, %c0_46] : memref<8x4xf32, #tpu.memory_space<smem>>
    %122 = vector.broadcast %121 : f32 to vector<1x1xf32>
    %123 = arith.mulf %120, %122 : vector<1x1xf32>
    %124 = vector.extract_strided_slice %5 {offsets = [1, 0], sizes = [1, 1], strides = [1, 1]} : vector<4x1xf32> to vector<1x1xf32>
    %c6_47 = arith.constant 6 : index
    %c1_48 = arith.constant 1 : index
    %125 = memref.load %arg6[%c6_47, %c1_48] : memref<8x4xf32, #tpu.memory_space<smem>>
    %126 = vector.broadcast %125 : f32 to vector<1x1xf32>
    %127 = arith.mulf %124, %126 : vector<1x1xf32>
    %128 = arith.addf %123, %127 : vector<1x1xf32>
    %129 = vector.extract_strided_slice %5 {offsets = [2, 0], sizes = [1, 1], strides = [1, 1]} : vector<4x1xf32> to vector<1x1xf32>
    %c6_49 = arith.constant 6 : index
    %c2_50 = arith.constant 2 : index
    %130 = memref.load %arg6[%c6_49, %c2_50] : memref<8x4xf32, #tpu.memory_space<smem>>
    %131 = vector.broadcast %130 : f32 to vector<1x1xf32>
    %132 = arith.mulf %129, %131 : vector<1x1xf32>
    %133 = arith.addf %128, %132 : vector<1x1xf32>
    %134 = vector.extract_strided_slice %5 {offsets = [3, 0], sizes = [1, 1], strides = [1, 1]} : vector<4x1xf32> to vector<1x1xf32>
    %c6_51 = arith.constant 6 : index
    %c3_52 = arith.constant 3 : index
    %135 = memref.load %arg6[%c6_51, %c3_52] : memref<8x4xf32, #tpu.memory_space<smem>>
    %136 = vector.broadcast %135 : f32 to vector<1x1xf32>
    %137 = arith.mulf %134, %136 : vector<1x1xf32>
    %138 = arith.addf %133, %137 : vector<1x1xf32>
    %139 = vector.extract_strided_slice %5 {offsets = [0, 0], sizes = [1, 1], strides = [1, 1]} : vector<4x1xf32> to vector<1x1xf32>
    %c7 = arith.constant 7 : index
    %c0_53 = arith.constant 0 : index
    %140 = memref.load %arg6[%c7, %c0_53] : memref<8x4xf32, #tpu.memory_space<smem>>
    %141 = vector.broadcast %140 : f32 to vector<1x1xf32>
    %142 = arith.mulf %139, %141 : vector<1x1xf32>
    %143 = vector.extract_strided_slice %5 {offsets = [1, 0], sizes = [1, 1], strides = [1, 1]} : vector<4x1xf32> to vector<1x1xf32>
    %c7_54 = arith.constant 7 : index
    %c1_55 = arith.constant 1 : index
    %144 = memref.load %arg6[%c7_54, %c1_55] : memref<8x4xf32, #tpu.memory_space<smem>>
    %145 = vector.broadcast %144 : f32 to vector<1x1xf32>
    %146 = arith.mulf %143, %145 : vector<1x1xf32>
    %147 = arith.addf %142, %146 : vector<1x1xf32>
    %148 = vector.extract_strided_slice %5 {offsets = [2, 0], sizes = [1, 1], strides = [1, 1]} : vector<4x1xf32> to vector<1x1xf32>
    %c7_56 = arith.constant 7 : index
    %c2_57 = arith.constant 2 : index
    %149 = memref.load %arg6[%c7_56, %c2_57] : memref<8x4xf32, #tpu.memory_space<smem>>
    %150 = vector.broadcast %149 : f32 to vector<1x1xf32>
    %151 = arith.mulf %148, %150 : vector<1x1xf32>
    %152 = arith.addf %147, %151 : vector<1x1xf32>
    %153 = vector.extract_strided_slice %5 {offsets = [3, 0], sizes = [1, 1], strides = [1, 1]} : vector<4x1xf32> to vector<1x1xf32>
    %c7_58 = arith.constant 7 : index
    %c3_59 = arith.constant 3 : index
    %154 = memref.load %arg6[%c7_58, %c3_59] : memref<8x4xf32, #tpu.memory_space<smem>>
    %155 = vector.broadcast %154 : f32 to vector<1x1xf32>
    %156 = arith.mulf %153, %155 : vector<1x1xf32>
    %157 = arith.addf %152, %156 : vector<1x1xf32>
    %158 = tpu.concatenate %24, %43, %62, %81, %100, %119, %138, %157 in 0 : vector<1x1xf32>, vector<1x1xf32>, vector<1x1xf32>, vector<1x1xf32>, vector<1x1xf32>, vector<1x1xf32>, vector<1x1xf32>, vector<1x1xf32> -> vector<8x1xf32>
    %cst_60 = arith.constant 0.000000e+00 : f32
    %159 = vector.broadcast %cst_60 : f32 to vector<8x1xf32>
    %160 = arith.subf %159, %158 : vector<8x1xf32>
    %161 = math.exp %160 : vector<8x1xf32>
    %cst_61 = arith.constant 1.000000e+00 : f32
    %162 = vector.broadcast %cst_61 : f32 to vector<8x1xf32>
    %163 = arith.addf %162, %161 : vector<8x1xf32>
    %cst_62 = arith.constant 1.000000e+00 : f32
    %164 = vector.broadcast %cst_62 : f32 to vector<8x1xf32>
    %165 = arith.divf %164, %163 : vector<8x1xf32>
    %cst_63 = arith.constant 0.000000e+00 : f32
    %166 = vector.broadcast %cst_63 : f32 to vector<4x290xf32>
    %c0_64 = arith.constant 0 : index
    %c0_65 = arith.constant 0 : index
    %167 = vector.load %arg9[%c0_64, %c0_65] : memref<4x290xf32, #tpu.memory_space<vmem>>, vector<4x290xf32>
    tpu.vector_store %arg9[%c0_64, %c0_65], %166 {strides = array<i32>} : memref<4x290xf32, #tpu.memory_space<vmem>>, vector<4x290xf32>,
    %c0_66 = arith.constant 0 : index
    %c17 = arith.constant 17 : index
    %168 = vector.load %arg9[%c0_66, %c17] : memref<4x290xf32, #tpu.memory_space<vmem>>, vector<4x256xf32>
    tpu.vector_store %arg9[%c0_66, %c17], %1 {strides = array<i32>} : memref<4x290xf32, #tpu.memory_space<vmem>>, vector<4x256xf32>,
    %c0_67 = arith.constant 0 : index
    %c0_68 = arith.constant 0 : index
    %169 = vector.load %arg2[%c0_67, %c0_68] : memref<2x256xf32, #tpu.memory_space<vmem>>, vector<1x256xf32>
    %c1_69 = arith.constant 1 : index
    %c0_70 = arith.constant 0 : index
    %170 = vector.load %arg2[%c1_69, %c0_70] : memref<2x256xf32, #tpu.memory_space<vmem>>, vector<1x256xf32>
    %c0_71 = arith.constant 0 : index
    %c0_72 = arith.constant 0 : index
    %171 = vector.load %arg9[%c0_71, %c0_72] : memref<4x290xf32, #tpu.memory_space<vmem>>, vector<4x256xf32>
    %172 = vector.broadcast %169 : vector<1x256xf32> to vector<4x256xf32>
    %173 = arith.mulf %171, %172 : vector<4x256xf32>
    %c0_73 = arith.constant 0 : index
    %c1_74 = arith.constant 1 : index
    %174 = vector.load %arg9[%c0_73, %c1_74] : memref<4x290xf32, #tpu.memory_space<vmem>>, vector<4x256xf32>
    %c0_75 = arith.constant 0 : index
    %c2_76 = arith.constant 2 : index
    %175 = vector.load %arg9[%c0_75, %c2_76] : memref<4x290xf32, #tpu.memory_space<vmem>>, vector<4x256xf32>
    %176 = vector.broadcast %170 : vector<1x256xf32> to vector<4x256xf32>
    %177 = arith.mulf %175, %176 : vector<4x256xf32>
    %c0_77 = arith.constant 0 : index
    %c16 = arith.constant 16 : index
    %178 = vector.load %arg9[%c0_77, %c16] : memref<4x290xf32, #tpu.memory_space<vmem>>, vector<4x256xf32>
    %179 = vector.broadcast %169 : vector<1x256xf32> to vector<4x256xf32>
    %180 = arith.mulf %178, %179 : vector<4x256xf32>
    %c0_78 = arith.constant 0 : index
    %c17_79 = arith.constant 17 : index
    %181 = vector.load %arg9[%c0_78, %c17_79] : memref<4x290xf32, #tpu.memory_space<vmem>>, vector<4x256xf32>
    %c0_80 = arith.constant 0 : index
    %c18 = arith.constant 18 : index
    %182 = vector.load %arg9[%c0_80, %c18] : memref<4x290xf32, #tpu.memory_space<vmem>>, vector<4x256xf32>
    %183 = vector.broadcast %170 : vector<1x256xf32> to vector<4x256xf32>
    %184 = arith.mulf %182, %183 : vector<4x256xf32>
    %c0_81 = arith.constant 0 : index
    %c32 = arith.constant 32 : index
    %185 = vector.load %arg9[%c0_81, %c32] : memref<4x290xf32, #tpu.memory_space<vmem>>, vector<4x256xf32>
    %186 = vector.broadcast %169 : vector<1x256xf32> to vector<4x256xf32>
    %187 = arith.mulf %185, %186 : vector<4x256xf32>
    %c0_82 = arith.constant 0 : index
    %c33 = arith.constant 33 : index
    %188 = vector.load %arg9[%c0_82, %c33] : memref<4x290xf32, #tpu.memory_space<vmem>>, vector<4x256xf32>
    %c0_83 = arith.constant 0 : index
    %c34 = arith.constant 34 : index
    %189 = vector.load %arg9[%c0_83, %c34] : memref<4x290xf32, #tpu.memory_space<vmem>>, vector<4x256xf32>
    %190 = vector.broadcast %170 : vector<1x256xf32> to vector<4x256xf32>
    %191 = arith.mulf %189, %190 : vector<4x256xf32>
    %192 = vector.extract_strided_slice %173 {offsets = [0, 0], sizes = [1, 256], strides = [1, 1]} : vector<4x256xf32> to vector<1x256xf32>
    %c0_84 = arith.constant 0 : index
    %c0_85 = arith.constant 0 : index
    %193 = memref.load %arg7[%c0_84, %c0_85] : memref<8x9xf32, #tpu.memory_space<smem>>
    %194 = vector.broadcast %193 : f32 to vector<1x256xf32>
    %195 = arith.mulf %192, %194 : vector<1x256xf32>
    %196 = vector.extract_strided_slice %174 {offsets = [0, 0], sizes = [1, 256], strides = [1, 1]} : vector<4x256xf32> to vector<1x256xf32>
    %c0_86 = arith.constant 0 : index
    %c1_87 = arith.constant 1 : index
    %197 = memref.load %arg7[%c0_86, %c1_87] : memref<8x9xf32, #tpu.memory_space<smem>>
    %198 = vector.broadcast %197 : f32 to vector<1x256xf32>
    %199 = arith.mulf %196, %198 : vector<1x256xf32>
    %200 = arith.addf %195, %199 : vector<1x256xf32>
    %201 = vector.extract_strided_slice %177 {offsets = [0, 0], sizes = [1, 256], strides = [1, 1]} : vector<4x256xf32> to vector<1x256xf32>
    %c0_88 = arith.constant 0 : index
    %c2_89 = arith.constant 2 : index
    %202 = memref.load %arg7[%c0_88, %c2_89] : memref<8x9xf32, #tpu.memory_space<smem>>
    %203 = vector.broadcast %202 : f32 to vector<1x256xf32>
    %204 = arith.mulf %201, %203 : vector<1x256xf32>
    %205 = arith.addf %200, %204 : vector<1x256xf32>
    %206 = vector.extract_strided_slice %180 {offsets = [0, 0], sizes = [1, 256], strides = [1, 1]} : vector<4x256xf32> to vector<1x256xf32>
    %c0_90 = arith.constant 0 : index
    %c3_91 = arith.constant 3 : index
    %207 = memref.load %arg7[%c0_90, %c3_91] : memref<8x9xf32, #tpu.memory_space<smem>>
    %208 = vector.broadcast %207 : f32 to vector<1x256xf32>
    %209 = arith.mulf %206, %208 : vector<1x256xf32>
    %210 = arith.addf %205, %209 : vector<1x256xf32>
    %211 = vector.extract_strided_slice %181 {offsets = [0, 0], sizes = [1, 256], strides = [1, 1]} : vector<4x256xf32> to vector<1x256xf32>
    %c0_92 = arith.constant 0 : index
    %c4_93 = arith.constant 4 : index
    %212 = memref.load %arg7[%c0_92, %c4_93] : memref<8x9xf32, #tpu.memory_space<smem>>
    %213 = vector.broadcast %212 : f32 to vector<1x256xf32>
    %214 = arith.mulf %211, %213 : vector<1x256xf32>
    %215 = arith.addf %210, %214 : vector<1x256xf32>
    %216 = vector.extract_strided_slice %184 {offsets = [0, 0], sizes = [1, 256], strides = [1, 1]} : vector<4x256xf32> to vector<1x256xf32>
    %c0_94 = arith.constant 0 : index
    %c5_95 = arith.constant 5 : index
    %217 = memref.load %arg7[%c0_94, %c5_95] : memref<8x9xf32, #tpu.memory_space<smem>>
    %218 = vector.broadcast %217 : f32 to vector<1x256xf32>
    %219 = arith.mulf %216, %218 : vector<1x256xf32>
    %220 = arith.addf %215, %219 : vector<1x256xf32>
    %221 = vector.extract_strided_slice %187 {offsets = [0, 0], sizes = [1, 256], strides = [1, 1]} : vector<4x256xf32> to vector<1x256xf32>
    %c0_96 = arith.constant 0 : index
    %c6_97 = arith.constant 6 : index
    %222 = memref.load %arg7[%c0_96, %c6_97] : memref<8x9xf32, #tpu.memory_space<smem>>
    %223 = vector.broadcast %222 : f32 to vector<1x256xf32>
    %224 = arith.mulf %221, %223 : vector<1x256xf32>
    %225 = arith.addf %220, %224 : vector<1x256xf32>
    %226 = vector.extract_strided_slice %188 {offsets = [0, 0], sizes = [1, 256], strides = [1, 1]} : vector<4x256xf32> to vector<1x256xf32>
    %c0_98 = arith.constant 0 : index
    %c7_99 = arith.constant 7 : index
    %227 = memref.load %arg7[%c0_98, %c7_99] : memref<8x9xf32, #tpu.memory_space<smem>>
    %228 = vector.broadcast %227 : f32 to vector<1x256xf32>
    %229 = arith.mulf %226, %228 : vector<1x256xf32>
    %230 = arith.addf %225, %229 : vector<1x256xf32>
    %231 = vector.extract_strided_slice %191 {offsets = [0, 0], sizes = [1, 256], strides = [1, 1]} : vector<4x256xf32> to vector<1x256xf32>
    %c0_100 = arith.constant 0 : index
    %c8 = arith.constant 8 : index
    %232 = memref.load %arg7[%c0_100, %c8] : memref<8x9xf32, #tpu.memory_space<smem>>
    %233 = vector.broadcast %232 : f32 to vector<1x256xf32>
    %234 = arith.mulf %231, %233 : vector<1x256xf32>
    %235 = arith.addf %230, %234 : vector<1x256xf32>
    %236 = vector.extract_strided_slice %173 {offsets = [0, 0], sizes = [1, 256], strides = [1, 1]} : vector<4x256xf32> to vector<1x256xf32>
    %c1_101 = arith.constant 1 : index
    %c0_102 = arith.constant 0 : index
    %237 = memref.load %arg7[%c1_101, %c0_102] : memref<8x9xf32, #tpu.memory_space<smem>>
    %238 = vector.broadcast %237 : f32 to vector<1x256xf32>
    %239 = arith.mulf %236, %238 : vector<1x256xf32>
    %240 = vector.extract_strided_slice %174 {offsets = [0, 0], sizes = [1, 256], strides = [1, 1]} : vector<4x256xf32> to vector<1x256xf32>
    %c1_103 = arith.constant 1 : index
    %c1_104 = arith.constant 1 : index
    %241 = memref.load %arg7[%c1_103, %c1_104] : memref<8x9xf32, #tpu.memory_space<smem>>
    %242 = vector.broadcast %241 : f32 to vector<1x256xf32>
    %243 = arith.mulf %240, %242 : vector<1x256xf32>
    %244 = arith.addf %239, %243 : vector<1x256xf32>
    %245 = vector.extract_strided_slice %177 {offsets = [0, 0], sizes = [1, 256], strides = [1, 1]} : vector<4x256xf32> to vector<1x256xf32>
    %c1_105 = arith.constant 1 : index
    %c2_106 = arith.constant 2 : index
    %246 = memref.load %arg7[%c1_105, %c2_106] : memref<8x9xf32, #tpu.memory_space<smem>>
    %247 = vector.broadcast %246 : f32 to vector<1x256xf32>
    %248 = arith.mulf %245, %247 : vector<1x256xf32>
    %249 = arith.addf %244, %248 : vector<1x256xf32>
    %250 = vector.extract_strided_slice %180 {offsets = [0, 0], sizes = [1, 256], strides = [1, 1]} : vector<4x256xf32> to vector<1x256xf32>
    %c1_107 = arith.constant 1 : index
    %c3_108 = arith.constant 3 : index
    %251 = memref.load %arg7[%c1_107, %c3_108] : memref<8x9xf32, #tpu.memory_space<smem>>
    %252 = vector.broadcast %251 : f32 to vector<1x256xf32>
    %253 = arith.mulf %250, %252 : vector<1x256xf32>
    %254 = arith.addf %249, %253 : vector<1x256xf32>
    %255 = vector.extract_strided_slice %181 {offsets = [0, 0], sizes = [1, 256], strides = [1, 1]} : vector<4x256xf32> to vector<1x256xf32>
    %c1_109 = arith.constant 1 : index
    %c4_110 = arith.constant 4 : index
    %256 = memref.load %arg7[%c1_109, %c4_110] : memref<8x9xf32, #tpu.memory_space<smem>>
    %257 = vector.broadcast %256 : f32 to vector<1x256xf32>
    %258 = arith.mulf %255, %257 : vector<1x256xf32>
    %259 = arith.addf %254, %258 : vector<1x256xf32>
    %260 = vector.extract_strided_slice %184 {offsets = [0, 0], sizes = [1, 256], strides = [1, 1]} : vector<4x256xf32> to vector<1x256xf32>
    %c1_111 = arith.constant 1 : index
    %c5_112 = arith.constant 5 : index
    %261 = memref.load %arg7[%c1_111, %c5_112] : memref<8x9xf32, #tpu.memory_space<smem>>
    %262 = vector.broadcast %261 : f32 to vector<1x256xf32>
    %263 = arith.mulf %260, %262 : vector<1x256xf32>
    %264 = arith.addf %259, %263 : vector<1x256xf32>
    %265 = vector.extract_strided_slice %187 {offsets = [0, 0], sizes = [1, 256], strides = [1, 1]} : vector<4x256xf32> to vector<1x256xf32>
    %c1_113 = arith.constant 1 : index
    %c6_114 = arith.constant 6 : index
    %266 = memref.load %arg7[%c1_113, %c6_114] : memref<8x9xf32, #tpu.memory_space<smem>>
    %267 = vector.broadcast %266 : f32 to vector<1x256xf32>
    %268 = arith.mulf %265, %267 : vector<1x256xf32>
    %269 = arith.addf %264, %268 : vector<1x256xf32>
    %270 = vector.extract_strided_slice %188 {offsets = [0, 0], sizes = [1, 256], strides = [1, 1]} : vector<4x256xf32> to vector<1x256xf32>
    %c1_115 = arith.constant 1 : index
    %c7_116 = arith.constant 7 : index
    %271 = memref.load %arg7[%c1_115, %c7_116] : memref<8x9xf32, #tpu.memory_space<smem>>
    %272 = vector.broadcast %271 : f32 to vector<1x256xf32>
    %273 = arith.mulf %270, %272 : vector<1x256xf32>
    %274 = arith.addf %269, %273 : vector<1x256xf32>
    %275 = vector.extract_strided_slice %191 {offsets = [0, 0], sizes = [1, 256], strides = [1, 1]} : vector<4x256xf32> to vector<1x256xf32>
    %c1_117 = arith.constant 1 : index
    %c8_118 = arith.constant 8 : index
    %276 = memref.load %arg7[%c1_117, %c8_118] : memref<8x9xf32, #tpu.memory_space<smem>>
    %277 = vector.broadcast %276 : f32 to vector<1x256xf32>
    %278 = arith.mulf %275, %277 : vector<1x256xf32>
    %279 = arith.addf %274, %278 : vector<1x256xf32>
    %280 = vector.extract_strided_slice %173 {offsets = [1, 0], sizes = [1, 256], strides = [1, 1]} : vector<4x256xf32> to vector<1x256xf32>
    %c2_119 = arith.constant 2 : index
    %c0_120 = arith.constant 0 : index
    %281 = memref.load %arg7[%c2_119, %c0_120] : memref<8x9xf32, #tpu.memory_space<smem>>
    %282 = vector.broadcast %281 : f32 to vector<1x256xf32>
    %283 = arith.mulf %280, %282 : vector<1x256xf32>
    %284 = vector.extract_strided_slice %174 {offsets = [1, 0], sizes = [1, 256], strides = [1, 1]} : vector<4x256xf32> to vector<1x256xf32>
    %c2_121 = arith.constant 2 : index
    %c1_122 = arith.constant 1 : index
    %285 = memref.load %arg7[%c2_121, %c1_122] : memref<8x9xf32, #tpu.memory_space<smem>>
    %286 = vector.broadcast %285 : f32 to vector<1x256xf32>
    %287 = arith.mulf %284, %286 : vector<1x256xf32>
    %288 = arith.addf %283, %287 : vector<1x256xf32>
    %289 = vector.extract_strided_slice %177 {offsets = [1, 0], sizes = [1, 256], strides = [1, 1]} : vector<4x256xf32> to vector<1x256xf32>
    %c2_123 = arith.constant 2 : index
    %c2_124 = arith.constant 2 : index
    %290 = memref.load %arg7[%c2_123, %c2_124] : memref<8x9xf32, #tpu.memory_space<smem>>
    %291 = vector.broadcast %290 : f32 to vector<1x256xf32>
    %292 = arith.mulf %289, %291 : vector<1x256xf32>
    %293 = arith.addf %288, %292 : vector<1x256xf32>
    %294 = vector.extract_strided_slice %180 {offsets = [1, 0], sizes = [1, 256], strides = [1, 1]} : vector<4x256xf32> to vector<1x256xf32>
    %c2_125 = arith.constant 2 : index
    %c3_126 = arith.constant 3 : index
    %295 = memref.load %arg7[%c2_125, %c3_126] : memref<8x9xf32, #tpu.memory_space<smem>>
    %296 = vector.broadcast %295 : f32 to vector<1x256xf32>
    %297 = arith.mulf %294, %296 : vector<1x256xf32>
    %298 = arith.addf %293, %297 : vector<1x256xf32>
    %299 = vector.extract_strided_slice %181 {offsets = [1, 0], sizes = [1, 256], strides = [1, 1]} : vector<4x256xf32> to vector<1x256xf32>
    %c2_127 = arith.constant 2 : index
    %c4_128 = arith.constant 4 : index
    %300 = memref.load %arg7[%c2_127, %c4_128] : memref<8x9xf32, #tpu.memory_space<smem>>
    %301 = vector.broadcast %300 : f32 to vector<1x256xf32>
    %302 = arith.mulf %299, %301 : vector<1x256xf32>
    %303 = arith.addf %298, %302 : vector<1x256xf32>
    %304 = vector.extract_strided_slice %184 {offsets = [1, 0], sizes = [1, 256], strides = [1, 1]} : vector<4x256xf32> to vector<1x256xf32>
    %c2_129 = arith.constant 2 : index
    %c5_130 = arith.constant 5 : index
    %305 = memref.load %arg7[%c2_129, %c5_130] : memref<8x9xf32, #tpu.memory_space<smem>>
    %306 = vector.broadcast %305 : f32 to vector<1x256xf32>
    %307 = arith.mulf %304, %306 : vector<1x256xf32>
    %308 = arith.addf %303, %307 : vector<1x256xf32>
    %309 = vector.extract_strided_slice %187 {offsets = [1, 0], sizes = [1, 256], strides = [1, 1]} : vector<4x256xf32> to vector<1x256xf32>
    %c2_131 = arith.constant 2 : index
    %c6_132 = arith.constant 6 : index
    %310 = memref.load %arg7[%c2_131, %c6_132] : memref<8x9xf32, #tpu.memory_space<smem>>
    %311 = vector.broadcast %310 : f32 to vector<1x256xf32>
    %312 = arith.mulf %309, %311 : vector<1x256xf32>
    %313 = arith.addf %308, %312 : vector<1x256xf32>
    %314 = vector.extract_strided_slice %188 {offsets = [1, 0], sizes = [1, 256], strides = [1, 1]} : vector<4x256xf32> to vector<1x256xf32>
    %c2_133 = arith.constant 2 : index
    %c7_134 = arith.constant 7 : index
    %315 = memref.load %arg7[%c2_133, %c7_134] : memref<8x9xf32, #tpu.memory_space<smem>>
    %316 = vector.broadcast %315 : f32 to vector<1x256xf32>
    %317 = arith.mulf %314, %316 : vector<1x256xf32>
    %318 = arith.addf %313, %317 : vector<1x256xf32>
    %319 = vector.extract_strided_slice %191 {offsets = [1, 0], sizes = [1, 256], strides = [1, 1]} : vector<4x256xf32> to vector<1x256xf32>
    %c2_135 = arith.constant 2 : index
    %c8_136 = arith.constant 8 : index
    %320 = memref.load %arg7[%c2_135, %c8_136] : memref<8x9xf32, #tpu.memory_space<smem>>
    %321 = vector.broadcast %320 : f32 to vector<1x256xf32>
    %322 = arith.mulf %319, %321 : vector<1x256xf32>
    %323 = arith.addf %318, %322 : vector<1x256xf32>
    %324 = vector.extract_strided_slice %173 {offsets = [1, 0], sizes = [1, 256], strides = [1, 1]} : vector<4x256xf32> to vector<1x256xf32>
    %c3_137 = arith.constant 3 : index
    %c0_138 = arith.constant 0 : index
    %325 = memref.load %arg7[%c3_137, %c0_138] : memref<8x9xf32, #tpu.memory_space<smem>>
    %326 = vector.broadcast %325 : f32 to vector<1x256xf32>
    %327 = arith.mulf %324, %326 : vector<1x256xf32>
    %328 = vector.extract_strided_slice %174 {offsets = [1, 0], sizes = [1, 256], strides = [1, 1]} : vector<4x256xf32> to vector<1x256xf32>
    %c3_139 = arith.constant 3 : index
    %c1_140 = arith.constant 1 : index
    %329 = memref.load %arg7[%c3_139, %c1_140] : memref<8x9xf32, #tpu.memory_space<smem>>
    %330 = vector.broadcast %329 : f32 to vector<1x256xf32>
    %331 = arith.mulf %328, %330 : vector<1x256xf32>
    %332 = arith.addf %327, %331 : vector<1x256xf32>
    %333 = vector.extract_strided_slice %177 {offsets = [1, 0], sizes = [1, 256], strides = [1, 1]} : vector<4x256xf32> to vector<1x256xf32>
    %c3_141 = arith.constant 3 : index
    %c2_142 = arith.constant 2 : index
    %334 = memref.load %arg7[%c3_141, %c2_142] : memref<8x9xf32, #tpu.memory_space<smem>>
    %335 = vector.broadcast %334 : f32 to vector<1x256xf32>
    %336 = arith.mulf %333, %335 : vector<1x256xf32>
    %337 = arith.addf %332, %336 : vector<1x256xf32>
    %338 = vector.extract_strided_slice %180 {offsets = [1, 0], sizes = [1, 256], strides = [1, 1]} : vector<4x256xf32> to vector<1x256xf32>
    %c3_143 = arith.constant 3 : index
    %c3_144 = arith.constant 3 : index
    %339 = memref.load %arg7[%c3_143, %c3_144] : memref<8x9xf32, #tpu.memory_space<smem>>
    %340 = vector.broadcast %339 : f32 to vector<1x256xf32>
    %341 = arith.mulf %338, %340 : vector<1x256xf32>
    %342 = arith.addf %337, %341 : vector<1x256xf32>
    %343 = vector.extract_strided_slice %181 {offsets = [1, 0], sizes = [1, 256], strides = [1, 1]} : vector<4x256xf32> to vector<1x256xf32>
    %c3_145 = arith.constant 3 : index
    %c4_146 = arith.constant 4 : index
    %344 = memref.load %arg7[%c3_145, %c4_146] : memref<8x9xf32, #tpu.memory_space<smem>>
    %345 = vector.broadcast %344 : f32 to vector<1x256xf32>
    %346 = arith.mulf %343, %345 : vector<1x256xf32>
    %347 = arith.addf %342, %346 : vector<1x256xf32>
    %348 = vector.extract_strided_slice %184 {offsets = [1, 0], sizes = [1, 256], strides = [1, 1]} : vector<4x256xf32> to vector<1x256xf32>
    %c3_147 = arith.constant 3 : index
    %c5_148 = arith.constant 5 : index
    %349 = memref.load %arg7[%c3_147, %c5_148] : memref<8x9xf32, #tpu.memory_space<smem>>
    %350 = vector.broadcast %349 : f32 to vector<1x256xf32>
    %351 = arith.mulf %348, %350 : vector<1x256xf32>
    %352 = arith.addf %347, %351 : vector<1x256xf32>
    %353 = vector.extract_strided_slice %187 {offsets = [1, 0], sizes = [1, 256], strides = [1, 1]} : vector<4x256xf32> to vector<1x256xf32>
    %c3_149 = arith.constant 3 : index
    %c6_150 = arith.constant 6 : index
    %354 = memref.load %arg7[%c3_149, %c6_150] : memref<8x9xf32, #tpu.memory_space<smem>>
    %355 = vector.broadcast %354 : f32 to vector<1x256xf32>
    %356 = arith.mulf %353, %355 : vector<1x256xf32>
    %357 = arith.addf %352, %356 : vector<1x256xf32>
    %358 = vector.extract_strided_slice %188 {offsets = [1, 0], sizes = [1, 256], strides = [1, 1]} : vector<4x256xf32> to vector<1x256xf32>
    %c3_151 = arith.constant 3 : index
    %c7_152 = arith.constant 7 : index
    %359 = memref.load %arg7[%c3_151, %c7_152] : memref<8x9xf32, #tpu.memory_space<smem>>
    %360 = vector.broadcast %359 : f32 to vector<1x256xf32>
    %361 = arith.mulf %358, %360 : vector<1x256xf32>
    %362 = arith.addf %357, %361 : vector<1x256xf32>
    %363 = vector.extract_strided_slice %191 {offsets = [1, 0], sizes = [1, 256], strides = [1, 1]} : vector<4x256xf32> to vector<1x256xf32>
    %c3_153 = arith.constant 3 : index
    %c8_154 = arith.constant 8 : index
    %364 = memref.load %arg7[%c3_153, %c8_154] : memref<8x9xf32, #tpu.memory_space<smem>>
    %365 = vector.broadcast %364 : f32 to vector<1x256xf32>
    %366 = arith.mulf %363, %365 : vector<1x256xf32>
    %367 = arith.addf %362, %366 : vector<1x256xf32>
    %368 = vector.extract_strided_slice %173 {offsets = [2, 0], sizes = [1, 256], strides = [1, 1]} : vector<4x256xf32> to vector<1x256xf32>
    %c4_155 = arith.constant 4 : index
    %c0_156 = arith.constant 0 : index
    %369 = memref.load %arg7[%c4_155, %c0_156] : memref<8x9xf32, #tpu.memory_space<smem>>
    %370 = vector.broadcast %369 : f32 to vector<1x256xf32>
    %371 = arith.mulf %368, %370 : vector<1x256xf32>
    %372 = vector.extract_strided_slice %174 {offsets = [2, 0], sizes = [1, 256], strides = [1, 1]} : vector<4x256xf32> to vector<1x256xf32>
    %c4_157 = arith.constant 4 : index
    %c1_158 = arith.constant 1 : index
    %373 = memref.load %arg7[%c4_157, %c1_158] : memref<8x9xf32, #tpu.memory_space<smem>>
    %374 = vector.broadcast %373 : f32 to vector<1x256xf32>
    %375 = arith.mulf %372, %374 : vector<1x256xf32>
    %376 = arith.addf %371, %375 : vector<1x256xf32>
    %377 = vector.extract_strided_slice %177 {offsets = [2, 0], sizes = [1, 256], strides = [1, 1]} : vector<4x256xf32> to vector<1x256xf32>
    %c4_159 = arith.constant 4 : index
    %c2_160 = arith.constant 2 : index
    %378 = memref.load %arg7[%c4_159, %c2_160] : memref<8x9xf32, #tpu.memory_space<smem>>
    %379 = vector.broadcast %378 : f32 to vector<1x256xf32>
    %380 = arith.mulf %377, %379 : vector<1x256xf32>
    %381 = arith.addf %376, %380 : vector<1x256xf32>
    %382 = vector.extract_strided_slice %180 {offsets = [2, 0], sizes = [1, 256], strides = [1, 1]} : vector<4x256xf32> to vector<1x256xf32>
    %c4_161 = arith.constant 4 : index
    %c3_162 = arith.constant 3 : index
    %383 = memref.load %arg7[%c4_161, %c3_162] : memref<8x9xf32, #tpu.memory_space<smem>>
    %384 = vector.broadcast %383 : f32 to vector<1x256xf32>
    %385 = arith.mulf %382, %384 : vector<1x256xf32>
    %386 = arith.addf %381, %385 : vector<1x256xf32>
    %387 = vector.extract_strided_slice %181 {offsets = [2, 0], sizes = [1, 256], strides = [1, 1]} : vector<4x256xf32> to vector<1x256xf32>
    %c4_163 = arith.constant 4 : index
    %c4_164 = arith.constant 4 : index
    %388 = memref.load %arg7[%c4_163, %c4_164] : memref<8x9xf32, #tpu.memory_space<smem>>
    %389 = vector.broadcast %388 : f32 to vector<1x256xf32>
    %390 = arith.mulf %387, %389 : vector<1x256xf32>
    %391 = arith.addf %386, %390 : vector<1x256xf32>
    %392 = vector.extract_strided_slice %184 {offsets = [2, 0], sizes = [1, 256], strides = [1, 1]} : vector<4x256xf32> to vector<1x256xf32>
    %c4_165 = arith.constant 4 : index
    %c5_166 = arith.constant 5 : index
    %393 = memref.load %arg7[%c4_165, %c5_166] : memref<8x9xf32, #tpu.memory_space<smem>>
    %394 = vector.broadcast %393 : f32 to vector<1x256xf32>
    %395 = arith.mulf %392, %394 : vector<1x256xf32>
    %396 = arith.addf %391, %395 : vector<1x256xf32>
    %397 = vector.extract_strided_slice %187 {offsets = [2, 0], sizes = [1, 256], strides = [1, 1]} : vector<4x256xf32> to vector<1x256xf32>
    %c4_167 = arith.constant 4 : index
    %c6_168 = arith.constant 6 : index
    %398 = memref.load %arg7[%c4_167, %c6_168] : memref<8x9xf32, #tpu.memory_space<smem>>
    %399 = vector.broadcast %398 : f32 to vector<1x256xf32>
    %400 = arith.mulf %397, %399 : vector<1x256xf32>
    %401 = arith.addf %396, %400 : vector<1x256xf32>
    %402 = vector.extract_strided_slice %188 {offsets = [2, 0], sizes = [1, 256], strides = [1, 1]} : vector<4x256xf32> to vector<1x256xf32>
    %c4_169 = arith.constant 4 : index
    %c7_170 = arith.constant 7 : index
    %403 = memref.load %arg7[%c4_169, %c7_170] : memref<8x9xf32, #tpu.memory_space<smem>>
    %404 = vector.broadcast %403 : f32 to vector<1x256xf32>
    %405 = arith.mulf %402, %404 : vector<1x256xf32>
    %406 = arith.addf %401, %405 : vector<1x256xf32>
    %407 = vector.extract_strided_slice %191 {offsets = [2, 0], sizes = [1, 256], strides = [1, 1]} : vector<4x256xf32> to vector<1x256xf32>
    %c4_171 = arith.constant 4 : index
    %c8_172 = arith.constant 8 : index
    %408 = memref.load %arg7[%c4_171, %c8_172] : memref<8x9xf32, #tpu.memory_space<smem>>
    %409 = vector.broadcast %408 : f32 to vector<1x256xf32>
    %410 = arith.mulf %407, %409 : vector<1x256xf32>
    %411 = arith.addf %406, %410 : vector<1x256xf32>
    %412 = vector.extract_strided_slice %173 {offsets = [2, 0], sizes = [1, 256], strides = [1, 1]} : vector<4x256xf32> to vector<1x256xf32>
    %c5_173 = arith.constant 5 : index
    %c0_174 = arith.constant 0 : index
    %413 = memref.load %arg7[%c5_173, %c0_174] : memref<8x9xf32, #tpu.memory_space<smem>>
    %414 = vector.broadcast %413 : f32 to vector<1x256xf32>
    %415 = arith.mulf %412, %414 : vector<1x256xf32>
    %416 = vector.extract_strided_slice %174 {offsets = [2, 0], sizes = [1, 256], strides = [1, 1]} : vector<4x256xf32> to vector<1x256xf32>
    %c5_175 = arith.constant 5 : index
    %c1_176 = arith.constant 1 : index
    %417 = memref.load %arg7[%c5_175, %c1_176] : memref<8x9xf32, #tpu.memory_space<smem>>
    %418 = vector.broadcast %417 : f32 to vector<1x256xf32>
    %419 = arith.mulf %416, %418 : vector<1x256xf32>
    %420 = arith.addf %415, %419 : vector<1x256xf32>
    %421 = vector.extract_strided_slice %177 {offsets = [2, 0], sizes = [1, 256], strides = [1, 1]} : vector<4x256xf32> to vector<1x256xf32>
    %c5_177 = arith.constant 5 : index
    %c2_178 = arith.constant 2 : index
    %422 = memref.load %arg7[%c5_177, %c2_178] : memref<8x9xf32, #tpu.memory_space<smem>>
    %423 = vector.broadcast %422 : f32 to vector<1x256xf32>
    %424 = arith.mulf %421, %423 : vector<1x256xf32>
    %425 = arith.addf %420, %424 : vector<1x256xf32>
    %426 = vector.extract_strided_slice %180 {offsets = [2, 0], sizes = [1, 256], strides = [1, 1]} : vector<4x256xf32> to vector<1x256xf32>
    %c5_179 = arith.constant 5 : index
    %c3_180 = arith.constant 3 : index
    %427 = memref.load %arg7[%c5_179, %c3_180] : memref<8x9xf32, #tpu.memory_space<smem>>
    %428 = vector.broadcast %427 : f32 to vector<1x256xf32>
    %429 = arith.mulf %426, %428 : vector<1x256xf32>
    %430 = arith.addf %425, %429 : vector<1x256xf32>
    %431 = vector.extract_strided_slice %181 {offsets = [2, 0], sizes = [1, 256], strides = [1, 1]} : vector<4x256xf32> to vector<1x256xf32>
    %c5_181 = arith.constant 5 : index
    %c4_182 = arith.constant 4 : index
    %432 = memref.load %arg7[%c5_181, %c4_182] : memref<8x9xf32, #tpu.memory_space<smem>>
    %433 = vector.broadcast %432 : f32 to vector<1x256xf32>
    %434 = arith.mulf %431, %433 : vector<1x256xf32>
    %435 = arith.addf %430, %434 : vector<1x256xf32>
    %436 = vector.extract_strided_slice %184 {offsets = [2, 0], sizes = [1, 256], strides = [1, 1]} : vector<4x256xf32> to vector<1x256xf32>
    %c5_183 = arith.constant 5 : index
    %c5_184 = arith.constant 5 : index
    %437 = memref.load %arg7[%c5_183, %c5_184] : memref<8x9xf32, #tpu.memory_space<smem>>
    %438 = vector.broadcast %437 : f32 to vector<1x256xf32>
    %439 = arith.mulf %436, %438 : vector<1x256xf32>
    %440 = arith.addf %435, %439 : vector<1x256xf32>
    %441 = vector.extract_strided_slice %187 {offsets = [2, 0], sizes = [1, 256], strides = [1, 1]} : vector<4x256xf32> to vector<1x256xf32>
    %c5_185 = arith.constant 5 : index
    %c6_186 = arith.constant 6 : index
    %442 = memref.load %arg7[%c5_185, %c6_186] : memref<8x9xf32, #tpu.memory_space<smem>>
    %443 = vector.broadcast %442 : f32 to vector<1x256xf32>
    %444 = arith.mulf %441, %443 : vector<1x256xf32>
    %445 = arith.addf %440, %444 : vector<1x256xf32>
    %446 = vector.extract_strided_slice %188 {offsets = [2, 0], sizes = [1, 256], strides = [1, 1]} : vector<4x256xf32> to vector<1x256xf32>
    %c5_187 = arith.constant 5 : index
    %c7_188 = arith.constant 7 : index
    %447 = memref.load %arg7[%c5_187, %c7_188] : memref<8x9xf32, #tpu.memory_space<smem>>
    %448 = vector.broadcast %447 : f32 to vector<1x256xf32>
    %449 = arith.mulf %446, %448 : vector<1x256xf32>
    %450 = arith.addf %445, %449 : vector<1x256xf32>
    %451 = vector.extract_strided_slice %191 {offsets = [2, 0], sizes = [1, 256], strides = [1, 1]} : vector<4x256xf32> to vector<1x256xf32>
    %c5_189 = arith.constant 5 : index
    %c8_190 = arith.constant 8 : index
    %452 = memref.load %arg7[%c5_189, %c8_190] : memref<8x9xf32, #tpu.memory_space<smem>>
    %453 = vector.broadcast %452 : f32 to vector<1x256xf32>
    %454 = arith.mulf %451, %453 : vector<1x256xf32>
    %455 = arith.addf %450, %454 : vector<1x256xf32>
    %456 = vector.extract_strided_slice %173 {offsets = [3, 0], sizes = [1, 256], strides = [1, 1]} : vector<4x256xf32> to vector<1x256xf32>
    %c6_191 = arith.constant 6 : index
    %c0_192 = arith.constant 0 : index
    %457 = memref.load %arg7[%c6_191, %c0_192] : memref<8x9xf32, #tpu.memory_space<smem>>
    %458 = vector.broadcast %457 : f32 to vector<1x256xf32>
    %459 = arith.mulf %456, %458 : vector<1x256xf32>
    %460 = vector.extract_strided_slice %174 {offsets = [3, 0], sizes = [1, 256], strides = [1, 1]} : vector<4x256xf32> to vector<1x256xf32>
    %c6_193 = arith.constant 6 : index
    %c1_194 = arith.constant 1 : index
    %461 = memref.load %arg7[%c6_193, %c1_194] : memref<8x9xf32, #tpu.memory_space<smem>>
    %462 = vector.broadcast %461 : f32 to vector<1x256xf32>
    %463 = arith.mulf %460, %462 : vector<1x256xf32>
    %464 = arith.addf %459, %463 : vector<1x256xf32>
    %465 = vector.extract_strided_slice %177 {offsets = [3, 0], sizes = [1, 256], strides = [1, 1]} : vector<4x256xf32> to vector<1x256xf32>
    %c6_195 = arith.constant 6 : index
    %c2_196 = arith.constant 2 : index
    %466 = memref.load %arg7[%c6_195, %c2_196] : memref<8x9xf32, #tpu.memory_space<smem>>
    %467 = vector.broadcast %466 : f32 to vector<1x256xf32>
    %468 = arith.mulf %465, %467 : vector<1x256xf32>
    %469 = arith.addf %464, %468 : vector<1x256xf32>
    %470 = vector.extract_strided_slice %180 {offsets = [3, 0], sizes = [1, 256], strides = [1, 1]} : vector<4x256xf32> to vector<1x256xf32>
    %c6_197 = arith.constant 6 : index
    %c3_198 = arith.constant 3 : index
    %471 = memref.load %arg7[%c6_197, %c3_198] : memref<8x9xf32, #tpu.memory_space<smem>>
    %472 = vector.broadcast %471 : f32 to vector<1x256xf32>
    %473 = arith.mulf %470, %472 : vector<1x256xf32>
    %474 = arith.addf %469, %473 : vector<1x256xf32>
    %475 = vector.extract_strided_slice %181 {offsets = [3, 0], sizes = [1, 256], strides = [1, 1]} : vector<4x256xf32> to vector<1x256xf32>
    %c6_199 = arith.constant 6 : index
    %c4_200 = arith.constant 4 : index
    %476 = memref.load %arg7[%c6_199, %c4_200] : memref<8x9xf32, #tpu.memory_space<smem>>
    %477 = vector.broadcast %476 : f32 to vector<1x256xf32>
    %478 = arith.mulf %475, %477 : vector<1x256xf32>
    %479 = arith.addf %474, %478 : vector<1x256xf32>
    %480 = vector.extract_strided_slice %184 {offsets = [3, 0], sizes = [1, 256], strides = [1, 1]} : vector<4x256xf32> to vector<1x256xf32>
    %c6_201 = arith.constant 6 : index
    %c5_202 = arith.constant 5 : index
    %481 = memref.load %arg7[%c6_201, %c5_202] : memref<8x9xf32, #tpu.memory_space<smem>>
    %482 = vector.broadcast %481 : f32 to vector<1x256xf32>
    %483 = arith.mulf %480, %482 : vector<1x256xf32>
    %484 = arith.addf %479, %483 : vector<1x256xf32>
    %485 = vector.extract_strided_slice %187 {offsets = [3, 0], sizes = [1, 256], strides = [1, 1]} : vector<4x256xf32> to vector<1x256xf32>
    %c6_203 = arith.constant 6 : index
    %c6_204 = arith.constant 6 : index
    %486 = memref.load %arg7[%c6_203, %c6_204] : memref<8x9xf32, #tpu.memory_space<smem>>
    %487 = vector.broadcast %486 : f32 to vector<1x256xf32>
    %488 = arith.mulf %485, %487 : vector<1x256xf32>
    %489 = arith.addf %484, %488 : vector<1x256xf32>
    %490 = vector.extract_strided_slice %188 {offsets = [3, 0], sizes = [1, 256], strides = [1, 1]} : vector<4x256xf32> to vector<1x256xf32>
    %c6_205 = arith.constant 6 : index
    %c7_206 = arith.constant 7 : index
    %491 = memref.load %arg7[%c6_205, %c7_206] : memref<8x9xf32, #tpu.memory_space<smem>>
    %492 = vector.broadcast %491 : f32 to vector<1x256xf32>
    %493 = arith.mulf %490, %492 : vector<1x256xf32>
    %494 = arith.addf %489, %493 : vector<1x256xf32>
    %495 = vector.extract_strided_slice %191 {offsets = [3, 0], sizes = [1, 256], strides = [1, 1]} : vector<4x256xf32> to vector<1x256xf32>
    %c6_207 = arith.constant 6 : index
    %c8_208 = arith.constant 8 : index
    %496 = memref.load %arg7[%c6_207, %c8_208] : memref<8x9xf32, #tpu.memory_space<smem>>
    %497 = vector.broadcast %496 : f32 to vector<1x256xf32>
    %498 = arith.mulf %495, %497 : vector<1x256xf32>
    %499 = arith.addf %494, %498 : vector<1x256xf32>
    %500 = vector.extract_strided_slice %173 {offsets = [3, 0], sizes = [1, 256], strides = [1, 1]} : vector<4x256xf32> to vector<1x256xf32>
    %c7_209 = arith.constant 7 : index
    %c0_210 = arith.constant 0 : index
    %501 = memref.load %arg7[%c7_209, %c0_210] : memref<8x9xf32, #tpu.memory_space<smem>>
    %502 = vector.broadcast %501 : f32 to vector<1x256xf32>
    %503 = arith.mulf %500, %502 : vector<1x256xf32>
    %504 = vector.extract_strided_slice %174 {offsets = [3, 0], sizes = [1, 256], strides = [1, 1]} : vector<4x256xf32> to vector<1x256xf32>
    %c7_211 = arith.constant 7 : index
    %c1_212 = arith.constant 1 : index
    %505 = memref.load %arg7[%c7_211, %c1_212] : memref<8x9xf32, #tpu.memory_space<smem>>
    %506 = vector.broadcast %505 : f32 to vector<1x256xf32>
    %507 = arith.mulf %504, %506 : vector<1x256xf32>
    %508 = arith.addf %503, %507 : vector<1x256xf32>
    %509 = vector.extract_strided_slice %177 {offsets = [3, 0], sizes = [1, 256], strides = [1, 1]} : vector<4x256xf32> to vector<1x256xf32>
    %c7_213 = arith.constant 7 : index
    %c2_214 = arith.constant 2 : index
    %510 = memref.load %arg7[%c7_213, %c2_214] : memref<8x9xf32, #tpu.memory_space<smem>>
    %511 = vector.broadcast %510 : f32 to vector<1x256xf32>
    %512 = arith.mulf %509, %511 : vector<1x256xf32>
    %513 = arith.addf %508, %512 : vector<1x256xf32>
    %514 = vector.extract_strided_slice %180 {offsets = [3, 0], sizes = [1, 256], strides = [1, 1]} : vector<4x256xf32> to vector<1x256xf32>
    %c7_215 = arith.constant 7 : index
    %c3_216 = arith.constant 3 : index
    %515 = memref.load %arg7[%c7_215, %c3_216] : memref<8x9xf32, #tpu.memory_space<smem>>
    %516 = vector.broadcast %515 : f32 to vector<1x256xf32>
    %517 = arith.mulf %514, %516 : vector<1x256xf32>
    %518 = arith.addf %513, %517 : vector<1x256xf32>
    %519 = vector.extract_strided_slice %181 {offsets = [3, 0], sizes = [1, 256], strides = [1, 1]} : vector<4x256xf32> to vector<1x256xf32>
    %c7_217 = arith.constant 7 : index
    %c4_218 = arith.constant 4 : index
    %520 = memref.load %arg7[%c7_217, %c4_218] : memref<8x9xf32, #tpu.memory_space<smem>>
    %521 = vector.broadcast %520 : f32 to vector<1x256xf32>
    %522 = arith.mulf %519, %521 : vector<1x256xf32>
    %523 = arith.addf %518, %522 : vector<1x256xf32>
    %524 = vector.extract_strided_slice %184 {offsets = [3, 0], sizes = [1, 256], strides = [1, 1]} : vector<4x256xf32> to vector<1x256xf32>
    %c7_219 = arith.constant 7 : index
    %c5_220 = arith.constant 5 : index
    %525 = memref.load %arg7[%c7_219, %c5_220] : memref<8x9xf32, #tpu.memory_space<smem>>
    %526 = vector.broadcast %525 : f32 to vector<1x256xf32>
    %527 = arith.mulf %524, %526 : vector<1x256xf32>
    %528 = arith.addf %523, %527 : vector<1x256xf32>
    %529 = vector.extract_strided_slice %187 {offsets = [3, 0], sizes = [1, 256], strides = [1, 1]} : vector<4x256xf32> to vector<1x256xf32>
    %c7_221 = arith.constant 7 : index
    %c6_222 = arith.constant 6 : index
    %530 = memref.load %arg7[%c7_221, %c6_222] : memref<8x9xf32, #tpu.memory_space<smem>>
    %531 = vector.broadcast %530 : f32 to vector<1x256xf32>
    %532 = arith.mulf %529, %531 : vector<1x256xf32>
    %533 = arith.addf %528, %532 : vector<1x256xf32>
    %534 = vector.extract_strided_slice %188 {offsets = [3, 0], sizes = [1, 256], strides = [1, 1]} : vector<4x256xf32> to vector<1x256xf32>
    %c7_223 = arith.constant 7 : index
    %c7_224 = arith.constant 7 : index
    %535 = memref.load %arg7[%c7_223, %c7_224] : memref<8x9xf32, #tpu.memory_space<smem>>
    %536 = vector.broadcast %535 : f32 to vector<1x256xf32>
    %537 = arith.mulf %534, %536 : vector<1x256xf32>
    %538 = arith.addf %533, %537 : vector<1x256xf32>
    %539 = vector.extract_strided_slice %191 {offsets = [3, 0], sizes = [1, 256], strides = [1, 1]} : vector<4x256xf32> to vector<1x256xf32>
    %c7_225 = arith.constant 7 : index
    %c8_226 = arith.constant 8 : index
    %540 = memref.load %arg7[%c7_225, %c8_226] : memref<8x9xf32, #tpu.memory_space<smem>>
    %541 = vector.broadcast %540 : f32 to vector<1x256xf32>
    %542 = arith.mulf %539, %541 : vector<1x256xf32>
    %543 = arith.addf %538, %542 : vector<1x256xf32>
    %544 = tpu.concatenate %235, %279, %323, %367, %411, %455, %499, %543 in 0 : vector<1x256xf32>, vector<1x256xf32>, vector<1x256xf32>, vector<1x256xf32>, vector<1x256xf32>, vector<1x256xf32>, vector<1x256xf32>, vector<1x256xf32> -> vector<8x256xf32>
    %c0_227 = arith.constant 0 : index
    %c0_228 = arith.constant 0 : index
    %545 = vector.load %arg3[%c0_227, %c0_228] : memref<8x1xf32, #tpu.memory_space<vmem>>, vector<8x1xf32>
    %546 = vector.broadcast %545 : vector<8x1xf32> to vector<8x256xf32>
    %547 = arith.mulf %544, %546 : vector<8x256xf32>
    %c0_229 = arith.constant 0 : index
    %c0_230 = arith.constant 0 : index
    %548 = vector.load %arg4[%c0_229, %c0_230] : memref<8x1xf32, #tpu.memory_space<vmem>>, vector<8x1xf32>
    %549 = vector.broadcast %548 : vector<8x1xf32> to vector<8x256xf32>
    %550 = arith.addf %547, %549 : vector<8x256xf32>
    %cst_231 = arith.constant 0.000000e+00 : f32
    %551 = vector.broadcast %cst_231 : f32 to vector<8x256xf32>
    %552 = arith.cmpf oge, %550, %551 : vector<8x256xf32>
    %c0_232 = arith.constant 0 : index
    %c0_233 = arith.constant 0 : index
    %553 = vector.load %arg5[%c0_232, %c0_233] : memref<8x1xf32, #tpu.memory_space<vmem>>, vector<8x1xf32>
    %554 = vector.broadcast %553 : vector<8x1xf32> to vector<8x256xf32>
    %555 = arith.mulf %554, %550 : vector<8x256xf32>
    %556 = arith.select %552, %550, %555 : vector<8x256xi1>, vector<8x256xf32>
    %557 = vector.broadcast %165 : vector<8x1xf32> to vector<8x256xf32>
    %558 = arith.mulf %556, %557 : vector<8x256xf32>
    %c0_234 = arith.constant 0 : index
    %c0_235 = arith.constant 0 : index
    %c0_236 = arith.constant 0 : index
    %559 = vector.load %arg8[%c0_234, %c0_235, %c0_236] : memref<1x8x256xf32, #tpu.memory_space<vmem>>, vector<1x8x256xf32>
    %560 = vector.shape_cast %559 : vector<1x8x256xf32> to vector<8x256xf32>
    %561 = vector.shape_cast %558 : vector<8x256xf32> to vector<1x8x256xf32>
    tpu.vector_store %arg8[%c0_234, %c0_235, %c0_236], %561 {strides = array<i32>} : memref<1x8x256xf32, #tpu.memory_space<vmem>>, vector<1x8x256xf32>,
    return
  }
  func.func @transform_0(%arg0: i32) -> (i32, i32, i32) {
    %c0_i32 = arith.constant 0 : i32
    %c0_i32_0 = arith.constant 0 : i32
    %c0_i32_1 = arith.constant 0 : i32
    return %arg0, %c0_i32, %c0_i32_0 : i32, i32, i32
  }
  func.func @transform_1(%arg0: i32) -> (i32, i32) {
    %c0_i32 = arith.constant 0 : i32
    %c0_i32_0 = arith.constant 0 : i32
    %c0_i32_1 = arith.constant 0 : i32
    return %c0_i32, %c0_i32_0 : i32, i32
  }
  func.func @transform_2(%arg0: i32) -> (i32, i32) {
    %c0_i32 = arith.constant 0 : i32
    %c0_i32_0 = arith.constant 0 : i32
    %c0_i32_1 = arith.constant 0 : i32
    return %c0_i32, %c0_i32_0 : i32, i32
  }
  func.func @transform_3(%arg0: i32) -> (i32, i32) {
    %c0_i32 = arith.constant 0 : i32
    %c0_i32_0 = arith.constant 0 : i32
    %c0_i32_1 = arith.constant 0 : i32
    return %c0_i32, %c0_i32_0 : i32, i32
  }
  func.func @transform_4(%arg0: i32) -> (i32, i32) {
    %c0_i32 = arith.constant 0 : i32
    %c0_i32_0 = arith.constant 0 : i32
    %c0_i32_1 = arith.constant 0 : i32
    return %c0_i32, %c0_i32_0 : i32, i32
  }
  func.func @transform_5(%arg0: i32) -> (i32, i32) {
    %c0_i32 = arith.constant 0 : i32
    %c0_i32_0 = arith.constant 0 : i32
    %c0_i32_1 = arith.constant 0 : i32
    return %c0_i32, %c0_i32_0 : i32, i32
  }
  func.func @transform_6(%arg0: i32) -> (i32, i32) {
    %c0_i32 = arith.constant 0 : i32
    %c0_i32_0 = arith.constant 0 : i32
    %c0_i32_1 = arith.constant 0 : i32
    return %c0_i32, %c0_i32_0 : i32, i32
  }
  func.func @transform_7(%arg0: i32) -> (i32, i32, i32) {
    %c0_i32 = arith.constant 0 : i32
    %c0_i32_0 = arith.constant 0 : i32
    %c0_i32_1 = arith.constant 0 : i32
    return %arg0, %c0_i32, %c0_i32_0 : i32, i32, i32
  }
}

</mosaic_0001>

<bundles_post_ra>
// kernel: tpu_custom_call.1
= control target key start
LH: loop header
LB: loop body
LE: loop exit
PB: predicated region body
PF: predicated region fallthrough
CT: control target
= control target key end

     0   :  { %s3641_s0 = inlined_call_operand.vmem [shape: f32[2,4,256], index: 0, kind: input, shape index: {}]   ;;  %s3642_s1 = inlined_call_operand.vmem [shape: f32[2,256], index: 1, kind: input, shape index: {}]   ;;  %s3643_s2 = inlined_call_operand.vmem [shape: f32[8,1], index: 2, kind: input, shape index: {}]   ;;  %s3644_s3 = inlined_call_operand.vmem [shape: f32[8,1], index: 3, kind: input, shape index: {}]   ;;  %s3645_s4 = inlined_call_operand.vmem [shape: f32[8,1], index: 4, kind: input, shape index: {}]   ;;  %s3646_s5 = inlined_call_operand.vmem [shape: f32[8,4], index: 5, kind: input, shape index: {}]   ;;  %s3647_s6 = inlined_call_operand.vmem [shape: f32[8,9], index: 6, kind: input, shape index: {}]   ;;  %s3648_s7 = inlined_call_operand.hbm [shape: f32[2,8,256], index: 7, kind: output, shape index: {}]  }
   0x1   :  { %3754 = sst [smem:[#allocation72_spill]] %s3641_s0 }
   0x2   :  { %3755 = sst [smem:[#allocation73_spill]] %s3642_s1 }
   0x3   :  { %3756 = sst [smem:[#allocation74_spill]] %s3643_s2 }
   0x4   :  { %3757 = sst [smem:[#allocation75_spill]] %s3644_s3 }
   0x5   :  { %3758 = sst [smem:[#allocation76_spill]] %s3645_s4 }
   0x6   :  { %3759 = sst [smem:[#allocation77_spill]] %s3646_s5 }
   0x7   :  { %3760 = sst [smem:[#allocation78_spill]] %s3647_s6 }
   0x8   :  { %3761 = sst [smem:[#allocation79_spill]] %s3648_s7 }
   0x9   :  { %12 = vsyncpa [#allocation5], 0 }
   0xa   :  { %13 = vsyncpa [#allocation7], 0 }
   0xb   :  { %14 = vsyncpa [#allocation4], 0 }
   0xc   :  { %16 = vsyncpa [#allocation4 + $0x1], 0  ;;  %s2291_s24 = smov 0   ;;  %s2293_s25 = smov 0  }
   0xd   :  { %s2295_s26 = smov 0   ;;  %s2297_s27 = smov 0  }
   0xe LB: > { %3762 = sst [smem:[#allocation12_spill]] %s2218_s24  ;;  %s2312_s28 = sadd.s32 4294967295, %s2230_s27   ;;  %s2230_s27 = sphi %s2297_s27, %s3973_s27   ;;  %s2226_s26 = sphi %s2295_s26, %s3976_s26   ;;  %s2222_s25 = sphi %s2293_s25, %s3975_s25   ;;  %s2218_s24 = sphi %s2291_s24, %s3974_s24  }
   0xf   : > { %3763 = sst [smem:[#allocation13_spill]] %s2222_s25  ;;  %s1926_s29 = sadd.s32 4294967294, %s2230_s27  }
  0x10   : > { %3764 = sst [smem:[#allocation14_spill]] %s2226_s26  ;;  %s2316_s30 = sadd.s32 1, %s2230_s27  }
  0x11   : > { %3765 = sst [smem:[#allocation15_spill]] %s2230_s27  ;;  %s181_s8 = sadd.s32 1, %s2226_s26 }
  0x12   : > { %3766 = sst [smem:[#allocation16_spill]] %s2312_s28  ;;  %s178_s9 = ssub.s32 %s2230_s27, %s2316_s30 }
  0x13   : > { %3767 = sst [smem:[#allocation17_spill]] %s2316_s30  ;;  %p191_p0 = scmp.ne.s32.totalorder %s2226_s26, %s2222_s25 }
  0x14   : > { %p179_p1 = scmp.eq.s32.totalorder %s178_s9, 0  ;;  %p192_p2 = scmp.eq.s32.totalorder %s2312_s28, 1 }
  0x15   : > { %p197_p3 = scmp.ne.s32.totalorder %s2222_s25, %s2218_s24  ;;  %p198_p4 = scmp.eq.s32.totalorder %s1926_s29, 1 }
  0x16   : > { %s2327_s10 = scalar_select %p179_p1, %s2226_s26, %s181_s8  }
  0x17   : > { %p2329_p5 = por %p192_p2, %p191_p0  ;;  %p2333_p6 = por %p198_p4, %p197_p3 }
  0x18   : > { %3768 = sst [smem:[#allocation18_spill]] %s2327_s10  ;;  %p1927_p7 = scmp.ge.s32.totalorder %s2230_s27, 1 }
  0x19   : > { %s3769_s11 = scalar_select %p2329_p5, 1, 0 }
  0x1a   : > { %s3771_s12 = scalar_select %p2333_p6, 1, 0 }
  0x1b   : > { %3770 = sst [smem:[#allocation19_spill]] %s3769_s11  ;;  %p205_p8 = scmp.lt.s32.totalorder %s2230_s27, 3 }
  0x1c   : > { %3772 = sst [smem:[#allocation20_spill]] %s3771_s12  ;;  %p3649_p9 = scmp.eq.s32.totalorder %s2312_s28, 0 }
  0x1d   : > { %p2340_p10 = pnand %p1927_p7, %p205_p8  ;;  %s3774_s5 = sld [smem:[#allocation77_spill]] }
  0x1e   : > { %s3775_s6 = sld [smem:[#allocation78_spill]] }
  0x1f   : > { %s3773_s13 = scalar_select %p2340_p10, 1, 0 }
  0x20   : > { %p2057_p11 = pneg %p2340_p10 }
  0x22   : > { %p2354_p12 = pnand %p3649_p9, %p2057_p11 }
  0x23   : > { %s230_s16 = sshll.u32 %s3774_s5, 4  ;;  %s231_s16 = int_to_ptr.vmem [resolvable:$true] %s230_s16 }
  0x24   : > { %s241_s19 = sshll.u32 %s3775_s6, 4  ;;  %s2132_s21 = scalar_lea.vmem %s231_s16, 128  ;;  %s242_s19 = int_to_ptr.vmem [resolvable:$true] %s241_s19 }
  0x25   : > { %p2133_p13 = scmp.ne.s32.totalorder %s231_s16, %s2132_s21  ;;  %p2134_p0 = pneg %p2354_p12 }
  0x26   : > { %p2140_p3 = scmp.lt.s32.totalorder %s231_s16, %s231_s16  ;;  %p2141_p4 = scmp.lt.s32.totalorder %s2132_s21, %s2132_s21 }
  0x27   : > { %p2135_p1 = pnand %p2134_p0, %p2133_p13 }
  0x28   : > { %p2142_p7 = por %p2141_p4, %p2140_p3 }
  0x29   : > { %p2136_p2 = pneg %p2135_p1 }
  0x2b   : > { %p2143_p8 = pnand %p2142_p7, %p2136_p2 }
  0x2d   : > { %2146 = shalt.err (!%p2143_p8)
}
  0x2e   : > { %s2232_s22 = smov [#allocation3]   ;;  %s2147_s23 = scalar_lea.vmem %s242_s19, 128 }
  0x2f   : > { %2060 = dma.vmem_to_smem (!%p2354_p12), %s231_s16, 128, %s2232_s22, [#allocation5]  }
  0x30   : > { %p2148_p11 = scmp.ne.s32.totalorder %s242_s19, %s2147_s23  ;;  %p2155_p5 = scmp.lt.s32.totalorder %s242_s19, %s242_s19 }
  0x31   : > { %p2156_p10 = scmp.lt.s32.totalorder %s2147_s23, %s2147_s23 }
  0x32   : > { %p2150_p9 = pnand %p2148_p11, %p2134_p0 }
  0x33   : > { %p2157_p13 = por %p2156_p10, %p2155_p5 }
  0x34   : > { %p2151_p6 = pneg %p2150_p9 }
  0x36   : > { %p2158_p1 = pnand %p2157_p13, %p2151_p6 }
  0x38   : > { %2161 = shalt.err (!%p2158_p1)
}
  0x39   : > { %s2233_s29 = smov [#allocation6]   ;;  %p3777_p2 = scmp.ne.s32.totalorder %s3773_s13, 0 }
  0x3a   : > { %2063 = dma.vmem_to_smem (!%p2354_p12), %s242_s19, 128, %s2233_s29, [#allocation7]  }
  0x3b   : > { %262 = sbr.rel (%p3777_p2) target bundleno = 655 (0x28f), region = 48 }
  0x40   : > { %p3778_p3 = scmp.eq.s32.totalorder %s2312_s28, 0 }
  0x42   : > { %2205 = dma.done.wait (%p3778_p3), [#allocation5], 128   ;;  %p3779_p4 = pmov %p3778_p3 }
  0x43   : > { %p3780_p9 = pmov %p3778_p3 }
  0x44   : > { %2207 = vsyncadd (%p3779_p4), [#allocation5], 4294967168 }
  0x45   : > { %2209 = dma.done.wait (%p3780_p9), [#allocation7], 128   ;;  %p3781_p5 = pmov %p3778_p3 }
  0x47   : > { %2211 = vsyncadd (%p3781_p5), [#allocation7], 4294967168 }
  0x48   : > { %272 = sfence }
  0x49   : > { %p299_p6 = scmp.lt.s32.totalorder %s2312_s28, 1  ;;  %v568_v0 = vlaneseq  ;;  %s3783_s1 = sld [smem:[#allocation73_spill]]  ;;  %vm308_vm0 = vcmask 1043456   ;;  %vm548_vm1 = vcmask 273408   ;;  %v2238_v17 = vmov 0.0  }
  0x4a   : > { %s3786_s0 = sld [smem:[#allocation72_spill]]  ;;  %s2234_s20 = smov 2   ;;  %547 = vst [vmem:[#allocation2] sm:$0xff] %v2238_v17  ;;  %549 = vst.msk [vmem:[#allocation2 + $0x8] sm:$0xf] %vm548_vm1, %v2238_v17  ;;  %vm557_vm2 = vcmask 1043592  }
  0x4b   : > { %s300_s8 = scalar_select %p299_p6, %s2312_s28, 1  ;;  %v2376_v1 = vshrl.u32 %v568_v0, 7  ;;  %vm558_vm3 = vcmask 1047556   ;;  %vm553_vm4 = vcmask 138240   ;;  %vm561_vm5 = vcmask 134144  }
  0x4c   : > { %s2235_s21 = smov 16   ;;  %s2236_s22 = smov 18   ;;  %vm559_vm6 = vmor %vm558_vm3, %vm557_vm2  ;;  %vm593_vm7 = vcmask 15360   ;;  %vm602_vm8 = vcmask 130048   ;;  %vm611_vm9 = vcmask 146432   ;;  %vm620_vm10 = vcmask 261120  }
  0x4d   : > { %3782 = vst [vmem:[#allocation21_spill] sm:$0xff] %v2376_v1  ;;  %s2045_s16 = sshll.u32 %s300_s8, 3  ;;  %v2385_v4 = vsub.s32 0, %v2376_v1  ;;  %v2388_v5 = vsub.s32 1, %v2376_v1  ;;  %s2237_s23 = smov 32   ;;  %vm629_vm11 = vcmask 277504  }
  0x4e   : > { %s2239_s29 = smov 34   ;;  %s2240_s8 = smov 17   ;;  %vm651_vm12 = vcmask 1039360   ;;  %vm702_vm13 = vcmask 908288   ;;  %vm668_vm14 = vcmask 1031168   ;;  %vm685_vm15 = vcmask 916480  }
  0x4f   : > { %v1968_v2 = vld [vmem:[%s3783_s1 + $0x1] ss:$2 sm:$0x3]  ;;  %v563_v3 = vld [vmem:[%s3783_s1] ss:$2 sm:$0x3] }
  0x50   : > { %3784 = vst [vmem:[#allocation22_spill] sm:$0xff] %v2385_v4  ;;  %3785 = vst [vmem:[#allocation23_spill] sm:$0xff] %v2388_v5  ;;  %s303_s19 = scalar_lea.vmem %s3786_s0, %s2045_s16  ;;  %v584_v7 = vrot.slane %v1968_v2, %v2385_v4  ;;  %v588_v8 = vrot.slane %v1968_v2, %v2388_v5  ;;  %v571_v9 = vrot.slane %v563_v3, %v2385_v4  ;;  %s2405_s9 = sld [smem:[#allocation6 + $0x1]]  ;;  %vm528_vm1 = vcmask 1040384  }
  0x51   : > { %v304_v6 = vld [vmem:[%s303_s19] sm:$0xff]  ;;  %v575_v10 = vrot.slane %v563_v3, %v2388_v5  ;;  %s1972_s13 = sld [smem:[#allocation6 + $0x4]]  ;;  %s3654_s16 = smov 127   ;;  %vm530_vm2 = vcmask 1041408   ;;  %vm753_vm3 = vcmask 777216  }
  0x52   : > { %v306_v11 = vcombine.high %v304_v6, %v304_v6  ;;  %v309_v12 = vsel %vm308_vm0, %v304_v6, 0.0  ;;  %v589_v13 = vcombine.low %v584_v7, %v588_v8  ;;  %s1975_s14 = sld [smem:[#allocation6 + $0x7]]  ;;  %s3652_s18 = smov 111  }
  0x53   : > { %v2399_v16 = vcombine.low %v571_v9, %v575_v10  ;;  %s1978_s15 = sld [smem:[#allocation6 + $0x81]]  ;;  %s3797_s5 = smov 110  }
  0x54   : > { %v310_v14 = vsel %vm308_vm0, %v306_v11, 0.0  ;;  %590 = vrot.lane.b32.xlu1 %v589_v13, %s2234_s20  ;;  %s1981_s17 = sld [smem:[#allocation6 + $0x84]]  ;;  %s3656_s20 = smov 95  }
  0x55   : > { %v311_v15 = vadd.f32 %v310_v14, %v309_v12  ;;  %s1984_s19 = sld [smem:[#allocation6 + $0x87]] }
  0x56   : > { %v639_v22 = vstv %s2405_s9  ;;  %s2502_s9 = sld [smem:[#allocation6 + $0x82]] }
  0x57   : > { %312 = vadd.xlane.f32.xlu0 %v311_v15  ;;  %v690_v23 = vstv %s1972_s13  ;;  %s2447_s13 = sld [smem:[#allocation6 + $0x2]] }
  0x58   : > { %599 = vrot.lane.b32.xlu1 %v2399_v16, %s2235_s21  ;;  %v741_v28 = vstv %s1975_s14  ;;  %s1987_s21 = sld [smem:[#allocation6 + $0x101]] }
  0x59   : > { %v778_v31 = vstv %s1978_s15  ;;  %s2454_s14 = sld [smem:[#allocation6 + $0x3]] }
  0x5a   : > { %v826_v34 = vstv %s1981_s17  ;;  %s2464_s15 = sld [smem:[#allocation6 + $0x5]] }
  0x5b   : > { %v874_v37 = vstv %s1984_s19  ;;  %s2474_s17 = sld [smem:[#allocation6 + $0x6]]  ;;  %s3662_s19 = smov 126  }
  0x5c   : > { %608 = vrot.lane.b32.xlu1 %v589_v13, %s2236_s22  ;;  %s1990_s22 = sld [smem:[#allocation6 + $0x104]] }
  0x5d   : > { %v656_v2 = vstv %s2447_s13  ;;  %s1982_s13 = sld [smem:[#allocation6 + $0x85]] }
  0x5e   : > { %v909_v40 = vstv %s1987_s21  ;;  %s2489_s21 = sld [smem:[#allocation6 + $0x8]] }
  0x5f   : > { %v673_v10 = vstv %s2454_s14  ;;  %s3658_s14 = smov 94   ;;  %s2601_s0 = sld [smem:[#allocation6 + $0x100]] }
  0x60   : > { %617 = vrot.lane.b32.xlu1 %v2399_v16, %s2237_s23  ;;  %s1993_s23 = sld [smem:[#allocation6 + $0x107]] }
  0x61   : > { %s2604_s1 = sld [smem:[#allocation6 + $0x205]] }
  0x62   : > { %v957_v44 = vstv %s1990_s22  ;;  %s3666_s22 = smov 112   ;;  %s2611_s6 = sld [smem:[#allocation6 + $0x207]] }
  0x63   : > { %s2614_s10 = sld [smem:[#allocation6 + $0x208]] }
  0x64   : > { %626 = vrot.lane.b32.xlu1 %v589_v13, %s2239_s29  ;;  %s1996_s29 = sld [smem:[#allocation6 + $0x181]] }
  0x65   : > { %3796 = sst [smem:[#allocation32_spill]] %s2601_s0 }
  0x66   : > { %v1005_v48 = vstv %s1993_s23  ;;  %s3664_s23 = smov 110   ;;  %s2617_s26 = sld [smem:[#allocation6 + $0x281]] }
  0x67   : > { %s2621_s30 = sld [smem:[#allocation6]] }
  0x68   : > { %3799 = sst [smem:[#allocation33_spill]] %s2611_s6 }
  0x69   : > { %3800 = sst [smem:[#allocation34_spill]] %s2614_s10 }
  0x6a   : > { %v1040_v52 = vstv %s1996_s29  ;;  %s2515_s29 = sld [smem:[#allocation6 + $0x83]] }
  0x6b   : > { %s2624_s12 = sld [smem:[#allocation6 + $0x282]] }
  0x6c   : > { %3801 = sst [smem:[#allocation35_spill]] %s2617_s26 }
  0x6d   : > { %550 = vrot.lane.b32.xlu0 %v304_v6, %s2240_s8  ;;  %s2441_s8 = sld [smem:[#allocation6 + $0x184]] }
  0x6e   : > { %3802 = sst [smem:[#allocation36_spill]] %s2621_s30 }
  0x6f   : > { %s2627_s24 = sld [smem:[#allocation6 + $0x283]] }
  0x70   : > { %s2630_s27 = sld [smem:[#allocation6 + $0x284]] }
  0x71   : > { %3804 = sst [smem:[#allocation37_spill]] %s2624_s12 }
  0x72   : > { %s2634_s7 = sld [smem:[#allocation6 + $0x285]] }
  0x73   : > { %v1088_v58 = vstv %s2441_s8  ;;  %s3660_s8 = smov 96   ;;  %s2637_s11 = sld [smem:[#allocation6 + $0x301]] }
  0x74   : > { %s2640_s28 = sld [smem:[#allocation6 + $0x381]] }
  0x75   : > { %3805 = sst [smem:[#allocation38_spill]] %s2627_s24 }
  0x76   : > { %3806 = sst [smem:[#allocation39_spill]] %s2630_s27 }
  0x77   : > { %s2643_s25 = sld [smem:[#allocation6 + $0x302]] }
  0x78   : > { %3807 = sst [smem:[#allocation40_spill]] %s2634_s7 }
  0x79   : > { %3809 = sst [smem:[#allocation41_spill]] %s2637_s11  ;;  %s3847_s11 = smov 110  }
  0x7a   : > { %3810 = sst [smem:[#allocation42_spill]] %s2640_s28 }
  0x7b   : > { %s2647_s4 = sld [smem:[#allocation6 + $0x382]] }
  0x7c   : > { %s2653_s3 = sld [smem:[#allocation6 + $0x383]] }
  0x7d   : > { %3811 = sst [smem:[#allocation43_spill]] %s2643_s25 }
  0x7e   : > { %s2656_s2 = sld [smem:[#allocation3]] }
  0x7f   : > { %s2660_s25 = sld [smem:[#allocation3 + $0x1]] }
  0x80   : > { %s2787_s27 = sld [smem:[#allocation3 + $0x303]] }
  0x81   : > { %3812 = sst [smem:[#allocation44_spill]] %s2647_s4 }
  0x82   : > { %3814 = sst [smem:[#allocation46_spill]] %s2653_s3 }
  0x83   : > { %s2799_s28 = sld [smem:[#allocation3 + $0x380]] }
  0x84   : > { %3815 = sst [smem:[#allocation47_spill]] %s2656_s2 }
  0x85   : > { %3816 = sst [smem:[#allocation48_spill]] %s2660_s25  ;;  %s3820_s25 = smov 95  }
  0x86   : > { %s2673_s2 = sld [smem:[#allocation3 + $0x80]] }
  0x87   : > { %s2805_s0 = sld [smem:[#allocation3 + $0x381]] }
  0x88   : > { %s2836_s24 = sld [smem:[#allocation6 + $0x384]] }
  0x8c   : > { %3819 = sst [smem:[#allocation51_spill]] %s2673_s2 }
  0x8d   : > { %s2690_s2 = sld [smem:[#allocation3 + $0x100]] }
  0x93   : > { %3822 = sst [smem:[#allocation53_spill]] %s2690_s2 }
  0x94   : > { %s2707_s2 = sld [smem:[#allocation3 + $0x180]] }
  0x9a   : > { %3825 = sst [smem:[#allocation56_spill]] %s2707_s2 }
  0x9b   : > { %s2724_s2 = sld [smem:[#allocation3 + $0x200]] }
  0xc6   : > { %v591_v41 = vpop.permute.xlu1 %590 }
  0xc7   : > { %v592_v51 = vrot.slane %v591_v41, 4 }
  0xc9   : > { %v594_v56 = vsel %vm593_vm7, %v592_v51, %v591_v41  ;;  %v810_v41 = vstv %s2515_s29  ;;  %s2551_s29 = sld [smem:[#allocation6 + $0x105]]  ;;  %vm535_vm7 = vcmask 1044480  }
  0xca   : > { %v600_v46 = vpop.permute.xlu1 %599 }
  0xcb   : > { %v601_v57 = vrot.slane %v600_v46, 4 }
  0xcd   : > { %v603_v63 = vsel %vm602_vm8, %v601_v57, %v600_v46  ;;  %vm770_vm8 = vcmask 769024  }
  0xce   : > { %v609_v53 = vpop.permute.xlu1 %608 }
  0xcf   : > { %v610_v0 = vrot.slane %v609_v53, 4 }
  0xd1   : > { %v612_v8 = vsel %vm611_vm9, %v610_v0, %v609_v53  ;;  %vm537_vm9 = vcmask 1045504  }
  0xd2   : > { %v618_v60 = vpop.permute.xlu1 %617 }
  0xd3   : > { %v619_v9 = vrot.slane %v618_v60, 4 }
  0xd5   : > { %v621_v17 = vsel %vm620_vm10, %v619_v9, %v618_v60  ;;  %vm539_vm10 = vcmask 1046528  }
  0xd6   : > { %v627_v11 = vpop.permute.xlu1 %626 }
  0xe0   : > { %v2403_v18 = vpop.xlane.xlu0 %312 }
  0xe4   : > { %v551_v19 = vpop.permute.xlu0 %550 }
  0xe5   : > { %v552_v20 = vrot.slane %v551_v19, 4 }
  0xe7   : > { %v554_v21 = vsel %vm553_vm4, %v552_v20, %v551_v19  ;;  %562 = vst.msk [vmem:[#allocation2 + $0x8] sm:$0xf] %vm561_vm5, %v552_v20  ;;  %v628_v19 = vrot.slane %v627_v11, 4  ;;  %v707_v20 = vstv %s2464_s15  ;;  %s1983_s15 = sld [smem:[#allocation6 + $0x86]]  ;;  %vm719_vm4 = vcmask 900096  }
  0xe8   : > { %560 = vst.msk [vmem:[#allocation2] sm:$0xff] %vm559_vm6, %v554_v21  ;;  %vm736_vm5 = vcmask 785408   ;;  %vm532_vm6 = vcmask 1042432  }
  0xee   : > { %v2408_v24 = vld [vmem:[#allocation2 + $0x8] sm:$0xf] }
  0xef   : > { %v2410_v25 = vld [vmem:[#allocation2] sm:$0xff]  ;;  %v641_v26 = vmul.f32 %v639_v22, %v2408_v24  ;;  %v692_v29 = vmul.f32 %v690_v23, %v2408_v24  ;;  %v743_v32 = vmul.f32 %v741_v28, %v2408_v24  ;;  %v780_v35 = vmul.f32 %v778_v31, %v2408_v24 }
  0xf0   : > { %v691_v27 = vmul.f32 %v690_v23, %v2410_v25  ;;  %v742_v30 = vmul.f32 %v741_v28, %v2410_v25  ;;  %v779_v33 = vmul.f32 %v778_v31, %v2410_v25  ;;  %v827_v36 = vmul.f32 %v826_v34, %v2410_v25 }
  0xf1   : > { %646 = vrot.lane.b32.xlu1 %v641_v26, %s3654_s16  ;;  %v828_v38 = vmul.f32 %v826_v34, %v2408_v24  ;;  %v875_v39 = vmul.f32 %v874_v37, %v2410_v25  ;;  %v876_v42 = vmul.f32 %v874_v37, %v2408_v24  ;;  %v910_v43 = vmul.f32 %v909_v40, %v2410_v25 }
  0xf2   : > { %695 = vrot.lane.b32.xlu0 %v691_v27, %s3652_s18  ;;  %v911_v45 = vmul.f32 %v909_v40, %v2408_v24  ;;  %v958_v47 = vmul.f32 %v957_v44, %v2410_v25  ;;  %v959_v49 = vmul.f32 %v957_v44, %v2408_v24  ;;  %v1006_v50 = vmul.f32 %v1005_v48, %v2410_v25 }
  0xf3   : > { %v1007_v54 = vmul.f32 %v1005_v48, %v2408_v24  ;;  %v1041_v55 = vmul.f32 %v1040_v52, %v2410_v25  ;;  %v1042_v59 = vmul.f32 %v1040_v52, %v2408_v24  ;;  %v1089_v61 = vmul.f32 %v1088_v58, %v2410_v25 }
  0xf4   : > { %v2460_v62 = vmul.f32 %v594_v56, %v2410_v25  ;;  %v1090_v3 = vmul.f32 %v1088_v58, %v2408_v24  ;;  %v2470_v7 = vmul.f32 %v603_v63, %v2410_v25  ;;  %v640_v12 = vmul.f32 %v639_v22, %v2410_v25 }
  0xf5   : > { %697 = vrot.lane.b32.xlu1 %v692_v29, %s3652_s18  ;;  %v2481_v13 = vmul.f32 %v592_v51, %v2408_v24  ;;  %v2485_v15 = vmul.f32 %v612_v8, %v2410_v25  ;;  %v2494_v22 = vmul.f32 %v601_v57, %v2408_v24  ;;  %v2497_v23 = vmul.f32 %v621_v17, %v2410_v25 }
  0xf6   : > { %746 = vrot.lane.b32.xlu0 %v742_v30, %s3656_s20  ;;  %v657_v6 = vmul.f32 %v656_v2, %v2460_v62  ;;  %v674_v14 = vmul.f32 %v673_v10, %v2470_v7  ;;  %v630_v27 = vsel %vm629_vm11, %v628_v19, %v627_v11  ;;  %v724_v28 = vstv %s2474_s17  ;;  %s1985_s17 = sld [smem:[#allocation6 + $0x88]] }
  0xf7   : > { %3787 = vst [vmem:[#allocation24_spill] sm:$0xff] %v2485_v15  ;;  %v658_v21 = vmul.f32 %v656_v2, %v2481_v13  ;;  %3788 = vst [vmem:[#allocation25_spill] sm:$0xff] %v2494_v22  ;;  %v708_v26 = vmul.f32 %v707_v20, %v2485_v15  ;;  %v675_v29 = vmul.f32 %v673_v10, %v2494_v22  ;;  %v794_v37 = vstv %s2502_s9  ;;  %s2545_s9 = sld [smem:[#allocation6 + $0x103]] }
  0xf8   : > { %3789 = vst [vmem:[#allocation26_spill] sm:$0xff] %v2497_v23  ;;  %v2507_v30 = vmul.f32 %v610_v0, %v2408_v24  ;;  %v2510_v31 = vmul.f32 %v630_v27, %v2410_v25  ;;  %v2519_v34 = vmul.f32 %v619_v9, %v2408_v24  ;;  %v795_v40 = vmul.f32 %v794_v37, %v2460_v62 }
  0xf9   : > { %748 = vrot.lane.b32.xlu1 %v743_v32, %s3656_s20  ;;  %v725_v32 = vmul.f32 %v724_v28, %v2497_v23  ;;  %v842_v44 = vstv %s1982_s13  ;;  %v812_v48 = vmul.f32 %v810_v41, %v2494_v22  ;;  %s2558_s13 = sld [smem:[#allocation6 + $0x106]] }
  0xfa   : > { %783 = vrot.lane.b32.xlu0 %v779_v33, %s3654_s16  ;;  %3790 = vst [vmem:[#allocation27_spill] sm:$0xff] %v2507_v30  ;;  %3791 = vst [vmem:[#allocation28_spill] sm:$0xff] %v2510_v31  ;;  %v758_v33 = vstv %s2489_s21  ;;  %v843_v46 = vmul.f32 %v842_v44, %v2485_v15  ;;  %s1988_s21 = sld [smem:[#allocation6 + $0x102]]  ;;  %v844_v51 = vmul.f32 %v842_v44, %v2507_v30 }
  0xfb   : > { %3792 = vst [vmem:[#allocation29_spill] sm:$0xff] %v2519_v34 }
  0xfd   : > { %785 = vrot.lane.b32.xlu1 %v780_v35, %s3654_s16  ;;  %v709_v35 = vmul.f32 %v707_v20, %v2507_v30  ;;  %v941_v56 = vstv %s2545_s9  ;;  %s2572_s9 = sld [smem:[#allocation6 + $0x185]] }
  0xfe   : > { %831 = vrot.lane.b32.xlu0 %v827_v36, %s3652_s18  ;;  %v759_v36 = vmul.f32 %v758_v33, %v2510_v31  ;;  %v942_v58 = vmul.f32 %v941_v56, %v2470_v7  ;;  %v943_v0 = vmul.f32 %v941_v56, %v2494_v22 }
  0xff   : > { %v989_v63 = vstv %s2558_s13  ;;  %s3795_s13 = smov 96  }
 0x100   : > { %v925_v53 = vstv %s1988_s21  ;;  %s2569_s21 = sld [smem:[#allocation6 + $0x183]]  ;;  %v990_v2 = vmul.f32 %v989_v63, %v2497_v23  ;;  %v991_v10 = vmul.f32 %v989_v63, %v2519_v34  ;;  %v1235_v63 = vstv %s2604_s1 }
 0x101   : > { %833 = vrot.lane.b32.xlu1 %v828_v38, %s3652_s18  ;;  %v2527_v38 = vmul.f32 %v628_v19, %v2408_v24  ;;  %v927_v60 = vmul.f32 %v925_v53, %v2481_v13  ;;  %s3860_s1 = sld [smem:[#allocation34_spill]] }
 0x102   : > { %879 = vrot.lane.b32.xlu0 %v875_v39, %s3656_s20  ;;  %v726_v39 = vmul.f32 %v724_v28, %v2519_v34 }
 0x103   : > { %3793 = vst [vmem:[#allocation30_spill] sm:$0xff] %v2527_v38  ;;  %v1104_v19 = vstv %s2572_s9  ;;  %s2650_s9 = sld [smem:[#allocation6 + $0x303]] }
 0x105   : > { %881 = vrot.lane.b32.xlu1 %v876_v42, %s3656_s20  ;;  %v760_v42 = vmul.f32 %v758_v33, %v2527_v38  ;;  %v1106_v33 = vmul.f32 %v1104_v19, %v2507_v30 }
 0x106   : > { %914 = vrot.lane.b32.xlu0 %v910_v43, %s3654_s16  ;;  %v811_v43 = vmul.f32 %v810_v41, %v2470_v7 }
 0x109   : > { %916 = vrot.lane.b32.xlu1 %v911_v45, %s3654_s16  ;;  %v796_v45 = vmul.f32 %v794_v37, %v2481_v13  ;;  %3813 = sst [smem:[#allocation45_spill]] %s2650_s9 }
 0x10a   : > { %962 = vrot.lane.b32.xlu0 %v958_v47, %s3652_s18  ;;  %v858_v47 = vstv %s1983_s15  ;;  %s2562_s15 = sld [smem:[#allocation6 + $0x108]] }
 0x10b   : > { %s2668_s9 = sld [smem:[#allocation3 + $0x3]] }
 0x10d   : > { %964 = vrot.lane.b32.xlu1 %v959_v49, %s3652_s18  ;;  %v859_v49 = vmul.f32 %v858_v47, %v2497_v23 }
 0x10e   : > { %1010 = vrot.lane.b32.xlu0 %v1006_v50, %s3656_s20  ;;  %v890_v50 = vstv %s1985_s17  ;;  %s2565_s17 = sld [smem:[#allocation6 + $0x182]] }
 0x10f   : > { %v891_v52 = vmul.f32 %v890_v50, %v2510_v31  ;;  %v892_v57 = vmul.f32 %v890_v50, %v2527_v38 }
 0x111   : > { %1012 = vrot.lane.b32.xlu1 %v1007_v54, %s3656_s20  ;;  %v860_v54 = vmul.f32 %v858_v47, %v2519_v34  ;;  %s2582_s20 = sld [smem:[#allocation6 + $0x188]] }
 0x112   : > { %1045 = vrot.lane.b32.xlu0 %v1041_v55, %s3654_s16  ;;  %v926_v55 = vmul.f32 %v925_v53, %v2460_v62  ;;  %3818 = sst [smem:[#allocation50_spill]] %s2668_s9 }
 0x113   : > { %s2685_s9 = sld [smem:[#allocation3 + $0x83]] }
 0x114   : > { %v1056_v9 = vstv %s2565_s17  ;;  %s3803_s17 = smov 126   ;;  %s3838_s12 = sld [smem:[#allocation50_spill]] }
 0x115   : > { %1047 = vrot.lane.b32.xlu1 %v1042_v59, %s3654_s16  ;;  %v973_v59 = vstv %s2551_s29  ;;  %s2585_s29 = sld [smem:[#allocation6 + $0x201]]  ;;  %v1057_v11 = vmul.f32 %v1056_v9, %v2460_v62  ;;  %v1058_v20 = vmul.f32 %v1056_v9, %v2481_v13 }
 0x116   : > { %1093 = vrot.lane.b32.xlu0 %v1089_v61, %s3652_s18  ;;  %v974_v61 = vmul.f32 %v973_v59, %v2485_v15 }
 0x117   : > { %v1152_v37 = vstv %s2582_s20  ;;  %s2694_s20 = sld [smem:[#allocation3 + $0x101]] }
 0x118   : > { %v1154_v50 = vmul.f32 %v1152_v37, %v2527_v38 }
 0x119   : > { %1095 = vrot.lane.b32.xlu1 %v1090_v3, %s3652_s18  ;;  %s2575_s18 = sld [smem:[#allocation6 + $0x186]]  ;;  %v1021_v3 = vstv %s2562_s15  ;;  %s3798_s15 = smov 94  }
 0x11a   : > { %661 = vrot.lane.b32.xlu0 %v657_v6, %s3662_s19  ;;  %v975_v6 = vmul.f32 %v973_v59, %v2507_v30  ;;  %v1022_v8 = vmul.f32 %v1021_v3, %v2510_v31  ;;  %3821 = sst [smem:[#allocation52_spill]] %s2685_s9 }
 0x11b   : > { %s2702_s9 = sld [smem:[#allocation3 + $0x103]] }
 0x11c   : > { %s3840_s7 = sld [smem:[#allocation52_spill]] }
 0x11d   : > { %644 = vrot.lane.b32.xlu1 %v640_v12, %s3654_s16  ;;  %s2578_s16 = sld [smem:[#allocation6 + $0x187]]  ;;  %v1072_v12 = vstv %s2569_s21  ;;  %s3808_s21 = smov 112  }
 0x11e   : > { %678 = vrot.lane.b32.xlu0 %v674_v14, %s3666_s22  ;;  %v1023_v14 = vmul.f32 %v1021_v3, %v2527_v38  ;;  %v1073_v17 = vmul.f32 %v1072_v12, %v2470_v7  ;;  %v1074_v27 = vmul.f32 %v1072_v12, %v2494_v22 }
 0x121   : > { %663 = vrot.lane.b32.xlu1 %v658_v21, %s3662_s19  ;;  %v1105_v21 = vmul.f32 %v1104_v19, %v2485_v15  ;;  %3824 = sst [smem:[#allocation55_spill]] %s2702_s9 }
 0x122   : > { %712 = vrot.lane.b32.xlu0 %v708_v26, %s3664_s23  ;;  %v1120_v26 = vstv %s2575_s18  ;;  %s2663_s18 = sld [smem:[#allocation3 + $0x2]] }
 0x123   : > { %v1121_v28 = vmul.f32 %v1120_v26, %v2497_v23  ;;  %s2719_s9 = sld [smem:[#allocation3 + $0x183]] }
 0x125   : > { %680 = vrot.lane.b32.xlu1 %v675_v29, %s3666_s22  ;;  %v1136_v29 = vstv %s2578_s16  ;;  %s2677_s16 = sld [smem:[#allocation3 + $0x81]] }
 0x126   : > { %729 = vrot.lane.b32.xlu0 %v725_v32, %s3660_s8 }
 0x128   : > { %3817 = sst [smem:[#allocation49_spill]] %s2663_s18 }
 0x129   : > { %714 = vrot.lane.b32.xlu1 %v709_v35, %s3664_s23  ;;  %s2680_s18 = sld [smem:[#allocation3 + $0x82]] }
 0x12a   : > { %763 = vrot.lane.b32.xlu0 %v759_v36, %s3658_s14  ;;  %v1137_v36 = vmul.f32 %v1136_v29, %v2410_v25  ;;  %s3837_s30 = sld [smem:[#allocation49_spill]] }
 0x12d   : > { %731 = vrot.lane.b32.xlu1 %v726_v39, %s3660_s8 }
 0x12e   : > { %799 = vrot.lane.b32.xlu0 %v795_v40, %s3662_s19  ;;  %v1122_v40 = vmul.f32 %v1120_v26, %v2519_v34 }
 0x131   : > { %765 = vrot.lane.b32.xlu1 %v760_v42, %s3658_s14  ;;  %v1153_v42 = vmul.f32 %v1152_v37, %v2510_v31 }
 0x132   : > { %815 = vrot.lane.b32.xlu0 %v811_v43, %s3666_s22  ;;  %v1171_v43 = vstv %s2585_s29  ;;  %s2711_s29 = sld [smem:[#allocation3 + $0x181]] }
 0x133   : > { %v1172_v47 = vmul.f32 %v1171_v43, %v2410_v25  ;;  %v1173_v56 = vmul.f32 %v1171_v43, %v2408_v24  ;;  %v1236_v43 = vmul.f32 %v1235_v63, %v2485_v15 }
 0x135   : > { %801 = vrot.lane.b32.xlu1 %v796_v45, %s3662_s19  ;;  %v1138_v45 = vmul.f32 %v1136_v29, %v2408_v24 }
 0x136   : > { %847 = vrot.lane.b32.xlu0 %v843_v46, %s3664_s23 }
 0x138   : > { %v391_v26 = vstv %s2711_s29  ;;  %s2868_s29 = sld [smem:[#allocation6 + $0x286]] }
 0x139   : > { %817 = vrot.lane.b32.xlu1 %v812_v48, %s3666_s22 }
 0x13a   : > { %863 = vrot.lane.b32.xlu0 %v859_v49, %s3660_s8 }
 0x13d   : > { %849 = vrot.lane.b32.xlu1 %v844_v51, %s3664_s23 }
 0x13e   : > { %895 = vrot.lane.b32.xlu0 %v891_v52, %s3658_s14 }
 0x141   : > { %865 = vrot.lane.b32.xlu1 %v860_v54, %s3660_s8  ;;  %s2591_s8 = sld [smem:[#allocation6 + $0x202]]  ;;  %v2249_v54 = vmov 0  }
 0x142   : > { %930 = vrot.lane.b32.xlu0 %v926_v55, %s3662_s19  ;;  %2124 = vset.pattern.permute.xlu1 %v2249_v54 }
 0x143   : > { %2123 = vset.pattern.permute.xlu0 %v2249_v54  ;;  %v357_v54 = vstv %s3840_s7  ;;  %s3871_s7 = smov 127  }
 0x145   : > { %897 = vrot.lane.b32.xlu1 %v892_v57, %s3658_s14  ;;  %s2588_s14 = sld [smem:[#allocation6 + $0x80]] }
 0x146   : > { %946 = vrot.lane.b32.xlu0 %v942_v58, %s3666_s22 }
 0x147   : > { %v1187_v48 = vstv %s2591_s8  ;;  %s2728_s8 = sld [smem:[#allocation3 + $0x201]] }
 0x148   : > { %v1188_v52 = vmul.f32 %v1187_v48, %v2460_v62 }
 0x149   : > { %932 = vrot.lane.b32.xlu1 %v927_v60, %s3662_s19  ;;  %s2595_s19 = sld [smem:[#allocation6 + $0x203]] }
 0x14a   : > { %978 = vrot.lane.b32.xlu0 %v974_v61, %s3664_s23  ;;  %s2598_s23 = sld [smem:[#allocation6 + $0x204]] }
 0x14b   : > { %3794 = sst [smem:[#allocation31_spill]] %s2588_s14 }
 0x14c   : > { %s2759_s14 = sld [smem:[#allocation3 + $0x283]] }
 0x14d   : > { %948 = vrot.lane.b32.xlu1 %v943_v0, %s3666_s22  ;;  %s2608_s22 = sld [smem:[#allocation6 + $0x206]] }
 0x14e   : > { %994 = vrot.lane.b32.xlu0 %v990_v2, %s3795_s13  ;;  %v1189_v2 = vmul.f32 %v1187_v48, %v2481_v13  ;;  %v326_v48 = vstv %s3837_s30  ;;  %s2819_s30 = sld [smem:[#allocation3 + $0x383]] }
 0x14f   : > { %v1203_v53 = vstv %s2595_s19  ;;  %s2741_s19 = sld [smem:[#allocation3 + $0x280]] }
 0x150   : > { %v1204_v58 = vmul.f32 %v1203_v53, %v2470_v7  ;;  %v1219_v59 = vstv %s2598_s23  ;;  %v1205_v29 = vmul.f32 %v1203_v53, %v2494_v22  ;;  %s3843_s23 = sld [smem:[#allocation53_spill]]  ;;  %v350_v53 = vstv %s2680_s18 }
 0x151   : > { %980 = vrot.lane.b32.xlu1 %v975_v6, %s3797_s5  ;;  %v1267_v6 = vstv %s2611_s6  ;;  %s3836_s6 = sld [smem:[#allocation48_spill]] }
 0x152   : > { %1026 = vrot.lane.b32.xlu0 %v1022_v8, %s3798_s15  ;;  %v3727_v8 = vstv %s2614_s10  ;;  %3831 = sst [smem:[#allocation60_spill]] %s2759_s14 }
 0x153   : > { %v1251_v3 = vstv %s2608_s22  ;;  %s3834_s10 = sld [smem:[#allocation47_spill]] }
 0x154   : > { %s2773_s14 = sld [smem:[#allocation3 + $0x301]]  ;;  %v1252_v37 = vmul.f32 %v1251_v3, %v2497_v23 }
 0x155   : > { %996 = vrot.lane.b32.xlu1 %v991_v10, %s3795_s13  ;;  %v1220_v10 = vmul.f32 %v1219_v59, %v2410_v25  ;;  %3841 = sst [smem:[#allocation47_spill]] %s2787_s27 }
 0x156   : > { %1061 = vrot.lane.b32.xlu0 %v1057_v11, %s3803_s17  ;;  %v1302_v11 = vstv %s2617_s26  ;;  %s2779_s26 = sld [smem:[#allocation3 + $0x302]] }
 0x157   : > { %3845 = sst [smem:[#allocation48_spill]] %s2799_s28  ;;  %s3867_s28 = smov 94  }
 0x158   : > { %s2829_s18 = sld [smem:[#allocation6 + $0x304]] }
 0x159   : > { %1028 = vrot.lane.b32.xlu1 %v1023_v14, %s3798_s15  ;;  %s3866_s27 = sld [smem:[#allocation55_spill]] }
 0x15a   : > { %1077 = vrot.lane.b32.xlu0 %v1073_v17, %s3808_s21  ;;  %s3908_s22 = sld [smem:[#allocation46_spill]] }
 0x15d   : > { %1063 = vrot.lane.b32.xlu1 %v1058_v20, %s3803_s17  ;;  %v405_v20 = vstv %s2719_s9  ;;  %s3861_s9 = smov 95  }
 0x15e   : > { %1109 = vrot.lane.b32.xlu0 %v1105_v21, %s3797_s5 }
 0x161   : > { %1079 = vrot.lane.b32.xlu1 %v1074_v27, %s3808_s21 }
 0x162   : > { %1125 = vrot.lane.b32.xlu0 %v1121_v28, %s3795_s13 }
 0x163   : > { %v2665_v32 = vpop.permute.xlu1 %646 }
 0x164   : > { %v2670_v35 = vpop.permute.xlu0 %695 }
 0x165   : > { %1111 = vrot.lane.b32.xlu1 %v1106_v33, %s3797_s5  ;;  %s2697_s5 = sld [smem:[#allocation3 + $0x102]]  ;;  %v1253_v33 = vmul.f32 %v1251_v3, %v2519_v34 }
 0x166   : > { %1141 = vrot.lane.b32.xlu0 %v1137_v36, %s3820_s25 }
 0x167   : > { %v2682_v39 = vpop.permute.xlu1 %697 }
 0x168   : > { %v2687_v41 = vpop.permute.xlu0 %746 }
 0x169   : > { %1127 = vrot.lane.b32.xlu1 %v1122_v40, %s3795_s13  ;;  %s3826_s13 = smov 127   ;;  %v2790_v40 = vmul.f32 0.00390625, %v2403_v18  ;;  %v343_v18 = vstv %s2677_s16  ;;  %s3881_s16 = sld [smem:[#allocation36_spill]] }
 0x16a   : > { %1157 = vrot.lane.b32.xlu0 %v1153_v42, %s3798_s15 }
 0x16b   : > { %3823 = sst [smem:[#allocation54_spill]] %s2697_s5  ;;  %v2699_v44 = vpop.permute.xlu1 %748  ;;  %v344_v27 = vmul.f32 %v343_v18, %v2790_v40  ;;  %v1237_v18 = vmul.f32 %v1235_v63, %v2507_v30 }
 0x16c   : > { %v2704_v46 = vpop.permute.xlu0 %783  ;;  %s2714_s5 = sld [smem:[#allocation3 + $0x182]] }
 0x16d   : > { %1143 = vrot.lane.b32.xlu1 %v1138_v45, %s3820_s25  ;;  %s2731_s25 = sld [smem:[#allocation3 + $0x202]]  ;;  %v316_v45 = vstv %s3834_s10  ;;  %v346_v12 = vrot.slane %v344_v27, 1 }
 0x16e   : > { %1176 = vrot.lane.b32.xlu0 %v1172_v47, %s3826_s13  ;;  %v319_v47 = vstv %s3836_s6  ;;  %s3844_s4 = sld [smem:[#allocation54_spill]]  ;;  %v317_v60 = vmul.f32 %v316_v45, %v2790_v40  ;;  %v351_v45 = vmul.f32 %v350_v53, %v2790_v40  ;;  %v2921_v53 = vmul.f32 %v405_v20, %v2790_v40 }
 0x16f   : > { %v2716_v49 = vpop.permute.xlu1 %785  ;;  %s2811_s6 = sld [smem:[#allocation3 + $0x382]]  ;;  %v320_v36 = vmul.f32 %v319_v47, %v2790_v40 }
 0x170   : > { %v2721_v51 = vpop.permute.xlu0 %831 }
 0x171   : > { %1159 = vrot.lane.b32.xlu1 %v1154_v50, %s3798_s15  ;;  %s2736_s15 = sld [smem:[#allocation3 + $0x203]]  ;;  %v333_v50 = vstv %s3838_s12 }
 0x172   : > { %1192 = vrot.lane.b32.xlu0 %v1188_v52, %s3803_s17  ;;  %v398_v21 = vstv %s2714_s5  ;;  %s2861_s5 = sld [smem:[#allocation6 + $0x305]] }
 0x173   : > { %3827 = sst [smem:[#allocation57_spill]] %s2731_s25  ;;  %v2733_v55 = vpop.permute.xlu1 %833 }
 0x174   : > { %v2738_v57 = vpop.permute.xlu0 %879  ;;  %s2745_s25 = sld [smem:[#allocation3 + $0x281]] }
 0x175   : > { %1178 = vrot.lane.b32.xlu1 %v1173_v56, %s3826_s13  ;;  %s2767_s13 = sld [smem:[#allocation3 + $0x300]] }
 0x176   : > { %1208 = vrot.lane.b32.xlu0 %v1204_v58, %s3808_s21  ;;  %v1221_v58 = vmul.f32 %v1219_v59, %v2408_v24  ;;  %s3850_s10 = sld [smem:[#allocation57_spill]]  ;;  %v322_v59 = vrot.slane %v320_v36, 1  ;;  %v327_v36 = vmul.f32 %v326_v48, %v2790_v40 }
 0x177   : > { %3828 = sst [smem:[#allocation58_spill]] %s2736_s15  ;;  %v2753_v0 = vpop.permute.xlu1 %881 }
 0x178   : > { %s2751_s15 = sld [smem:[#allocation3 + $0x282]]  ;;  %v2761_v9 = vpop.permute.xlu0 %914 }
 0x179   : > { %1194 = vrot.lane.b32.xlu1 %v1189_v2, %s3803_s17  ;;  %s3848_s17 = sld [smem:[#allocation56_spill]]  ;;  %v364_v2 = vstv %s3843_s23  ;;  %s3856_s23 = smov 96  }
 0x17a   : > { %s3878_s12 = sld [smem:[#allocation38_spill]] }
 0x17b   : > { %3833 = sst [smem:[#allocation61_spill]] %s2767_s13  ;;  %v2781_v28 = vpop.permute.xlu1 %916 }
 0x17c   : > { %s3839_s13 = sld [smem:[#allocation51_spill]]  ;;  %v2792_v42 = vpop.permute.xlu0 %962 }
 0x17d   : > { %3842 = vst [vmem:[#allocation62_spill] sm:$0xff] %v2792_v42  ;;  %1210 = vrot.lane.b32.xlu1 %v1205_v29, %s3808_s21  ;;  %v374_v29 = vstv %s3844_s4  ;;  %s3855_s21 = sld [smem:[#allocation60_spill]] }
 0x17e   : > { %3829 = sst [smem:[#allocation59_spill]] %s2751_s15  ;;  %s3835_s15 = smov 111  }
 0x17f   : > { %1224 = vrot.lane.b32.xlu0 %v1220_v10, %s3835_s15  ;;  %v2813_v56 = vpop.permute.xlu1 %964  ;;  %v367_v10 = vstv %s2694_s20  ;;  %s3854_s20 = sld [smem:[#allocation59_spill]] }
 0x180   : > { %3849 = vst [vmem:[#allocation63_spill] sm:$0xff] %v2813_v56  ;;  %s3857_s3 = sld [smem:[#allocation61_spill]]  ;;  %v368_v19 = vmul.f32 %v367_v10, %v2790_v40  ;;  %v1284_v10 = vmul.f32 %v3727_v8, %v2510_v31  ;;  %v334_v8 = vmul.f32 %v333_v50, %v2790_v40  ;;  %v365_v50 = vmul.f32 %v364_v2, %v2790_v40 }
 0x181   : > { %1226 = vrot.lane.b32.xlu1 %v1221_v58, %s3835_s15  ;;  %v329_v58 = vrot.slane %v327_v36, 2  ;;  %v375_v36 = vmul.f32 %v374_v29, %v2790_v40  ;;  %s3870_s4 = sld [smem:[#allocation37_spill]]  ;;  %v399_v29 = vmul.f32 %v398_v21, %v2790_v40  ;;  %v3873_v21 = vstv %s3848_s17  ;;  %s3880_s17 = smov 126  }
 0x182   : > { %v340_v52 = vstv %s3839_s13  ;;  %s3852_s13 = sld [smem:[#allocation58_spill]]  ;;  %v389_v20 = vmul.f32 %v3873_v21, %v2790_v40  ;;  %v3879_v21 = vstv %s2724_s2 }
 0x183   : > { %1240 = vrot.lane.b32.xlu0 %v1236_v43, %s3847_s11  ;;  %v2821_v43 = vpop.permute.xlu0 %1010  ;;  %v2842_v17 = vpop.permute.xlu1 %1012  ;;  %s3886_s2 = sld [smem:[#allocation40_spill]] }
 0x184   : > { %3851 = vst [vmem:[#allocation64_spill] sm:$0xff] %v2821_v43  ;;  %3858 = vst [vmem:[#allocation65_spill] sm:$0xff] %v2842_v17 }
 0x185   : > { %1242 = vrot.lane.b32.xlu1 %v1237_v18, %s3847_s11  ;;  %v324_v18 = vadd.f32 %v322_v59, %v317_v60  ;;  %v370_v60 = vrot.slane %v368_v19, 1  ;;  %v392_v59 = vmul.f32 %v391_v26, %v2790_v40  ;;  %v1303_v19 = vmul.f32 %v1302_v11, %v2410_v25  ;;  %s3877_s11 = sld [smem:[#allocation32_spill]] }
 0x187   : > { %1256 = vrot.lane.b32.xlu0 %v1252_v37, %s3856_s23  ;;  %v2850_v14 = vpop.permute.xlu0 %1045  ;;  %v1268_v37 = vmul.f32 %v1267_v6, %v2410_v25  ;;  %v2870_v27 = vpop.permute.xlu1 %1047  ;;  %v331_v26 = vadd.f32 %v329_v58, %v324_v18  ;;  %v336_v58 = vrot.slane %v334_v8, 3  ;;  %v372_v18 = vadd.f32 %v370_v60, %v365_v50 }
 0x188   : > { %3859 = vst [vmem:[#allocation66_spill] sm:$0xff] %v2850_v14  ;;  %3862 = vst [vmem:[#allocation67_spill] sm:$0xff] %v2870_v27  ;;  %v394_v2 = vrot.slane %v392_v59, 1  ;;  %v3875_v60 = vstv %s3870_s4 }
 0x189   : > { %1258 = vrot.lane.b32.xlu1 %v1253_v33, %s3856_s23  ;;  %v353_v33 = vrot.slane %v351_v45, 2  ;;  %v1319_v59 = vmul.f32 %v3875_v60, %v2460_v62  ;;  %v2943_v50 = vadd.f32 %v336_v58, %v331_v26  ;;  %v413_v60 = vmul.f32 %v3879_v21, %v2790_v40 }
 0x18a   : > { %v3882_v58 = vstv %s2728_s8  ;;  %v3885_v21 = vstv %s3852_s13  ;;  %s3892_s8 = sld [smem:[#allocation41_spill]] }
 0x18b   : > { %1272 = vrot.lane.b32.xlu0 %v1268_v37, %s3861_s9  ;;  %v341_v37 = vmul.f32 %v340_v52, %v2790_v40  ;;  %v2878_v48 = vpop.permute.xlu0 %1093  ;;  %v2894_v47 = vpop.permute.xlu1 %1095  ;;  %v3890_v61 = vstv %s3877_s11  ;;  %s3905_s13 = sld [smem:[#allocation44_spill]] }
 0x18c   : > { %3863 = vst [vmem:[#allocation68_spill] sm:$0xff] %v2878_v48  ;;  %3868 = vst [vmem:[#allocation69_spill] sm:$0xff] %v2894_v47 }
 0x18d   : > { %v348_v3 = vadd.f32 %v346_v12, %v341_v37  ;;  %v1269_v12 = vmul.f32 %v1267_v6, %v2408_v24  ;;  %v358_v37 = vmul.f32 %v357_v54, %v2790_v40  ;;  %v3869_v6 = vstv %s3866_s27  ;;  %s3876_s27 = sld [smem:[#allocation31_spill]] }
 0x18e   : > { %v2916_v45 = vmul.f32 %v3869_v6, %v2790_v40  ;;  %v3872_v6 = vstv %s3860_s1  ;;  %s3883_s1 = sld [smem:[#allocation39_spill]] }
 0x18f   : > { %1288 = vrot.lane.b32.xlu0 %v1284_v10, %s3867_s28  ;;  %v2905_v10 = vpop.permute.xlu0 %661  ;;  %1274 = vrot.lane.b32.xlu1 %v1269_v12, %s3861_s9  ;;  %v355_v54 = vadd.f32 %v353_v33, %v348_v3  ;;  %v2926_v63 = vpop.permute.xlu1 %644  ;;  %v1285_v12 = vmul.f32 %v3872_v6, %v2527_v38  ;;  %v360_v3 = vrot.slane %v358_v37, 3  ;;  %v377_v33 = vrot.slane %v375_v36, 2 }
 0x190   : > { %v384_v37 = vrot.slane %v2916_v45, 3  ;;  %v408_v6 = vrot.slane %v2921_v53, 3  ;;  %v396_v45 = vadd.f32 %v394_v2, %v389_v20  ;;  %v1304_v53 = vmul.f32 %v1302_v11, %v2408_v24 }
 0x191   : > { %v2947_v36 = vadd.f32 %v360_v3, %v355_v54  ;;  %v379_v26 = vadd.f32 %v377_v33, %v372_v18  ;;  %v3884_v54 = vstv %s3850_s10  ;;  %v2968_v18 = vmul.f32 %v3885_v21, %v2790_v40  ;;  %s3901_s10 = smov 112  }
 0x192   : > { %v3887_v2 = vstv %s2741_s19  ;;  %v3888_v20 = vstv %s2745_s25  ;;  %v3893_v21 = vstv %s3878_s12  ;;  %s3895_s19 = sld [smem:[#allocation42_spill]] }
 0x193   : > { %1307 = vrot.lane.b32.xlu0 %v1303_v19, %s3871_s7  ;;  %v2936_v19 = vmul.f32 %v2399_v16, %v2410_v25  ;;  %v2938_v8 = vpop.permute.xlu0 %678  ;;  %1290 = vrot.lane.b32.xlu1 %v1285_v12, %s3867_s28  ;;  %v401_v16 = vrot.slane %v399_v29, 2  ;;  %v416_v12 = vmul.f32 %v3882_v58, %v2790_v40  ;;  %v423_v29 = vmul.f32 %v3884_v54, %v2790_v40  ;;  %v2960_v3 = vpop.permute.xlu1 %663  ;;  %s3898_s25 = sld [smem:[#allocation43_spill]] }
 0x194   : > { %v437_v33 = vmul.f32 %v3887_v2, %v2790_v40  ;;  %v3889_v58 = vstv %s3876_s27  ;;  %v1335_v38 = vmul.f32 %v3893_v21, %v2470_v7  ;;  %v3894_v2 = vstv %s3854_s20  ;;  %s3906_s20 = sld [smem:[#allocation45_spill]] }
 0x195   : > { %3874 = vst [vmem:[#allocation70_spill] sm:$0xff] %v2936_v19  ;;  %v2979_v54 = vmul.f32 %v3889_v58, %v2936_v19  ;;  %v2984_v52 = vmul.f32 %v3890_v61, %v2936_v19  ;;  %v447_v31 = vmul.f32 %v3894_v2, %v2790_v40  ;;  %v3897_v61 = vstv %s3870_s4  ;;  %s3919_s4 = sld [smem:[#allocation47_spill]] }
 0x196   : > { %v1320_v48 = vmul.f32 %v3897_v61, %v2481_v13  ;;  %v3899_v5 = vstv %s3883_s1  ;;  %v3902_v2 = vstv %s3878_s12  ;;  %v418_v61 = vrot.slane %v416_v12, 1  ;;  %s3923_s27 = sld [smem:[#allocation48_spill]] }
 0x197   : > { %1323 = vrot.lane.b32.xlu0 %v1319_v59, %s3880_s17  ;;  %v440_v59 = vmul.f32 %v3888_v20, %v2790_v40  ;;  %3891 = vst [vmem:[#allocation71_spill] sm:$0xff] %v2984_v52  ;;  %v2986_v11 = vpop.permute.xlu0 %712  ;;  %v3896_v20 = vstv %s3881_s16  ;;  %1309 = vrot.lane.b32.xlu1 %v1304_v53, %s3871_s7  ;;  %v1351_v47 = vmul.f32 %v3899_v5, %v2410_v25  ;;  %v3900_v21 = vmov %v3899_v5  ;;  %v681_v5 = vpop.permute.xlu1 %680 }
 0x198   : > { %v2997_v58 = vmul.f32 %v3896_v20, %v2936_v19  ;;  %v1352_v34 = vmul.f32 %v3900_v21, %v2408_v24  ;;  %v1336_v14 = vmul.f32 %v3902_v2, %v2494_v22  ;;  %v3903_v20 = vstv %s3886_s2  ;;  %s2013_s2 = sld [smem:[#allocation6 + $0x280]] }
 0x199   : > { %v1367_v19 = vmul.f32 %v3903_v20, %v2485_v15  ;;  %v3904_v53 = vmov %v3903_v20  ;;  %v3907_v21 = vstv %s3892_s8  ;;  %v3910_v20 = vstv %s3895_s19  ;;  %s2022_s8 = sld [smem:[#allocation6 + $0x300]] }
 0x19a   : > { %v3019_v43 = vmul.f32 %v3904_v53, %v2507_v30  ;;  %v3909_v27 = vmov %v3907_v21  ;;  %v3032_v17 = vmul.f32 %v3910_v20, %v2410_v25  ;;  %v3911_v53 = vmov %v3910_v20  ;;  %s2031_s19 = sld [smem:[#allocation6 + $0x380]] }
 0x19b   : > { %1339 = vrot.lane.b32.xlu0 %v1335_v38, %s3901_s10  ;;  %v1434_v38 = vmul.f32 %v3907_v21, %v2410_v25  ;;  %v3027_v2 = vmul.f32 %v3909_v27, %v2408_v24  ;;  %v3037_v30 = vmul.f32 %v3911_v53, %v2408_v24  ;;  %v3039_v12 = vpop.permute.xlu0 %729  ;;  %v3912_v23 = vstv %s3898_s25  ;;  %1325 = vrot.lane.b32.xlu1 %v1320_v48, %s3880_s17  ;;  %s3963_s25 = sld [smem:[#allocation13_spill]] }
 0x19c   : > { %v3044_v15 = vmul.f32 %v3912_v23, %v2460_v62  ;;  %v3913_v21 = vmov %v3912_v23  ;;  %v403_v27 = vadd.f32 %v401_v16, %v396_v45  ;;  %v442_v4 = vrot.slane %v440_v59, 1 }
 0x19d   : > { %v3049_v42 = vmul.f32 %v3913_v21, %v2481_v13  ;;  %v648_v25 = vrot.slane %v2926_v63, 4  ;;  %v3914_v20 = vstv %s3905_s13  ;;  %v3915_v53 = vstv %s3906_s20 }
 0x19e   : > { %v3056_v24 = vmul.f32 %v3914_v20, %v2460_v62  ;;  %v3061_v56 = vmul.f32 %v3915_v53, %v2470_v7  ;;  %v3916_v23 = vmov %v3914_v20  ;;  %v3917_v16 = vstv %s3908_s22 }
 0x19f   : > { %v3066_v52 = vmul.f32 %v3916_v23, %v2481_v13  ;;  %1355 = vrot.lane.b32.xlu0 %v1351_v47, %s3835_s15  ;;  %v3072_v45 = vmul.f32 %v3917_v16, %v2470_v7  ;;  %v3074_v48 = vadd.f32 %v384_v37, %v379_v26  ;;  %v420_v59 = vadd.f32 %v418_v61, %v413_v60  ;;  %v3081_v13 = vpop.permute.xlu1 %714  ;;  %v3084_v7 = vpop.permute.xlu0 %763 }
 0x1a0   : > { %v3918_v62 = vstv %s2773_s14  ;;  %v649_v20 = vrot.slane %v2665_v32, 4  ;;  %v666_v53 = vrot.slane %v2960_v3, 4  ;;  %v425_v23 = vrot.slane %v423_v29, 2  ;;  %1341 = vrot.lane.b32.xlu1 %v1336_v14, %s3901_s10  ;;  %s3922_s14 = smov 110  }
 0x1a1   : > { %v464_v21 = vmul.f32 %v3918_v62, %v2790_v40  ;;  %v432_v47 = vrot.slane %v2968_v18, 3  ;;  %v3086_v37 = vadd.f32 %v408_v6, %v403_v27  ;;  %v444_v60 = vadd.f32 %v442_v4, %v437_v33  ;;  %s296_s13 = sand.u32 1, %s3963_s25  }
 0x1a2   : > { %v449_v26 = vrot.slane %v447_v31, 2  ;;  %v3920_v61 = vstv %s3855_s21  ;;  %v665_v32 = vrot.slane %v2905_v10, 4  ;;  %v650_v3 = vsel %vm308_vm0, %v648_v25, %v649_v20  ;;  %s3298_s21 = sld [smem:[#allocation6 + $0x287]] }
 0x1a3   : > { %v454_v16 = vmul.f32 %v3920_v61, %v2790_v40  ;;  %v683_v62 = vrot.slane %v681_v5, 4  ;;  %v3921_v29 = vstv %s2779_s26  ;;  %1371 = vrot.lane.b32.xlu0 %v1367_v19, %s3922_s14  ;;  %v427_v6 = vadd.f32 %v425_v23, %v420_v59  ;;  %v3108_v25 = vpop.permute.xlu1 %731  ;;  %s3291_s26 = sld [smem:[#allocation6 + $0x180]] }
 0x1a4   : > { %v471_v18 = vmul.f32 %v3921_v29, %v2790_v40  ;;  %v3924_v4 = vstv %s3857_s3  ;;  %v466_v33 = vrot.slane %v464_v21, 1  ;;  %v3925_v27 = vstv %s3919_s4  ;;  %v800_v21 = vpop.permute.xlu0 %799  ;;  %1357 = vrot.lane.b32.xlu1 %v1352_v34, %s3835_s15  ;;  %s3275_s3 = sld [smem:[#allocation6 + $0x306]] }
 0x1a5   : > { %v461_v31 = vmul.f32 %v3924_v4, %v2790_v40  ;;  %v3104_v61 = vmul.f32 %v3925_v27, %v2790_v40  ;;  %v682_v5 = vrot.slane %v2938_v8, 4  ;;  %v667_v14 = vsel %vm308_vm0, %v665_v32, %v666_v53 }
 0x1a6   : > { %v3926_v19 = vstv %s2805_s0  ;;  %v652_v20 = vsel %vm651_vm12, %v2926_v63, %v650_v3  ;;  %v451_v23 = vadd.f32 %v449_v26, %v444_v60  ;;  %v456_v29 = vrot.slane %v454_v16, 3  ;;  %s3263_s0 = sld [smem:[#allocation6 + $0x385]] }
 0x1a7   : > { %v488_v59 = vmul.f32 %v3926_v19, %v2790_v40  ;;  %v3927_v4 = vstv %s3923_s27  ;;  %v684_v1 = vsel %vm308_vm0, %v682_v5, %v683_v62  ;;  %v473_v53 = vrot.slane %v471_v18, 2  ;;  %1438 = vrot.lane.b32.xlu0 %v1434_v38, %s3871_s7  ;;  %v3132_v3 = vpop.permute.xlu1 %765 }
 0x1a8   : > { %v485_v27 = vmul.f32 %v3927_v4, %v2790_v40  ;;  %v3928_v32 = vstv %s2811_s6  ;;  %v788_v19 = vrot.slane %v2716_v49, 4  ;;  %v669_v63 = vsel %vm668_vm14, %v2905_v10, %v667_v14  ;;  %v816_v5 = vpop.permute.xlu0 %815  ;;  %1373 = vrot.lane.b32.xlu1 %v3019_v43, %s3922_s14  ;;  %s3355_s6 = sld [smem:[#allocation6 + $0x288]] }
 0x1a9   : > { %v3123_v22 = vmul.f32 %v3928_v32, %v2790_v40  ;;  %v468_v60 = vadd.f32 %v466_v33, %v461_v31  ;;  %v480_v26 = vrot.slane %v3104_v61, 3  ;;  %v700_v16 = vrot.slane %v2682_v39, 4 }
 0x1aa   : > { %v654_v34 = vadd.f32 %v652_v20, %v2997_v58  ;;  %v3134_v62 = vadd.f32 %v432_v47, %v427_v6  ;;  %v490_v18 = vrot.slane %v488_v59, 1  ;;  %v787_v49 = vrot.slane %v2704_v46, 4 }
 0x1ab   : > { %v686_v10 = vsel %vm685_vm15, %v2938_v8, %v684_v1  ;;  %v3139_v38 = vadd.f32 %v456_v29, %v451_v23  ;;  %v3929_v31 = vstv %s2819_s30  ;;  %v699_v39 = vrot.slane %v2670_v35, 4  ;;  %1569 = vrot.lane.b32.xlu0 %v3032_v17, %s3871_s7  ;;  %v802_v23 = vpop.permute.xlu1 %801  ;;  %s3366_s30 = sld [smem:[#allocation6 + $0x387]] }
 0x1ac   : > { %v3144_v33 = vmul.f32 %v3929_v31, %v2790_v40  ;;  %v671_v58 = vadd.f32 %v669_v63, %v654_v34  ;;  %v717_v14 = vrot.slane %v3081_v13, 4  ;;  %v497_v47 = vrot.slane %v3123_v22, 2  ;;  %v848_v17 = vpop.permute.xlu0 %847  ;;  %1440 = vrot.lane.b32.xlu1 %v3027_v2, %s3871_s7 }
 0x1ad   : > { %v789_v6 = vsel %vm308_vm0, %v787_v49, %v788_v19  ;;  %v3154_v1 = vadd.f32 %v473_v53, %v468_v60  ;;  %v508_v40 = vrot.slane %v2947_v36, 7  ;;  %v511_v8 = vrot.slane %v3074_v48, 6 }
 0x1ae   : > { %v701_v59 = vsel %vm308_vm0, %v699_v39, %v700_v16  ;;  %v716_v13 = vrot.slane %v2986_v11, 4  ;;  %v688_v20 = vadd.f32 %v686_v10, %v671_v58  ;;  %v734_v43 = vrot.slane %v3108_v25, 4 }
 0x1af   : > { %v803_v29 = vrot.slane %v800_v21, 4  ;;  %v804_v4 = vrot.slane %v802_v23, 4  ;;  %v3161_v53 = vadd.f32 %v490_v18, %v485_v27  ;;  %v790_v36 = vsel %vm651_vm12, %v2704_v46, %v789_v6  ;;  %1454 = vrot.lane.b32.xlu0 %v3044_v15, %s3880_s17  ;;  %v818_v2 = vpop.permute.xlu1 %817 }
 0x1b0   : > { %v733_v48 = vrot.slane %v3039_v12, 4  ;;  %v718_v32 = vsel %vm308_vm0, %v716_v13, %v717_v14  ;;  %v703_v25 = vsel %vm702_vm13, %v2670_v35, %v701_v59  ;;  %v751_v19 = vrot.slane %v2699_v44, 4  ;;  %v864_v49 = vpop.permute.xlu0 %863  ;;  %1571 = vrot.lane.b32.xlu1 %v3037_v30, %s3871_s7 }
 0x1b1   : > { %v836_v63 = vrot.slane %v2733_v55, 4  ;;  %v805_v27 = vsel %vm308_vm0, %v803_v29, %v804_v4  ;;  %v835_v46 = vrot.slane %v2721_v51, 4  ;;  %v705_v60 = vadd.f32 %v703_v25, %v688_v20 }
 0x1b2   : > { %v735_v16 = vsel %vm308_vm0, %v733_v48, %v734_v43  ;;  %v806_v34 = vsel %vm668_vm14, %v800_v21, %v805_v27  ;;  %v792_v35 = vadd.f32 %v790_v36, %v2979_v54  ;;  %v720_v44 = vsel %vm719_vm4, %v2986_v11, %v718_v32 }
 0x1b3   : > { %v819_v55 = vrot.slane %v816_v5, 4  ;;  %v820_v18 = vrot.slane %v818_v2, 4  ;;  %v750_v10 = vrot.slane %v2687_v41, 4  ;;  %v504_v15 = vrot.slane %v3144_v33, 3  ;;  %1585 = vrot.lane.b32.xlu0 %v3056_v24, %s3880_s17 }
 0x1b4   : > { %v514_v31 = vrot.slane %v3086_v37, 5  ;;  %v529_v21 = vsel %vm528_vm1, %v2943_v50, %v508_v40  ;;  %v837_v54 = vsel %vm308_vm0, %v835_v46, %v836_v63  ;;  %v737_v11 = vsel %vm736_vm5, %v3039_v12, %v735_v16  ;;  %v850_v37 = vpop.permute.xlu1 %849  ;;  %v896_v12 = vpop.permute.xlu0 %895  ;;  %1456 = vrot.lane.b32.xlu1 %v3049_v42, %s3880_s17 }
 0x1b5   : > { %v808_v39 = vadd.f32 %v806_v34, %v792_v35  ;;  %v821_v58 = vsel %vm308_vm0, %v819_v55, %v820_v18  ;;  %v722_v14 = vadd.f32 %v720_v44, %v705_v60  ;;  %v768_v30 = vrot.slane %v3132_v3, 4  ;;  %v3930_v60 = vld [vmem:[#allocation25_spill] sm:$0xff]  ;;  %v3239_v44 = vld [vmem:[#allocation2] sm:$0xff] }
 0x1b6   : > { %v822_v6 = vsel %vm685_vm15, %v816_v5, %v821_v58  ;;  %v517_v59 = vrot.slane %v3134_v62, 4  ;;  %v752_v50 = vsel %vm308_vm0, %v750_v10, %v751_v19  ;;  %v851_v40 = vrot.slane %v848_v17, 4 }
 0x1b7   : > { %v824_v13 = vadd.f32 %v822_v6, %v808_v39  ;;  %v852_v20 = vrot.slane %v850_v37, 4  ;;  %v838_v43 = vsel %vm702_vm13, %v2721_v51, %v837_v54  ;;  %v767_v23 = vrot.slane %v3084_v7, 4  ;;  %1470 = vrot.lane.b32.xlu0 %v3061_v56, %s3901_s10 }
 0x1b8   : > { %v739_v24 = vadd.f32 %v737_v11, %v722_v14  ;;  %v531_v3 = vsel %vm530_vm2, %v529_v21, %v511_v8  ;;  %v884_v62 = vrot.slane %v2753_v0, 4  ;;  %v754_v51 = vsel %vm753_vm3, %v2687_v41, %v752_v50  ;;  %v866_v8 = vpop.permute.xlu1 %865  ;;  %v931_v19 = vpop.permute.xlu0 %930  ;;  %1587 = vrot.lane.b32.xlu1 %v3066_v52, %s3880_s17  ;;  %v3934_v21 = vld [vmem:[#allocation21_spill] sm:$0xff]  ;;  %s3961_s17 = sld [smem:[#allocation75_spill]] }
 0x1b9   : > { %v840_v5 = vadd.f32 %v838_v43, %v824_v13  ;;  %v853_v29 = vsel %vm308_vm0, %v851_v40, %v852_v20  ;;  %v919_v4 = vrot.slane %v2781_v28, 4  ;;  %v769_v36 = vsel %vm308_vm0, %v767_v23, %v768_v30  ;;  %v3936_v20 = vld [vmem:[#allocation71_spill] sm:$0xff]  ;;  %v3938_v23 = vld [vmem:[#allocation22_spill] sm:$0xff] }
 0x1ba   : > { %v854_v42 = vsel %vm719_vm4, %v848_v17, %v853_v29  ;;  %v883_v48 = vrot.slane %v2738_v57, 4  ;;  %v867_v0 = vrot.slane %v864_v49, 4  ;;  %v868_v25 = vrot.slane %v866_v8, 4 }
 0x1bb   : > { %v856_v32 = vadd.f32 %v854_v42, %v840_v5  ;;  %v918_v63 = vrot.slane %v2761_v9, 4  ;;  %v756_v56 = vadd.f32 %v754_v51, %v739_v24  ;;  %v3221_v41 = vadd.f32 %v480_v26, %v3154_v1  ;;  %1601 = vrot.lane.b32.xlu0 %v3072_v45, %s3901_s10 }
 0x1bc   : > { %v520_v28 = vrot.slane %v3139_v38, 3  ;;  %v885_v17 = vsel %vm308_vm0, %v883_v48, %v884_v62  ;;  %v771_v27 = vsel %vm770_vm8, %v3084_v7, %v769_v36  ;;  %v869_v46 = vsel %vm308_vm0, %v867_v0, %v868_v25  ;;  %v898_v1 = vpop.permute.xlu1 %897  ;;  %v947_v45 = vpop.permute.xlu0 %946  ;;  %v3940_v36 = vld [vmem:[#allocation62_spill] sm:$0xff] }
 0x1bd   : > { %v533_v52 = vsel %vm532_vm6, %v531_v3, %v514_v31  ;;  %v920_v61 = vsel %vm308_vm0, %v918_v63, %v919_v4  ;;  %v870_v26 = vsel %vm736_vm5, %v864_v49, %v869_v46  ;;  %v499_v38 = vadd.f32 %v497_v47, %v3161_v53 }
 0x1be   : > { %v3931_v7 = vstv %s3906_s20  ;;  %v899_v34 = vrot.slane %v896_v12, 4  ;;  %v872_v2 = vadd.f32 %v870_v26, %v856_v32  ;;  %v900_v35 = vrot.slane %v898_v1, 4  ;;  %v3941_v32 = vld [vmem:[#allocation24_spill] sm:$0xff]  ;;  %s1934_s20 = sshll.u32 %s296_s13, 4 }
 0x1bf   : > { %v1467_v16 = vmul.f32 %v3931_v7, %v3930_v60  ;;  %v3932_v55 = vstv %s2829_s18  ;;  %v886_v49 = vsel %vm753_vm3, %v2738_v57, %v885_v17  ;;  %v773_v10 = vadd.f32 %v771_v27, %v756_v56  ;;  %v3944_v7 = vld [vmem:[#allocation26_spill] sm:$0xff]  ;;  %s3383_s18 = sld [smem:[#allocation6 + $0x308]]  ;;  %s298_s4 = scalar_lea.vmem [#allocation8], %s1934_s20 }
 0x1c0   : > { %v1482_v18 = vmul.f32 %v3239_v44, %v3932_v55  ;;  %v534_v22 = vsel %vm308_vm0, %v533_v52, %v517_v59  ;;  %v3933_v47 = vstv %s3908_s22  ;;  %v921_v31 = vsel %vm651_vm12, %v2761_v9, %v920_v61  ;;  %v933_v30 = vpop.permute.xlu1 %932  ;;  %v979_v13 = vpop.permute.xlu0 %978  ;;  %s1845_s27 = sshll.u32 %s298_s4, 4  ;;  %s1846_s27 = int_to_ptr.vmem [resolvable:$true] %s1845_s27 }
 0x1c1   : > { %1472 = vrot.lane.b32.xlu1 %v1467_v16, %s3901_s10  ;;  %v1598_v53 = vmul.f32 %v3933_v47, %v3930_v60  ;;  %v1698_v54 = vsub.s32 4, %v3934_v21  ;;  %v888_v11 = vadd.f32 %v886_v49, %v872_v2  ;;  %v901_v39 = vsel %vm308_vm0, %v899_v34, %v900_v35  ;;  %v3946_v47 = vld [vmem:[#allocation65_spill] sm:$0xff] }
 0x1c2   : > { %1486 = vrot.lane.b32.xlu0 %v1482_v18, %s3835_s15  ;;  %v506_v57 = vadd.f32 %v504_v15, %v499_v38  ;;  %v523_v58 = vrot.slane %v3221_v41, 2  ;;  %v902_v14 = vsel %vm770_vm8, %v896_v12, %v901_v39  ;;  %v3935_v6 = vstv %s2836_s24  ;;  %v3937_v15 = vld [vmem:[#allocation63_spill] sm:$0xff]  ;;  %s3313_s24 = sld [smem:[#allocation6 + $0x386]] }
 0x1c3   : > { %v1613_v37 = vmul.f32 %v3239_v44, %v3935_v6  ;;  %v934_v9 = vrot.slane %v931_v19, 4  ;;  %v536_v59 = vsel %vm535_vm7, %v534_v22, %v520_v28  ;;  %v904_v50 = vadd.f32 %v902_v14, %v888_v11  ;;  %v3270_v12 = vld [vmem:[#allocation2 + $0x8] sm:$0xf]  ;;  %v3947_v11 = vld [vmem:[#allocation27_spill] sm:$0xff] }
 0x1c4   : > { %v935_v40 = vrot.slane %v933_v30, 4  ;;  %v923_v33 = vadd.f32 %v921_v31, %v3936_v20  ;;  %v967_v43 = vrot.slane %v3937_v15, 4  ;;  %v1695_v24 = vrot.slane %v773_v10, %v3938_v23  ;;  %v949_v0 = vpop.permute.xlu1 %948  ;;  %v995_v27 = vpop.permute.xlu0 %994 }
 0x1c5   : > { %1603 = vrot.lane.b32.xlu1 %v1598_v53, %s3901_s10  ;;  %v3939_v3 = vmov %v3932_v55  ;;  %v1699_v5 = vrot.slane %v773_v10, %v1698_v54  ;;  %v1706_v29 = vrot.slane %v904_v50, %v3938_v23  ;;  %v1710_v51 = vrot.slane %v904_v50, %v1698_v54  ;;  %s3964_s10 = sld [smem:[#allocation16_spill]] }
 0x1c6   : > { %v1483_v62 = vmul.f32 %v3270_v12, %v3939_v3  ;;  %v936_v4 = vsel %vm308_vm0, %v934_v9, %v935_v40  ;;  %1617 = vrot.lane.b32.xlu0 %v1613_v37, %s3835_s15  ;;  %v966_v42 = vrot.slane %v3940_v36, 4  ;;  %v950_v8 = vrot.slane %v947_v45, 4 }
 0x1c7   : > { %v937_v48 = vsel %vm668_vm14, %v931_v19, %v936_v4  ;;  %v3942_v25 = vstv %s2861_s5  ;;  %v3286_v56 = vsel %vm528_vm1, %v1695_v24, %v1706_v29  ;;  %v3289_v41 = vsel %vm528_vm1, %v1699_v5, %v1710_v51  ;;  %v3952_v4 = vld [vmem:[#allocation29_spill] sm:$0xff]  ;;  %s3397_s5 = sld [smem:[#allocation6 + $0x388]] }
 0x1c8   : > { %v1498_v63 = vmul.f32 %v3942_v25, %v3941_v32  ;;  %v939_v28 = vadd.f32 %v937_v48, %v923_v33  ;;  %v951_v17 = vrot.slane %v949_v0, 4  ;;  %v538_v19 = vsel %vm537_vm9, %v536_v59, %v523_v58  ;;  %v981_v38 = vpop.permute.xlu1 %980  ;;  %v1027_v10 = vpop.permute.xlu0 %1026  ;;  %v3949_v58 = vld [vmem:[#allocation67_spill] sm:$0xff]  ;;  %v3950_v59 = vld [vmem:[#allocation64_spill] sm:$0xff] }
 0x1c9   : > { %1488 = vrot.lane.b32.xlu1 %v1483_v62, %s3835_s15  ;;  %v968_v46 = vsel %vm308_vm0, %v966_v42, %v967_v43  ;;  %v526_v52 = vrot.slane %v506_v57, 1  ;;  %v3943_v1 = vmov %v3935_v6  ;;  %v3945_v16 = vstv %s2868_s29  ;;  %v3951_v43 = vld [vmem:[#allocation66_spill] sm:$0xff]  ;;  %s3405_s29 = sld [smem:[#allocation6 + $0x200]] }
 0x1ca   : > { %v952_v61 = vsel %vm308_vm0, %v950_v8, %v951_v17  ;;  %1502 = vrot.lane.b32.xlu0 %v1498_v63, %s3922_s14  ;;  %v1614_v60 = vmul.f32 %v3270_v12, %v3943_v1  ;;  %v1383_v34 = vmul.f32 %v3945_v16, %v3944_v7  ;;  %v1628_v2 = vstv %s3263_s0 }
 0x1cb   : > { %v953_v26 = vsel %vm685_vm15, %v947_v45, %v952_v61  ;;  %v540_v35 = vsel %vm539_vm10, %v538_v19, %v526_v52  ;;  %v982_v55 = vrot.slane %v979_v13, 4  ;;  %v983_v49 = vrot.slane %v981_v38, 4  ;;  %v3954_v61 = vld [vmem:[#allocation70_spill] sm:$0xff]  ;;  %s2046_s22 = sshll.u32 %s3964_s10, 8 }
 0x1cc   : > { %v955_v18 = vadd.f32 %v953_v26, %v939_v28  ;;  %v969_v22 = vsel %vm702_vm13, %v3940_v36, %v968_v46  ;;  %v1513_v45 = vstv %s3275_s3  ;;  %v1015_v53 = vrot.slane %v3946_v47, 4  ;;  %v997_v37 = vpop.permute.xlu1 %996  ;;  %v1062_v15 = vpop.permute.xlu0 %1061  ;;  %v3955_v47 = vld [vmem:[#allocation69_spill] sm:$0xff] }
 0x1cd   : > { %1619 = vrot.lane.b32.xlu1 %v1614_v60, %s3835_s15  ;;  %v984_v54 = vsel %vm308_vm0, %v982_v55, %v983_v49  ;;  %v3948_v39 = vmov %v3942_v25  ;;  %v1050_v14 = vrot.slane %v3949_v58, 4  ;;  %v541_v30 = vsub.f32 0.0, %v540_v35  ;;  %s3342_s15 = sld [smem:[#allocation6 + $0x307]] }
 0x1ce   : > { %v971_v31 = vadd.f32 %v969_v22, %v955_v18  ;;  %1387 = vrot.lane.b32.xlu0 %v1383_v34, %s3856_s23  ;;  %v1499_v57 = vmul.f32 %v3948_v39, %v3947_v11  ;;  %v985_v6 = vsel %vm719_vm4, %v979_v13, %v984_v54  ;;  %v1629_v9 = vmul.f32 %v1628_v2, %v3941_v32 }
 0x1cf   : > { %v1014_v50 = vrot.slane %v3950_v59, 4  ;;  %v998_v40 = vrot.slane %v995_v27, 4  ;;  %v999_v33 = vrot.slane %v997_v37, 4  ;;  %v1049_v23 = vrot.slane %v3951_v43, 4 }
 0x1d0   : > { %v987_v20 = vadd.f32 %v985_v6, %v971_v31  ;;  %v1037_v3 = vstv %s3291_s26  ;;  %v1398_v62 = vstv %s3298_s21  ;;  %v1029_v51 = vpop.permute.xlu1 %1028  ;;  %v3953_v36 = vmov %v3945_v16  ;;  %v1078_v63 = vpop.permute.xlu0 %1077  ;;  %s3966_s26 = sld [smem:[#allocation79_spill]] }
 0x1d1   : > { %1504 = vrot.lane.b32.xlu1 %v1499_v57, %s3922_s14  ;;  %v1016_v24 = vsel %vm308_vm0, %v1014_v50, %v1015_v53  ;;  %v1000_v13 = vsel %vm308_vm0, %v998_v40, %v999_v33  ;;  %v1051_v5 = vsel %vm308_vm0, %v1049_v23, %v1050_v14  ;;  %v1384_v42 = vmul.f32 %v3953_v36, %v3952_v4 }
 0x1d2   : > { %1633 = vrot.lane.b32.xlu0 %v1629_v9, %s3922_s14  ;;  %v1001_v29 = vsel %vm736_vm5, %v995_v27, %v1000_v13  ;;  %v1514_v8 = vmul.f32 %v1513_v45, %v3944_v7  ;;  %v542_v48 = vmul.f32 1.442695, %v541_v30  ;;  %v1030_v0 = vrot.slane %v1027_v10, 4 }
 0x1d3   : > { %v1003_v32 = vadd.f32 %v1001_v29, %v987_v20  ;;  %v1031_v25 = vrot.slane %v1029_v51, 4  ;;  %v1017_v28 = vsel %vm753_vm3, %v3950_v59, %v1016_v24  ;;  %v1644_v17 = vstv %s3313_s24 }
 0x1d4   : > { %v1052_v27 = vsel %vm651_vm12, %v3951_v43, %v1051_v5  ;;  %v1720_v19 = vsub.s32 5, %v3934_v21  ;;  %v1038_v26 = vmul.f32 %v1037_v3, %v3954_v61  ;;  %v1064_v1 = vpop.permute.xlu1 %1063  ;;  %v1630_v60 = vmul.f32 %v1628_v2, %v3947_v11  ;;  %v1110_v18 = vpop.permute.xlu0 %1109  ;;  %v3957_v11 = vld [vmem:[#allocation68_spill] sm:$0xff] }
 0x1d5   : > { %1389 = vrot.lane.b32.xlu1 %v1384_v42, %s3856_s23  ;;  %v1019_v46 = vadd.f32 %v1017_v28, %v1003_v32  ;;  %v1032_v52 = vsel %vm308_vm0, %v1030_v0, %v1031_v25  ;;  %v1399_v16 = vmul.f32 %v3239_v44, %v1398_v62  ;;  %2126 = vpow2.f32 %v542_v48  ;;  %v3958_v25 = vld [vmem:[#allocation28_spill] sm:$0xff] }
 0x1d6   : > { %1518 = vrot.lane.b32.xlu0 %v1514_v8, %s3856_s23  ;;  %v1033_v38 = vsel %vm770_vm8, %v1027_v10, %v1032_v52  ;;  %v1065_v34 = vrot.slane %v1062_v15, 4  ;;  %v1066_v55 = vrot.slane %v1064_v1, 4  ;;  %v1054_v49 = vadd.f32 %v1052_v27, %v1038_v26  ;;  %v3956_v10 = vld [vmem:[#allocation23_spill] sm:$0xff]  ;;  %s3967_s21 = smov %s3966_s26  ;;  %s3606_s24 = scalar_lea.hbm %s3966_s26, %s2046_s22 }
 0x1d7   : > { %v1035_v35 = vadd.f32 %v1033_v38, %v1019_v46  ;;  %v1515_v22 = vmul.f32 %v1513_v45, %v3952_v4  ;;  %v1098_v53 = vrot.slane %v3955_v47, 4  ;;  %v1097_v39 = vrot.slane %v3957_v11, 4 }
 0x1d8   : > { %v1067_v54 = vsel %vm308_vm0, %v1065_v34, %v1066_v55  ;;  %v1081_v57 = vrot.slane %v1078_v63, 4  ;;  %v1080_v45 = vpop.permute.xlu1 %1079  ;;  %v1645_v14 = vmul.f32 %v1644_v17, %v3944_v7  ;;  %v1126_v37 = vpop.permute.xlu0 %1125  ;;  %v1529_v50 = vstv %s3342_s15  ;;  %s1831_s15 = scalar_lea.sflag [#allocation4], %s296_s13 }
 0x1d9   : > { %1635 = vrot.lane.b32.xlu1 %v1630_v60, %s3922_s14  ;;  %v1717_v31 = vrot.slane %v1035_v35, %v3956_v10  ;;  %v1721_v2 = vrot.slane %v1035_v35, %v1720_v19  ;;  %v1068_v58 = vsel %vm668_vm14, %v1062_v15, %v1067_v54  ;;  %v1082_v6 = vrot.slane %v1080_v45, 4  ;;  %s3965_s14 = sld [smem:[#allocation19_spill]] }
 0x1da   : > { %1403 = vrot.lane.b32.xlu0 %v1399_v16, %s3861_s9  ;;  %v1070_v30 = vadd.f32 %v1068_v58, %v1054_v49  ;;  %v1099_v40 = vsel %vm308_vm0, %v1097_v39, %v1098_v53  ;;  %v1530_v24 = vmul.f32 %v3239_v44, %v1529_v50  ;;  %v1414_v13 = vstv %s3355_s6  ;;  %s2162_s6 = scalar_lea.vmem %s1846_s27, 256 }
 0x1db   : > { %v3370_v9 = vsel %vm530_vm2, %v3286_v56, %v1717_v31  ;;  %v3374_v59 = vsel %vm530_vm2, %v3289_v41, %v1721_v2  ;;  %v1083_v7 = vsel %vm308_vm0, %v1081_v57, %v1082_v6  ;;  %v1400_v56 = vmul.f32 %v3270_v12, %v1398_v62  ;;  %p2163_p10 = scmp.ne.s32.totalorder %s1846_s27, %s2162_s6 }
 0x1dc   : > { %v1084_v20 = vsel %vm685_vm15, %v1078_v63, %v1083_v7  ;;  %v1112_v33 = vpop.permute.xlu1 %1111  ;;  %v1113_v41 = vrot.slane %v1110_v18, 4  ;;  %v1142_v23 = vpop.permute.xlu0 %1141  ;;  %v1100_v3 = vsel %vm702_vm13, %v3957_v11, %v1099_v40  ;;  %v1646_v36 = vmul.f32 %v1644_v17, %v3952_v4 }
 0x1dd   : > { %1520 = vrot.lane.b32.xlu1 %v1515_v22, %s3856_s23  ;;  %v1086_v15 = vadd.f32 %v1084_v20, %v1070_v30  ;;  %v1114_v43 = vrot.slane %v1112_v33, 4  ;;  %v1660_v42 = vstv %s3366_s30  ;;  %v1129_v8 = vrot.slane %v1126_v37, 4  ;;  %s2250_s30 = smov [#allocation8]  }
 0x1de   : > { %1649 = vrot.lane.b32.xlu0 %v1645_v14, %s3856_s23  ;;  %v1415_v63 = vmul.f32 %v1414_v13, %v3958_v25  ;;  %v1531_v17 = vmul.f32 %v3270_v12, %v1529_v50  ;;  %v1661_v52 = vmul.f32 %v3239_v44, %v1660_v42  ;;  %v1545_v26 = vstv %s3383_s18  ;;  %v3959_v44 = vld [vmem:[#allocation30_spill] sm:$0xff]  ;;  %s2166_s18 = sshll.u32 %s2250_s30, 4  ;;  %s2167_s18 = int_to_ptr.vmem [resolvable:$false] %s2166_s18 }
 0x1df   : > { %v1102_v5 = vadd.f32 %v1100_v3, %v1086_v15  ;;  %v1115_v29 = vsel %vm308_vm0, %v1113_v41, %v1114_v43  ;;  %v1145_v1 = vrot.slane %v1142_v23, 4  ;;  %v1416_v49 = vmul.f32 %v1414_v13, %v3959_v44  ;;  %p3968_p12 = scmp.ne.s32.totalorder %s3965_s14, 0  ;;  %p2169_p8 = scmp.lt.s32.totalorder %s1846_s27, %s2167_s18 }
 0x1e0   : > { %v1116_v62 = vsel %vm719_vm4, %v1110_v18, %v1115_v29  ;;  %v1128_v51 = vpop.permute.xlu1 %1127  ;;  %v1158_v32 = vpop.permute.xlu0 %1157  ;;  %v1546_v22 = vmul.f32 %v1545_v26, %v3958_v25  ;;  %v1676_v54 = vstv %s3397_s5  ;;  %v1168_v57 = vstv %s3405_s29  ;;  %s2168_s5 = scalar_lea.vmem %s2167_s18, 512 }
 0x1e1   : > { %1405 = vrot.lane.b32.xlu1 %v1400_v56, %s3861_s9  ;;  %v1118_v48 = vadd.f32 %v1116_v62, %v1102_v5  ;;  %v1130_v0 = vrot.slane %v1128_v51, 4  ;;  %v1161_v47 = vrot.slane %v1158_v32, 4  ;;  %v1662_v45 = vmul.f32 %v3270_v12, %v1660_v42  ;;  %p2164_p0 = pnand %p2163_p10, %p3968_p12  ;;  %p2170_p11 = scmp.lt.s32.totalorder %s2168_s5, %s2162_s6 }
 0x1e2   : > { %1534 = vrot.lane.b32.xlu0 %v1530_v24, %s3861_s9  ;;  %v2127_v28 = vpop.eup %2126  ;;  %v1677_v50 = vmul.f32 %v1676_v54, %v3958_v25  ;;  %v1169_v20 = vmul.f32 %v1168_v57, %v3954_v61  ;;  %v1547_v15 = vmul.f32 %v1545_v26, %v3959_v44  ;;  %v1678_v62 = vmul.f32 %v1676_v54, %v3959_v44 }
 0x1e3   : > { %v1131_v27 = vsel %vm308_vm0, %v1129_v8, %v1130_v0  ;;  %v544_v38 = vadd.f32 1.0, %v2127_v28  ;;  %p2165_p7 = pneg %p2164_p0  ;;  %p2171_p13 = por %p2170_p11, %p2169_p8 }
 0x1e4   : > { %v1132_v46 = vsel %vm736_vm5, %v1126_v37, %v1131_v27  ;;  %v1144_v4 = vpop.permute.xlu1 %1143  ;;  %v1177_v34 = vpop.permute.xlu0 %1176 }
 0x1e5   : > { %1651 = vrot.lane.b32.xlu1 %v1646_v36, %s3856_s23  ;;  %v1134_v60 = vadd.f32 %v1132_v46, %v1118_v48  ;;  %v1146_v16 = vrot.slane %v1144_v4, 4  ;;  %2128 = vrcp.f32 %v544_v38  ;;  %v1180_v14 = vrot.slane %v1177_v34, 4  ;;  %v1801_v48 = vld [vmem:[%s3961_s17] sm:$0xff]  ;;  %p2172_p1 = pnand %p2171_p13, %p2165_p7 }
 0x1e6   : > { %1419 = vrot.lane.b32.xlu0 %v1415_v63, %s3867_s28 }
 0x1e7   : > { %v1147_v35 = vsel %vm308_vm0, %v1145_v1, %v1146_v16 }
 0x1e8   : > { %v1148_v55 = vsel %vm753_vm3, %v1142_v23, %v1147_v35  ;;  %v1160_v18 = vpop.permute.xlu1 %1159  ;;  %v1193_v2 = vpop.permute.xlu0 %1192 }
 0x1e9   : > { %1536 = vrot.lane.b32.xlu1 %v1531_v17, %s3861_s9  ;;  %v1150_v53 = vadd.f32 %v1148_v55, %v1134_v60  ;;  %v1162_v31 = vrot.slane %v1160_v18, 4  ;;  %v1196_v12 = vrot.slane %v1193_v2, 4 }
 0x1ea   : > { %1665 = vrot.lane.b32.xlu0 %v1661_v52, %s3861_s9 }
 0x1eb   : > { %v1163_v11 = vsel %vm308_vm0, %v1161_v47, %v1162_v31 }
 0x1ec   : > { %v1164_v39 = vsel %vm770_vm8, %v1158_v32, %v1163_v11  ;;  %v1179_v58 = vpop.permute.xlu1 %1178  ;;  %v1209_v37 = vpop.permute.xlu0 %1208 }
 0x1ed   : > { %1421 = vrot.lane.b32.xlu1 %v1416_v49, %s3867_s28  ;;  %v1166_v30 = vadd.f32 %v1164_v39, %v1150_v53  ;;  %v1181_v6 = vrot.slane %v1179_v58, 4  ;;  %v1212_v51 = vrot.slane %v1209_v37, 4 }
 0x1ee   : > { %1550 = vrot.lane.b32.xlu0 %v1546_v22, %s3867_s28 }
 0x1ef   : > { %v1728_v40 = vrot.slane %v1166_v30, %v3956_v10  ;;  %v1732_v7 = vrot.slane %v1166_v30, %v1720_v19  ;;  %v1182_v33 = vsel %vm308_vm0, %v1180_v14, %v1181_v6 }
 0x1f0   : > { %v1183_v56 = vsel %vm651_vm12, %v1177_v34, %v1182_v33  ;;  %v1195_v41 = vpop.permute.xlu1 %1194 }
 0x1f1   : > { %1667 = vrot.lane.b32.xlu1 %v1662_v45, %s3861_s9  ;;  %s3960_s9 = sld [smem:[#allocation74_spill]]  ;;  %v1185_v10 = vadd.f32 %v1183_v56, %v1169_v20  ;;  %v1197_v23 = vrot.slane %v1195_v41, 4  ;;  %v1225_v24 = vpop.permute.xlu0 %1224  ;;  %v3435_v19 = vsel %vm532_vm6, %v3370_v9, %v1728_v40  ;;  %v3439_v3 = vsel %vm532_vm6, %v3374_v59, %v1732_v7 }
 0x1f2   : > { %1681 = vrot.lane.b32.xlu0 %v1677_v50, %s3867_s28  ;;  %v2129_v9 = vpop.eup %2128  ;;  %v1228_v25 = vrot.slane %v1225_v24, 4  ;;  %v1742_v50 = vsub.s32 6, %v3934_v21  ;;  %v1299_v20 = vstv %s2013_s2 }
 0x1f3   : > { %v1198_v13 = vsel %vm308_vm0, %v1196_v12, %v1197_v23  ;;  %v1300_v23 = vmul.f32 %v1299_v20, %v3954_v61 }
 0x1f4   : > { %v1199_v5 = vsel %vm668_vm14, %v1193_v2, %v1198_v13  ;;  %v1211_v29 = vpop.permute.xlu1 %1210 }
 0x1f5   : > { %1552 = vrot.lane.b32.xlu1 %v1547_v15, %s3867_s28  ;;  %v1201_v36 = vadd.f32 %v1199_v5, %v1185_v10  ;;  %v1213_v42 = vrot.slane %v1211_v29, 4  ;;  %v1241_v8 = vpop.permute.xlu0 %1240 }
 0x1f6   : > { %v1244_v26 = vrot.slane %v1241_v8, 4 }
 0x1f7   : > { %v1793_v43 = vld [vmem:[%s3960_s9] sm:$0xff]  ;;  %v1214_v59 = vsel %vm308_vm0, %v1212_v51, %v1213_v42 }
 0x1f8   : > { %1796 = vperm.xlu0 %2123, %v1793_v43   ;;  %v1215_v0 = vsel %vm685_vm15, %v1209_v37, %v1214_v59  ;;  %v1227_v32 = vpop.permute.xlu1 %1226  ;;  %v1738_v37 = vsub.s32 2, %v3934_v21 }
 0x1f9   : > { %1683 = vrot.lane.b32.xlu1 %v1678_v62, %s3867_s28  ;;  %v1217_v63 = vadd.f32 %v1215_v0, %v1201_v36  ;;  %v1229_v28 = vrot.slane %v1227_v32, 4  ;;  %v1257_v27 = vpop.permute.xlu0 %1256  ;;  %s3962_s28 = sld [smem:[#allocation76_spill]] }
 0x1fa   : > { %v1260_v55 = vrot.slane %v1257_v27, 4 }
 0x1fb   : > { %v1230_v46 = vsel %vm308_vm0, %v1228_v25, %v1229_v28 }
 0x1fc   : > { %1823 = vperm.xlu0 %2123, %v2129_v9   ;;  %v1231_v17 = vsel %vm702_vm13, %v1225_v24, %v1230_v46  ;;  %v1243_v52 = vpop.permute.xlu1 %1242 }
 0x1fd   : > { %1804 = vperm.xlu1 %2124, %v1801_v48   ;;  %v1233_v38 = vadd.f32 %v1231_v17, %v1217_v63  ;;  %v1245_v1 = vrot.slane %v1243_v52, 4  ;;  %v1273_v60 = vpop.permute.xlu0 %1272 }
 0x1fe   : > { %v1276_v31 = vrot.slane %v1273_v60, 4 }
 0x1ff   : > { %v1811_v4 = vld [vmem:[%s3962_s28] sm:$0xff]  ;;  %v1246_v16 = vsel %vm308_vm0, %v1244_v26, %v1245_v1 }
 0x200   : > { %v1247_v34 = vsel %vm719_vm4, %v1241_v8, %v1246_v16  ;;  %v1259_v35 = vpop.permute.xlu1 %1258 }
 0x201   : > { %1814 = vperm.xlu1 %2124, %v1811_v4   ;;  %v1249_v18 = vadd.f32 %v1247_v34, %v1233_v38  ;;  %v1261_v44 = vrot.slane %v1259_v35, 4  ;;  %v1289_v49 = vpop.permute.xlu0 %1288 }
 0x202   : > { %v1292_v45 = vrot.slane %v1289_v49, 4 }
 0x203   : > { %v1262_v22 = vsel %vm308_vm0, %v1260_v55, %v1261_v44 }
 0x204   : > { %v1263_v47 = vsel %vm736_vm5, %v1257_v27, %v1262_v22  ;;  %v1275_v53 = vpop.permute.xlu1 %1274 }
 0x205   : > { %v1265_v2 = vadd.f32 %v1263_v47, %v1249_v18  ;;  %v1277_v54 = vrot.slane %v1275_v53, 4  ;;  %v1308_v11 = vpop.permute.xlu0 %1307 }
 0x206   : > { %v1311_v12 = vrot.slane %v1308_v11, 4 }
 0x207   : > { %v1278_v39 = vsel %vm308_vm0, %v1276_v31, %v1277_v54 }
 0x208   : > { %v1279_v57 = vsel %vm753_vm3, %v1273_v60, %v1278_v39  ;;  %v1291_v58 = vpop.permute.xlu1 %1290 }
 0x209   : > { %v1281_v14 = vadd.f32 %v1279_v57, %v1265_v2  ;;  %v1293_v30 = vrot.slane %v1291_v58, 4  ;;  %v1324_v6 = vpop.permute.xlu0 %1323 }
 0x20a   : > { %v1327_v13 = vrot.slane %v1324_v6, 4 }
 0x20b   : > { %v1294_v40 = vsel %vm308_vm0, %v1292_v45, %v1293_v30 }
 0x20c   : > { %v1295_v7 = vsel %vm770_vm8, %v1289_v49, %v1294_v40  ;;  %v1310_v33 = vpop.permute.xlu1 %1309 }
 0x20d   : > { %v1297_v56 = vadd.f32 %v1295_v7, %v1281_v14  ;;  %v1312_v41 = vrot.slane %v1310_v33, 4  ;;  %v1340_v15 = vpop.permute.xlu0 %1339 }
 0x20e   : > { %v1343_v0 = vrot.slane %v1340_v15, 4 }
 0x20f   : > { %v1739_v43 = vrot.slane %v1297_v56, %v1738_v37  ;;  %v1743_v10 = vrot.slane %v1297_v56, %v1742_v50  ;;  %v1313_v24 = vsel %vm308_vm0, %v1311_v12, %v1312_v41 }
 0x210   : > { %v1314_v5 = vsel %vm651_vm12, %v1308_v11, %v1313_v24  ;;  %v1326_v29 = vpop.permute.xlu1 %1325 }
 0x211   : > { %v1316_v62 = vadd.f32 %v1314_v5, %v1300_v23  ;;  %v1328_v51 = vrot.slane %v1326_v29, 4  ;;  %v1356_v36 = vpop.permute.xlu0 %1355  ;;  %v3475_v42 = vsel %vm308_vm0, %v3435_v19, %v1739_v43  ;;  %v3479_v8 = vsel %vm308_vm0, %v3439_v3, %v1743_v10 }
 0x212   : > { %v1359_v19 = vrot.slane %v1356_v36, 4  ;;  %v1430_v29 = vstv %s2022_s8 }
 0x213   : > { %v1329_v9 = vsel %vm308_vm0, %v1327_v13, %v1328_v51 }
 0x214   : > { %v1330_v59 = vsel %vm668_vm14, %v1324_v6, %v1329_v9  ;;  %v1342_v48 = vpop.permute.xlu1 %1341 }
 0x215   : > { %v1332_v32 = vadd.f32 %v1330_v59, %v1316_v62  ;;  %v1344_v25 = vrot.slane %v1342_v48, 4  ;;  %v1372_v63 = vpop.permute.xlu0 %1371 }
 0x216   : > { %v1375_v1 = vrot.slane %v1372_v63, 4 }
 0x217   : > { %v1345_v28 = vsel %vm308_vm0, %v1343_v0, %v1344_v25  ;;  %v1561_v0 = vstv %s2031_s19 }
 0x218   : > { %v1346_v27 = vsel %vm685_vm15, %v1340_v15, %v1345_v28  ;;  %v1358_v46 = vpop.permute.xlu1 %1357 }
 0x219   : > { %v1348_v4 = vadd.f32 %v1346_v27, %v1332_v32  ;;  %v1360_v17 = vrot.slane %v1358_v46, 4  ;;  %v1439_v52 = vpop.permute.xlu0 %1438  ;;  %v1431_v27 = vmul.f32 %v1430_v29, %v3954_v61 }
 0x21a   : > { %v1442_v13 = vrot.slane %v1439_v52, 4 }
 0x21b   : > { %v1361_v3 = vsel %vm308_vm0, %v1359_v19, %v1360_v17 }
 0x21c   : > { %v1362_v26 = vsel %vm702_vm13, %v1356_v36, %v1361_v3  ;;  %v1374_v38 = vpop.permute.xlu1 %1373 }
 0x21d   : > { %v1364_v60 = vadd.f32 %v1362_v26, %v1348_v4  ;;  %v1376_v16 = vrot.slane %v1374_v38, 4  ;;  %v1570_v34 = vpop.permute.xlu0 %1569  ;;  %v1562_v26 = vmul.f32 %v1561_v0, %v3954_v61 }
 0x21e   : > { %v1573_v5 = vrot.slane %v1570_v34, 4 }
 0x21f   : > { %v1377_v35 = vsel %vm308_vm0, %v1375_v1, %v1376_v16 }
 0x220   : > { %v1378_v55 = vsel %vm719_vm4, %v1372_v63, %v1377_v35  ;;  %v1441_v18 = vpop.permute.xlu1 %1440 }
 0x221   : > { %v3489_v44 = vadd.f32 %v1378_v55, %v1364_v60  ;;  %v1455_v49 = vpop.permute.xlu0 %1454  ;;  %v1443_v41 = vrot.slane %v1441_v18, 4 }
 0x222   : > { %v1458_v62 = vrot.slane %v1455_v49, 4 }
 0x223   : > { %v1444_v36 = vsel %vm308_vm0, %v1442_v13, %v1443_v41 }
 0x224   : > { %v1572_v22 = vpop.permute.xlu1 %1571  ;;  %v1445_v19 = vsel %vm651_vm12, %v1439_v52, %v1444_v36 }
 0x225   : > { %v1586_v47 = vpop.permute.xlu0 %1585  ;;  %v1574_v15 = vrot.slane %v1572_v22, 4 }
 0x226   : > { %v1589_v51 = vrot.slane %v1586_v47, 4 }
 0x227   : > { %v1575_v9 = vsel %vm308_vm0, %v1573_v5, %v1574_v15 }
 0x228   : > { %v1457_v53 = vpop.permute.xlu1 %1456  ;;  %v1576_v4 = vsel %vm651_vm12, %v1570_v34, %v1575_v9  ;;  %v1447_v34 = vadd.f32 %v1445_v19, %v1431_v27 }
 0x229   : > { %v3491_v31 = vpop.permute.xlu0 %1470  ;;  %v1459_v10 = vrot.slane %v1457_v53, 4  ;;  %v1578_v53 = vadd.f32 %v1576_v4, %v1562_v26 }
 0x22a   : > { %v1474_v46 = vrot.slane %v3491_v31, 4 }
 0x22b   : > { %v1460_v32 = vsel %vm308_vm0, %v1458_v62, %v1459_v10 }
 0x22c   : > { %v1588_v2 = vpop.permute.xlu1 %1587  ;;  %v1461_v38 = vsel %vm668_vm14, %v1455_v49, %v1460_v32 }
 0x22d   : > { %v3493_v54 = vpop.permute.xlu0 %1601  ;;  %v1590_v23 = vrot.slane %v1588_v2, 4 }
 0x22e   : > { %v1605_v17 = vrot.slane %v3493_v54, 4 }
 0x22f   : > { %v1591_v25 = vsel %vm308_vm0, %v1589_v51, %v1590_v23 }
 0x230   : > { %v1592_v1 = vsel %vm668_vm14, %v1586_v47, %v1591_v25 }
 0x233   : > { %v1473_v11 = vpop.permute.xlu1 %1472 }
 0x234   : > { %v3495_v39 = vpop.permute.xlu0 %1486  ;;  %v1475_v59 = vrot.slane %v1473_v11, 4 }
 0x235   : > { %v1490_v2 = vrot.slane %v3495_v39, 4 }
 0x236   : > { %v1476_v60 = vsel %vm308_vm0, %v1474_v46, %v1475_v59 }
 0x237   : > { %v1604_v57 = vpop.permute.xlu1 %1603 }
 0x238   : > { %v3497_v58 = vpop.permute.xlu0 %1617  ;;  %v1606_v63 = vrot.slane %v1604_v57, 4  ;;  %v1463_v57 = vadd.f32 %v1461_v38, %v1447_v34 }
 0x239   : > { %v1621_v10 = vrot.slane %v3497_v58, 4 }
 0x23a   : > { %v1607_v35 = vsel %vm308_vm0, %v1605_v17, %v1606_v63 }
 0x23b   : > { %v3499_v45 = vpop.permute.xlu1 %1488  ;;  %v1608_v41 = vsel %vm685_vm15, %v3493_v54, %v1607_v35 }
 0x23c   : > { %v3501_v14 = vpop.permute.xlu0 %1502  ;;  %v1491_v55 = vrot.slane %v3499_v45, 4  ;;  %v1477_v45 = vsel %vm685_vm15, %v3491_v31, %v1476_v60 }
 0x23d   : > { %v1479_v62 = vadd.f32 %v1477_v45, %v1463_v57 }
 0x23e   : > { %v1492_v23 = vsel %vm308_vm0, %v1490_v2, %v1491_v55 }
 0x23f   : > { %v3503_v30 = vpop.permute.xlu1 %1619  ;;  %v1493_v36 = vsel %vm702_vm13, %v3495_v39, %v1492_v23 }
 0x240   : > { %v1388_v6 = vpop.permute.xlu0 %1387  ;;  %v1622_v61 = vrot.slane %v3503_v30, 4  ;;  %v1506_v30 = vrot.slane %v3501_v14, 4 }
 0x241   : > { %v1391_v18 = vrot.slane %v1388_v6, 4 }
 0x242   : > { %v1623_v31 = vsel %vm308_vm0, %v1621_v10, %v1622_v61 }
 0x243   : > { %v3505_v40 = vpop.permute.xlu1 %1504  ;;  %v1624_v63 = vsel %vm702_vm13, %v3497_v58, %v1623_v31 }
 0x244   : > { %v3507_v7 = vpop.permute.xlu0 %1633  ;;  %v1507_v49 = vrot.slane %v3505_v40, 4 }
 0x245   : > { %v1637_v39 = vrot.slane %v3507_v7, 4 }
 0x246   : > { %v1508_v54 = vsel %vm308_vm0, %v1506_v30, %v1507_v49 }
 0x247   : > { %v1390_v20 = vpop.permute.xlu1 %1389  ;;  %v1509_v27 = vsel %vm719_vm4, %v3501_v14, %v1508_v54 }
 0x248   : > { %v3509_v33 = vpop.permute.xlu0 %1518  ;;  %v1392_v3 = vrot.slane %v1390_v20, 4  ;;  %v1594_v20 = vadd.f32 %v1592_v1, %v1578_v53 }
 0x249   : > { %v1522_v9 = vrot.slane %v3509_v33, 4 }
 0x24a   : > { %v1393_v47 = vsel %vm308_vm0, %v1391_v18, %v1392_v3  ;;  %v1610_v51 = vadd.f32 %v1608_v41, %v1594_v20 }
 0x24b   : > { %v3511_v12 = vpop.permute.xlu1 %1635  ;;  %v1394_v13 = vsel %vm736_vm5, %v1388_v6, %v1393_v47 }
 0x24c   : > { %v3513_v56 = vpop.permute.xlu0 %1403  ;;  %v1638_v59 = vrot.slane %v3511_v12, 4  ;;  %v1626_v55 = vadd.f32 %v1624_v63, %v1610_v51 }
 0x24d   : > { %v1407_v11 = vrot.slane %v3513_v56, 4 }
 0x24e   : > { %v1639_v17 = vsel %vm308_vm0, %v1637_v39, %v1638_v59 }
 0x24f   : > { %v3515_v43 = vpop.permute.xlu1 %1520  ;;  %v1640_v53 = vsel %vm719_vm4, %v3507_v7, %v1639_v17  ;;  %v1760_v7 = vsub.s32 3, %v3934_v21 }
 0x250   : > { %v3517_v24 = vpop.permute.xlu0 %1649  ;;  %v1523_v5 = vrot.slane %v3515_v43, 4  ;;  %v1396_v43 = vadd.f32 %v1394_v13, %v3489_v44  ;;  %v1495_v44 = vadd.f32 %v1493_v36, %v1479_v62  ;;  %v1642_v45 = vadd.f32 %v1640_v53, %v1626_v55 }
 0x251   : > { %v1653_v3 = vrot.slane %v3517_v24, 4 }
 0x252   : > { %v1524_v46 = vsel %vm308_vm0, %v1522_v9, %v1523_v5 }
 0x253   : > { %v1406_v48 = vpop.permute.xlu1 %1405  ;;  %v1525_v14 = vsel %vm736_vm5, %v3509_v33, %v1524_v46 }
 0x254   : > { %v3523_v28 = vpop.permute.xlu0 %1534  ;;  %v1408_v52 = vrot.slane %v1406_v48, 4 }
 0x255   : > { %v1538_v19 = vrot.slane %v3523_v28, 4 }
 0x256   : > { %v1409_v40 = vsel %vm308_vm0, %v1407_v11, %v1408_v52 }
 0x257   : > { %v1652_v16 = vpop.permute.xlu1 %1651  ;;  %v1410_v48 = vsel %vm753_vm3, %v3513_v56, %v1409_v40 }
 0x258   : > { %v1420_v22 = vpop.permute.xlu0 %1419  ;;  %v1412_v12 = vadd.f32 %v1410_v48, %v1396_v43  ;;  %v1654_v56 = vrot.slane %v1652_v16, 4  ;;  %v1511_v16 = vadd.f32 %v1509_v27, %v1495_v44 }
 0x259   : > { %v1423_v0 = vrot.slane %v1420_v22, 4 }
 0x25a   : > { %v1655_v18 = vsel %vm308_vm0, %v1653_v3, %v1654_v56  ;;  %v1527_v2 = vadd.f32 %v1525_v14, %v1511_v16 }
 0x25b   : > { %v1537_v15 = vpop.permute.xlu1 %1536 }
 0x25c   : > { %v1666_v29 = vpop.permute.xlu0 %1665  ;;  %v1539_v32 = vrot.slane %v1537_v15, 4  ;;  %v1764_v15 = vsub.s32 7, %v3934_v21 }
 0x25d   : > { %v1669_v52 = vrot.slane %v1666_v29, 4 }
 0x25e   : > { %v1540_v1 = vsel %vm308_vm0, %v1538_v19, %v1539_v32 }
 0x25f   : > { %v1422_v6 = vpop.permute.xlu1 %1421  ;;  %v1541_v33 = vsel %vm753_vm3, %v3523_v28, %v1540_v1 }
 0x260   : > { %v1424_v25 = vrot.slane %v1422_v6, 4  ;;  %v1551_v26 = vpop.permute.xlu0 %1550  ;;  %v1543_v41 = vadd.f32 %v1541_v33, %v1527_v2 }
 0x261   : > { %v1554_v61 = vrot.slane %v1551_v26, 4 }
 0x262   : > { %v1425_v4 = vsel %vm308_vm0, %v1423_v0, %v1424_v25 }
 0x263   : > { %v1426_v58 = vsel %vm770_vm8, %v1420_v22, %v1425_v4  ;;  %v1668_v38 = vpop.permute.xlu1 %1667 }
 0x264   : > { %v1428_v60 = vadd.f32 %v1426_v58, %v1412_v12  ;;  %v1670_v35 = vrot.slane %v1668_v38, 4  ;;  %v1682_v20 = vpop.permute.xlu0 %1681 }
 0x266   : > { %v1750_v34 = vrot.slane %v1428_v60, %v1738_v37  ;;  %v1754_v22 = vrot.slane %v1428_v60, %v1742_v50  ;;  %v1671_v47 = vsel %vm308_vm0, %v1669_v52, %v1670_v35  ;;  %v1656_v50 = vsel %vm736_vm5, %v3517_v24, %v1655_v18 }
 0x267   : > { %v1553_v49 = vpop.permute.xlu1 %1552  ;;  %v1672_v10 = vsel %vm753_vm3, %v1666_v29, %v1671_v47  ;;  %v1658_v30 = vadd.f32 %v1656_v50, %v1642_v45 }
 0x268   : > { %v1555_v11 = vrot.slane %v1553_v49, 4  ;;  %v1787_v57 = vsel %vm535_vm7, %v3475_v42, %v1750_v34  ;;  %v1788_v37 = vsel %vm535_vm7, %v3479_v8, %v1754_v22  ;;  %v1685_v8 = vrot.slane %v1682_v20, 4 }
 0x269   : > { %v1674_v24 = vadd.f32 %v1672_v10, %v1658_v30 }
 0x26a   : > { %v1556_v28 = vsel %vm308_vm0, %v1554_v61, %v1555_v11 }
 0x26b   : > { %v1557_v23 = vsel %vm770_vm8, %v1551_v26, %v1556_v28  ;;  %v1684_v42 = vpop.permute.xlu1 %1683 }
 0x26c   : > { %v1559_v40 = vadd.f32 %v1557_v23, %v1543_v41  ;;  %v1686_v13 = vrot.slane %v1684_v42, 4 }
 0x26e   : > { %v1687_v5 = vsel %vm308_vm0, %v1685_v8, %v1686_v13  ;;  %v1761_v62 = vrot.slane %v1559_v40, %v1760_v7  ;;  %v1765_v51 = vrot.slane %v1559_v40, %v1764_v15 }
 0x26f   : > { %v1688_v31 = vsel %vm770_vm8, %v1682_v20, %v1687_v5 }
 0x270   : > { %v1690_v54 = vadd.f32 %v1688_v31, %v1674_v24  ;;  %v1789_v21 = vsel %vm537_vm9, %v1787_v57, %v1761_v62  ;;  %v1790_v29 = vsel %vm537_vm9, %v1788_v37, %v1765_v51 }
 0x272   : > { %v1772_v36 = vrot.slane %v1690_v54, %v1760_v7  ;;  %v1776_v9 = vrot.slane %v1690_v54, %v1764_v15 }
 0x273   : > { %v1797_v6 = vpop.permute.xlu0 %1796 }
 0x274   : > { %v1791_v59 = vsel %vm539_vm10, %v1789_v21, %v1772_v36  ;;  %v1792_v48 = vsel %vm539_vm10, %v1790_v29, %v1776_v9 }
 0x275   : > { %v1799_v43 = vmul.f32 %v1797_v6, %v1791_v59  ;;  %v1800_v0 = vmul.f32 %v1797_v6, %v1792_v48 }
 0x277   : > { %v1824_v12 = vpop.permute.xlu0 %1823 }
 0x278   : > { %v1805_v32 = vpop.permute.xlu1 %1804 }
 0x279   : > { %v1807_v25 = vadd.f32 %v1805_v32, %v1799_v43  ;;  %v1808_v63 = vadd.f32 %v1805_v32, %v1800_v0 }
 0x27b   : > { %vm1809_vm0 = vcmp.ge.f32.partialorder %v1807_v25, 0.0  ;;  %vm1810_vm11 = vcmp.ge.f32.partialorder %v1808_v63, 0.0 }
 0x27c   : > { %v1815_v27 = vpop.permute.xlu1 %1814 }
 0x27d   : > { %v1817_v39 = vmul.f32 %v1815_v27, %v1807_v25  ;;  %v1818_v46 = vmul.f32 %v1815_v27, %v1808_v63 }
 0x27f   : > { %v1819_v19 = vsel %vm1809_vm0, %v1807_v25, %v1817_v39  ;;  %v1820_v56 = vsel %vm1810_vm11, %v1808_v63, %v1818_v46 }
 0x280   : > { %v1826_v4 = vmul.f32 %v1824_v12, %v1819_v19  ;;  %v1827_v44 = vmul.f32 %v1824_v12, %v1820_v56 }
 0x282   : > { %1828 = vst [vmem:[%s298_s4] sm:$0xff] %v1826_v4  ;;  %1829 = vst [vmem:[%s298_s4 + $0x8] sm:$0xff] %v1827_v44 }
 0x283   : > { %2175 = shalt.err (!%p2172_p1)
}
 0x284   : > { %s2176_s29 = scalar_lea.hbm %s3606_s24, 256  ;;  %s2180_s9 = scalar_lea.hbm %s3967_s21, 512 }
 0x285   : > { %p2177_p2 = scmp.ne.s32.totalorder %s3606_s24, %s2176_s29  ;;  %p2181_p9 = scmp.lt.s32.totalorder %s3606_s24, %s3967_s21 }
 0x286   : > { %p2182_p5 = scmp.lt.s32.totalorder %s2180_s9, %s2176_s29 }
 0x287   : > { %p2178_p3 = pnand %p2177_p2, %p3968_p12 }
 0x288   : > { %p2183_p6 = por %p2182_p5, %p2181_p9 }
 0x289   : > { %p2179_p4 = pneg %p2178_p3 }
 0x28b   : > { %p2184_p10 = pnand %p2183_p6, %p2179_p4 }
 0x28d   : > { %2187 = shalt.err (!%p2184_p10)
}
 0x28e   : > { %2055 = dma.vmem_to_hbm [thread:$0]  (%p3968_p12), %s1846_s27, 256, %s3606_s24, %s1831_s15  }
 0x28f PF: > { %s3969_s17 = sld [smem:[#allocation15_spill]] }
 0x290   : > { %s3970_s16 = sld [smem:[#allocation12_spill]] }
 0x291   : > { %s3971_s1 = sld [smem:[#allocation20_spill]] }
 0x295   : > { %p2072_p0 = scmp.ge.s32.totalorder %s3969_s17, 2 }
 0x296   : > { %s1857_s28 = sand.u32 1, %s3970_s16  }
 0x297   : > { %p3972_p7 = scmp.ne.s32.totalorder %s3971_s1, 0  ;;  %s1858_s2 = scalar_lea.sflag [#allocation4], %s1857_s28 }
 0x299   : > { %p2065_p8 = pnand %p2072_p0, %p3972_p7 }
 0x29b   : > { %p2066_p11 = pneg %p2065_p8 }
 0x29d   : > { %2213 = dma.done.wait (%p2066_p11), %s1858_s2, 256  }
 0x29e   : > { %2215 = vsyncadd (%p2066_p11), %s1858_s2, 4294967040  ;;  %s3973_s27 = sld [smem:[#allocation17_spill]] }
 0x29f   : > { %s3974_s24 = sld [smem:[#allocation13_spill]] }
 0x2a0   : > { %s3975_s25 = sld [smem:[#allocation14_spill]] }
 0x2a1   : > { %s3976_s26 = sld [smem:[#allocation18_spill]] }
 0x2a4   : > { %p19_p13 = scmp.ge.s32.totalorder %s3973_s27, 4  }
 0x2a6   :  { %21 = sbr.rel (!%p19_p13) target bundleno = 14 (0xe), region = 93 }
 0x2ab   :  { %1863 = vsyncpa [#allocation4], 1 }
 0x2ac   :  { %1865 = vsyncpa [#allocation4 + $0x1], 1 }
 0x2ad   :  { %1866 = vsyncpa [#allocation5], 1 }
 0x2ae   :  { %1868 = vsyncpa [#allocation5 + $0x1], 1 }
 0x2af   :  { %1869 = vsyncpa [#allocation7], 1 }

</bundles_post_ra>
